<compile_context>
chip_gen: v6e
topology: v6e:2x2x1
jax: 0.10.0
libtpu: 0.0.40
codegen_flags: <defaults>
</compile_context>

<pallas_src>
import functools

import jax
import jax.numpy as jnp
from jax import lax
from jax.experimental import pallas as pl
from jax.experimental.pallas import tpu as pltpu


_SENTINEL = 1e15  # padded-target "squared norm": always loses the min.


def _round_up(x, m):
    return -(-x // m) * m


def _cdiv(a, b):
    return -(-a // b)


def _tensorcores_per_chip():
    # v7x has 2 TensorCores per chip; v5e/v6e have 1.  Only split the pred axis
    # beyond what the batch provides when there is a second core to feed.
    try:
        kind = (getattr(jax.devices()[0], "device_kind", "") or "").lower()
        if "v7" in kind:
            return 2
    except Exception:
        pass
    return 1


def _chamfer_min_kernel(p_ref, t_ref, o_ref, min_sc, *, chunk, n_chunks):
    """Grid = (B, pred tiles, target tiles); j (target tiles) is 'arbitrary'.

    p_ref  : (1, 8, tn)  pred tile, coordinate-major columns:
                         [-2px, -2py, -2pz, 1, |p|^2, 0, 0, 0]
    t_ref  : (1, tm, 8)  target tile, points-major rows:
                         [tx, ty, tz, |t|^2, 1, 0, 0, 0]
                         (padded rows: [0,0,0, SENTINEL, 0, 0,0,0])
    o_ref  : (1, 1, tn)  per-pred-point min Euclidean distance (lane-dense)
    min_sc : (1, tn)     running min of squared distances across j
    """
    j = pl.program_id(2)
    p = p_ref[0]                                                 # (8, tn)

    def body(c, carry):
        start = pl.multiple_of(c * chunk, chunk)
        t = t_ref[0, pl.ds(start, chunk), :]                     # (chunk, 8)
        # One MXU contraction yields |p|^2 + |t|^2 - 2 p.t directly.
        d2 = jnp.dot(t, p,
                     preferred_element_type=jnp.float32,
                     precision=lax.Precision.HIGHEST)            # (chunk, tn)
        # Sublane min-reduce; chunk*tn is small enough to stay in vregs.
        return jnp.minimum(carry, jnp.min(d2, axis=0, keepdims=True))

    init = jnp.full((1, p.shape[1]), 3.0e38, dtype=jnp.float32)
    tile_min = lax.fori_loop(0, n_chunks, body, init,
                             unroll=min(n_chunks, 8))

    @pl.when(j == 0)
    def _():
        min_sc[...] = tile_min

    @pl.when(j > 0)
    def _():
        min_sc[...] = jnp.minimum(min_sc[...], tile_min)

    @pl.when(j == pl.num_programs(2) - 1)
    def _():
        # Clamp deferred to the tiny (1, tn) running min (min/clamp commute);
        # cancellation in |p|^2 + |t|^2 - 2 p.t can dip slightly below 0.
        o_ref[...] = jnp.sqrt(jnp.maximum(min_sc[...], 0.0))[None]


def partial_chamfer_loss(pred, target, *, num_samples=1000, key=None):
    """pred: (B, N, 3), target: (B, M, 3) -> scalar partial Chamfer loss."""
    assert pred.ndim == 3 and target.ndim == 3, "Input tensors must be 3-dimensional"
    assert pred.shape[0] == target.shape[0], "Batch sizes must match"
    assert pred.shape[2] == 3 and target.shape[2] == 3
    B, N, _ = pred.shape
    M = target.shape[1]

    # Random subsampling of pred (glue; mirrors torch.randperm(N)[:num_samples],
    # same indices for every batch element).
    # TODO(synk): jax.random.permutation will not reproduce torch.randperm
    # indices bit-for-bit; the subsampled loss differs from torch for N > num_samples.
    if N > num_samples:
        if key is None:
            key = jax.random.PRNGKey(0)
        idx = jax.random.permutation(key, N)[:num_samples]
        pred = pred[:, idx, :]
        N = num_samples

    # ---- tile selection -----------------------------------------------------
    cores = _tensorcores_per_chip()

    # Pred tiles: lane axis, multiple of 128, up to 512 points per tile.
    n128 = _round_up(N, 128)
    num_i = _cdiv(n128, 512)
    tn = _round_up(_cdiv(n128, num_i), 128)
    if cores > 1 and B * num_i < cores and n128 >= 2 * 128:   # v7x only: feed both TCs
        num_i = 2
        tn = _round_up(_cdiv(n128, 2), 128)
    Np = tn * num_i

    # In-kernel target chunk: keep the (chunk, tn) matmul result register
    # resident (~32 vregs) so it never round-trips VMEM.
    chunk = max(8, (min(32768 // tn, 256) // 8) * 8)
    m8 = _round_up(M, 8)
    if m8 <= chunk:
        chunk = m8
        tm = m8
        num_j = 1
    else:
        m_pad = _round_up(M, chunk)
        # Resident target tile capped at ~4 MiB (32 B per padded point); for
        # typical cloud sizes this collapses the j axis to a single tile.
        tm_cap = max(chunk, ((4 << 20) // 32) // chunk * chunk)
        num_j = _cdiv(m_pad, tm_cap)
        tm = _round_up(_cdiv(m_pad, num_j), chunk)
    Mp = tm * num_j
    n_chunks = tm // chunk

    # ---- padding & layout (norms folded into the MXU contraction) -----------
    pred_f = pred.astype(jnp.float32)
    target_f = target.astype(jnp.float32)

    # Pred columns (coordinate-major, points on the 128-wide lane axis):
    #   [-2px, -2py, -2pz, 1, |p|^2, 0, 0, 0]; padded points are all-zero
    #   (their min is 0 and they are dropped before the mean).
    p_sq = jnp.sum(pred_f * pred_f, axis=-1, keepdims=True)               # (B, N, 1)
    pred_cols = jnp.concatenate(
        [-2.0 * pred_f, jnp.ones_like(p_sq), p_sq,
         jnp.zeros((B, N, 3), jnp.float32)], axis=-1)                     # (B, N, 8)
    pred_cols = jnp.pad(pred_cols, ((0, 0), (0, Np - N), (0, 0)))         # (B, Np, 8)
    pred_t = jnp.transpose(pred_cols, (0, 2, 1))                          # (B, 8, Np)

    # Target rows (points-major, K=8 on lanes):
    #   [tx, ty, tz, |t|^2, 1, 0, 0, 0]; padded rows are [0,0,0, SENTINEL, 0, ...]
    #   so their "squared distance" is SENTINEL and never wins the min.
    t_sq = jnp.sum(target_f * target_f, axis=-1, keepdims=True)           # (B, M, 1)
    coords = jnp.pad(target_f, ((0, 0), (0, Mp - M), (0, 0)))
    t_sq_p = jnp.pad(t_sq, ((0, 0), (0, Mp - M), (0, 0)),
                     constant_values=_SENTINEL)
    ones_p = jnp.pad(jnp.ones_like(t_sq), ((0, 0), (0, Mp - M), (0, 0)))
    target_rows = jnp.concatenate(
        [coords, t_sq_p, ones_p, jnp.zeros((B, Mp, 3), jnp.float32)],
        axis=-1)                                                          # (B, Mp, 8)

    kernel = functools.partial(_chamfer_min_kernel, chunk=chunk, n_chunks=n_chunks)
    min_dist = pl.pallas_call(
        kernel,
        out_shape=jax.ShapeDtypeStruct((B, 1, Np), jnp.float32),
        grid_spec=pltpu.PrefetchScalarGridSpec(
            num_scalar_prefetch=0,
            grid=(B, num_i, num_j),
            in_specs=[
                pl.BlockSpec((1, 8, tn), lambda b, i, j: (b, 0, i)),
                pl.BlockSpec((1, tm, 8), lambda b, i, j: (b, j, 0)),
            ],
            out_specs=pl.BlockSpec((1, 1, tn), lambda b, i, j: (b, 0, i)),
            scratch_shapes=[pltpu.VMEM((1, tn), jnp.float32)],
        ),
        compiler_params=pltpu.CompilerParams(
            dimension_semantics=("parallel", "parallel", "arbitrary"),
            vmem_limit_bytes=32 * 1024 * 1024),
    )(pred_t, target_rows)

    # Final mean over valid pred points (matches torch.mean over (B, N)).
    return jnp.mean(min_dist[:, 0, :N])


def _reference_loss(pred, target):
    diff = pred[:, :, None, :] - target[:, None, :, :]
    dist = jnp.sqrt(jnp.sum(diff * diff, axis=-1))
    return jnp.mean(jnp.min(dist, axis=2))


if __name__ == "__main__":
    key = jax.random.PRNGKey(0)
    k1, k2, k3, k4 = jax.random.split(key, 4)

    # Tile-aligned case (N <= num_samples: no subsampling).
    B, N, M = 2, 256, 384
    pred = jax.random.normal(k1, (B, N, 3), dtype=jnp.float32)
    target = jax.random.normal(k2, (B, M, 3), dtype=jnp.float32)
    loss = jax.block_until_ready(partial_chamfer_loss(pred, target))
    ref = jax.block_until_ready(_reference_loss(pred, target))
    assert jnp.allclose(loss, ref, rtol=1e-3, atol=1e-4), (loss, ref)

    # Non-tile-aligned case (exercises pred zero-padding and target sentinel rows).
    pred2 = jax.random.normal(k3, (B, 200, 3), dtype=jnp.float32)
    target2 = jax.random.normal(k4, (B, 300, 3), dtype=jnp.float32)
    loss2 = jax.block_until_ready(partial_chamfer_loss(pred2, target2))
    ref2 = jax.block_until_ready(_reference_loss(pred2, target2))
    assert jnp.allclose(loss2, ref2, rtol=1e-3, atol=1e-4), (loss2, ref2)

    # Subsampling path (random subset; just check it runs and is finite).
    loss3 = jax.block_until_ready(
        partial_chamfer_loss(pred, target, num_samples=128, key=k1))
    assert jnp.isfinite(loss3)

    print("KERNEL_OK")
</pallas_src>

<mosaic_0001>
module attributes {stable_mosaic.version = 11 : i64} {
  func.func @_chamfer_min_kernel(%arg0: i32, %arg1: i32, %arg2: i32, %arg3: memref<1x8x256xf32, #tpu.memory_space<vmem>>, %arg4: memref<1x384x8xf32, #tpu.memory_space<vmem>>, %arg5: memref<1x1x256xf32, #tpu.memory_space<vmem>>, %arg6: memref<1x256xf32, #tpu.memory_space<vmem>>) attributes {dimension_semantics = [#tpu.dimension_semantics<parallel>, #tpu.dimension_semantics<parallel>, #tpu.dimension_semantics<arbitrary>], iteration_bounds = array<i64: 2, 1, 1>, scalar_prefetch = 0 : i64, scratch_operands = 1 : i64, tpu.core_type = #tpu.core_type<tc>, window_params = [{transform_indices = @transform_0, window_bounds = array<i64: 1, 8, 256>}, {transform_indices = @transform_1, window_bounds = array<i64: 1, 384, 8>}, {transform_indices = @transform_2, window_bounds = array<i64: 1, 1, 256>}]} {
    %c0 = arith.constant 0 : index
    %c0_0 = arith.constant 0 : index
    %c0_1 = arith.constant 0 : index
    %0 = vector.load %arg3[%c0, %c0_0, %c0_1] : memref<1x8x256xf32, #tpu.memory_space<vmem>>, vector<1x8x256xf32>
    %1 = vector.shape_cast %0 : vector<1x8x256xf32> to vector<8x256xf32>
    %cst = arith.constant 3.000000e+38 : f32
    %2 = vector.broadcast %cst : f32 to vector<1x256xf32>
    %c0_i32 = arith.constant 0 : i32
    %c128_i32 = arith.constant 128 : i32
    %3 = arith.muli %c0_i32, %c128_i32 : i32
    %4 = tpu.assume_multiple %3, 128 : i32
    %c0_2 = arith.constant 0 : index
    %5 = arith.index_cast %4 : i32 to index
    %c0_3 = arith.constant 0 : index
    %6 = vector.load %arg4[%c0_2, %5, %c0_3] : memref<1x384x8xf32, #tpu.memory_space<vmem>>, vector<1x128x8xf32>
    %7 = vector.shape_cast %6 : vector<1x128x8xf32> to vector<128x8xf32>
    %cst_4 = arith.constant dense<0.000000e+00> : vector<128x256xf32>
    %8 = tpu.matmul %7, %1, %cst_4 {dimension_numbers = #tpu.dot_dimension_numbers<[1], [0], [0], [1], [0, 0, 1, 1], [], []>, precision = #tpu.contract_precision<fp32>} : vector<128x8xf32>, vector<8x256xf32>, vector<128x256xf32> -> vector<128x256xf32>
    %cst_5 = arith.constant dense<0x7F800000> : vector<256xf32>
    %9 = vector.multi_reduction <minimumf>, %8, %cst_5 [0] : vector<128x256xf32> to vector<256xf32>
    %10 = vector.shape_cast %9 : vector<256xf32> to vector<1x256xf32>
    %11 = arith.minimumf %2, %10 : vector<1x256xf32>
    %c1_i32 = arith.constant 1 : i32
    %c128_i32_6 = arith.constant 128 : i32
    %12 = arith.muli %c1_i32, %c128_i32_6 : i32
    %13 = tpu.assume_multiple %12, 128 : i32
    %c0_7 = arith.constant 0 : index
    %14 = arith.index_cast %13 : i32 to index
    %c0_8 = arith.constant 0 : index
    %15 = vector.load %arg4[%c0_7, %14, %c0_8] : memref<1x384x8xf32, #tpu.memory_space<vmem>>, vector<1x128x8xf32>
    %16 = vector.shape_cast %15 : vector<1x128x8xf32> to vector<128x8xf32>
    %cst_9 = arith.constant dense<0.000000e+00> : vector<128x256xf32>
    %17 = tpu.matmul %16, %1, %cst_9 {dimension_numbers = #tpu.dot_dimension_numbers<[1], [0], [0], [1], [0, 0, 1, 1], [], []>, precision = #tpu.contract_precision<fp32>} : vector<128x8xf32>, vector<8x256xf32>, vector<128x256xf32> -> vector<128x256xf32>
    %cst_10 = arith.constant dense<0x7F800000> : vector<256xf32>
    %18 = vector.multi_reduction <minimumf>, %17, %cst_10 [0] : vector<128x256xf32> to vector<256xf32>
    %19 = vector.shape_cast %18 : vector<256xf32> to vector<1x256xf32>
    %20 = arith.minimumf %11, %19 : vector<1x256xf32>
    %c2_i32 = arith.constant 2 : i32
    %c128_i32_11 = arith.constant 128 : i32
    %21 = arith.muli %c2_i32, %c128_i32_11 : i32
    %22 = tpu.assume_multiple %21, 128 : i32
    %c0_12 = arith.constant 0 : index
    %23 = arith.index_cast %22 : i32 to index
    %c0_13 = arith.constant 0 : index
    %24 = vector.load %arg4[%c0_12, %23, %c0_13] : memref<1x384x8xf32, #tpu.memory_space<vmem>>, vector<1x128x8xf32>
    %25 = vector.shape_cast %24 : vector<1x128x8xf32> to vector<128x8xf32>
    %cst_14 = arith.constant dense<0.000000e+00> : vector<128x256xf32>
    %26 = tpu.matmul %25, %1, %cst_14 {dimension_numbers = #tpu.dot_dimension_numbers<[1], [0], [0], [1], [0, 0, 1, 1], [], []>, precision = #tpu.contract_precision<fp32>} : vector<128x8xf32>, vector<8x256xf32>, vector<128x256xf32> -> vector<128x256xf32>
    %cst_15 = arith.constant dense<0x7F800000> : vector<256xf32>
    %27 = vector.multi_reduction <minimumf>, %26, %cst_15 [0] : vector<128x256xf32> to vector<256xf32>
    %28 = vector.shape_cast %27 : vector<256xf32> to vector<1x256xf32>
    %29 = arith.minimumf %20, %28 : vector<1x256xf32>
    %c3_i32 = arith.constant 3 : i32
    %c0_i32_16 = arith.constant 0 : i32
    %30 = arith.cmpi eq, %arg2, %c0_i32_16 : i32
    %31 = arith.extui %30 : i1 to i32
    %c0_i32_17 = arith.constant 0 : i32
    %32 = arith.cmpi ne, %31, %c0_i32_17 : i32
    scf.if %32 {
      %c0_22 = arith.constant 0 : index
      %c0_23 = arith.constant 0 : index
      %39 = vector.load %arg6[%c0_22, %c0_23] : memref<1x256xf32, #tpu.memory_space<vmem>>, vector<1x256xf32>
      tpu.vector_store %arg6[%c0_22, %c0_23], %29 {strides = array<i32>} : memref<1x256xf32, #tpu.memory_space<vmem>>, vector<1x256xf32>,
    } else {
    }
    %c0_i32_18 = arith.constant 0 : i32
    %33 = arith.cmpi sgt, %arg2, %c0_i32_18 : i32
    %34 = arith.extui %33 : i1 to i32
    %c0_i32_19 = arith.constant 0 : i32
    %35 = arith.cmpi ne, %34, %c0_i32_19 : i32
    scf.if %35 {
      %c0_22 = arith.constant 0 : index
      %c0_23 = arith.constant 0 : index
      %39 = vector.load %arg6[%c0_22, %c0_23] : memref<1x256xf32, #tpu.memory_space<vmem>>, vector<1x256xf32>
      %40 = arith.minimumf %39, %29 : vector<1x256xf32>
      %c0_24 = arith.constant 0 : index
      %c0_25 = arith.constant 0 : index
      %41 = vector.load %arg6[%c0_24, %c0_25] : memref<1x256xf32, #tpu.memory_space<vmem>>, vector<1x256xf32>
      tpu.vector_store %arg6[%c0_24, %c0_25], %40 {strides = array<i32>} : memref<1x256xf32, #tpu.memory_space<vmem>>, vector<1x256xf32>,
    } else {
    }
    %c0_i32_20 = arith.constant 0 : i32
    %36 = arith.cmpi eq, %arg2, %c0_i32_20 : i32
    %37 = arith.extui %36 : i1 to i32
    %c0_i32_21 = arith.constant 0 : i32
    %38 = arith.cmpi ne, %37, %c0_i32_21 : i32
    scf.if %38 {
      %c0_22 = arith.constant 0 : index
      %c0_23 = arith.constant 0 : index
      %39 = vector.load %arg6[%c0_22, %c0_23] : memref<1x256xf32, #tpu.memory_space<vmem>>, vector<1x256xf32>
      %cst_24 = arith.constant 0.000000e+00 : f32
      %40 = vector.broadcast %cst_24 : f32 to vector<1x256xf32>
      %41 = arith.maximumf %39, %40 : vector<1x256xf32>
      %42 = math.sqrt %41 : vector<1x256xf32>
      %43 = vector.shape_cast %42 : vector<1x256xf32> to vector<1x1x256xf32>
      %c0_25 = arith.constant 0 : index
      %c0_26 = arith.constant 0 : index
      %c0_27 = arith.constant 0 : index
      %44 = vector.load %arg5[%c0_25, %c0_26, %c0_27] : memref<1x1x256xf32, #tpu.memory_space<vmem>>, vector<1x1x256xf32>
      tpu.vector_store %arg5[%c0_25, %c0_26, %c0_27], %43 {strides = array<i32>} : memref<1x1x256xf32, #tpu.memory_space<vmem>>, vector<1x1x256xf32>,
    } else {
    }
    return
  }
  func.func @transform_0(%arg0: i32, %arg1: i32, %arg2: i32) -> (i32, i32, i32) {
    %c0_i32 = arith.constant 0 : i32
    %c0_i32_0 = arith.constant 0 : i32
    return %arg0, %c0_i32, %arg1 : i32, i32, i32
  }
  func.func @transform_1(%arg0: i32, %arg1: i32, %arg2: i32) -> (i32, i32, i32) {
    %c0_i32 = arith.constant 0 : i32
    %c0_i32_0 = arith.constant 0 : i32
    return %arg0, %arg2, %c0_i32 : i32, i32, i32
  }
  func.func @transform_2(%arg0: i32, %arg1: i32, %arg2: i32) -> (i32, i32, i32) {
    %c0_i32 = arith.constant 0 : i32
    %c0_i32_0 = arith.constant 0 : i32
    return %arg0, %c0_i32, %arg1 : i32, i32, i32
  }
}

</mosaic_0001>

<bundles_post_ra>
// kernel: tpu_custom_call.1
= control target key start
LH: loop header
LB: loop body
LE: loop exit
PB: predicated region body
PF: predicated region fallthrough
CT: control target
= control target key end

     0   :  { %7 = vsyncpa [#allocation4], 0  ;;  %s6432_s0 = inlined_call_operand.vmem [shape: f32[2,8,256], index: 0, kind: input, shape index: {}]   ;;  %s6433_s1 = inlined_call_operand.vmem [shape: f32[2,384,8], index: 1, kind: input, shape index: {}]   ;;  %s6434_s2 = inlined_call_operand.hbm [shape: f32[2,1,256], index: 2, kind: output, shape index: {}]  }
   0x1   :  { %9 = vsyncpa [#allocation4 + $0x1], 0  ;;  %s4536_s9 = smov 0   ;;  %s4538_s10 = smov 0  }
   0x2   :  { %s4540_s11 = smov 0   ;;  %s4542_s12 = smov 0  }
   0x3   :  { %s4544_s13 = smov 0   ;;  %s4546_s14 = smov 0  }
   0x4 LB: > { %s4332_s15 = sadd.s32 4294967295, %s4516_s14   ;;  %s4333_s16 = sadd.s32 4294967294, %s4516_s14   ;;  %s4516_s14 = sphi %s4546_s14, %s15_s14   ;;  %s4512_s13 = sphi %s4544_s13, %s6639_s13   ;;  %s4508_s12 = sphi %s4542_s12, %s6638_s12   ;;  %s4504_s11 = sphi %s4540_s11, %s6637_s11   ;;  %s4500_s10 = sphi %s4538_s10, %s6636_s10   ;;  %s4496_s9 = sphi %s4536_s9, %s6635_s9  }
   0x5   : > { %s34_s17 = sadd.s32 1, %s4512_s13  ;;  %s99_s18 = sadd.s32 1, %s4504_s11 }
   0x6   : > { %p36_p0 = scmp.ge.s32.totalorder %s34_s17, 2  ;;  %p109_p1 = scmp.ne.s32.totalorder %s4504_s11, %s4500_s10 }
   0x7   : > { %p110_p2 = scmp.eq.s32.totalorder %s4332_s15, 1  ;;  %p115_p3 = scmp.ne.s32.totalorder %s4500_s10, %s4496_s9 }
   0x8   : > { %s6641_s17 = smov (%p36_p0, %s34_s17), 0  ;;  %p116_p5 = scmp.eq.s32.totalorder %s4333_s16, 1 }
   0x9   : > { %p4576_p4 = por %p110_p2, %p109_p1  ;;  %s94_s20 = ssub.s32 %s4512_s13, %s6641_s17 }
   0xa   : > { %p4336_p6 = scmp.ge.s32.totalorder %s4516_s14, 1  ;;  %p97_p7 = scmp.eq.s32.totalorder %s94_s20, 0 }
   0xb   : > { %p4583_p8 = por %p116_p5, %p115_p3  ;;  %p160_p9 = scmp.lt.s32.totalorder %s4516_s14, 3 }
   0xc   : > { %s4589_s22 = scalar_select %p97_p7, %s4504_s11, %s99_s18  }
   0xd   : > { %p161_p10 = pnand %p4336_p6, %p160_p9 }
   0xf   : > { %164 = sbr.rel (%p161_p10) target bundleno = 875 (0x36b), region = 28 }
  0x14   : > { %p196_p11 = scmp.lt.s32.totalorder %s4508_s12, 1  ;;  %v6445_v0 = vmov 0.0   ;;  %vm234_vm0 = vcmask 64512   ;;  %s192_s4 = sand.u32 1, %s4500_s10  }
  0x15   : > { %349 = vmatprep.mubr.f32.mxu0 %v6445_v0  ;;  %600 = vmatprep.mubr.f32.mxu1 %v6445_v0  ;;  %s4337_s5 = sshll.u32 %s192_s4, 1  ;;  %s4379_s6 = sshll.u32 %s4508_s12, 5 }
  0x16   : > { %s197_s23 = scalar_select %p196_p11, %s4508_s12, 1 }
  0x17   : > { %s194_s7 = scalar_lea.vmem [#allocation3], %s4337_s5  ;;  %s6390_s18 = scalar_lea.hbm %s6434_s2, %s4379_s6 }
  0x18   : > { %s4378_s24 = sshll.u32 %s197_s23, 4  ;;  %s4380_s25 = smul.u32 384, %s197_s23 }
  0x19   : > { %s203_s28 = scalar_lea.vmem %s6432_s0, %s4378_s24  ;;  %s4235_s8 = sshll.u32 %s194_s7, 4  ;;  %s4236_s8 = int_to_ptr.vmem [resolvable:$true] %s4235_s8 }
  0x1a   : > { %s4601_s3 = scalar_lea.vmem %s6433_s1, %s4380_s25  ;;  %v217_v1 = vld [vmem:[%s203_s28 + $0x8] sm:$0xff]  ;;  %v216_v2 = vld [vmem:[%s203_s28] sm:$0xff]  ;;  %s4219_s20 = scalar_lea.sflag [#allocation4], %s192_s4 }
  0x1b   : > { %v4603_v3 = vand.u32 4294901760, %v217_v1  ;;  %v4605_v4 = vand.u32 4294901760, %v216_v2  ;;  %v218_v5 = vld [vmem:[%s4601_s3] sm:$0xff]  ;;  %v219_v6 = vld [vmem:[%s4601_s3 + $0x8] sm:$0xff]  ;;  %v220_v7 = vld [vmem:[%s4601_s3 + $0x10] sm:$0xff]  ;;  %s4440_s23 = scalar_lea.vmem %s4236_s8, 32 }
  0x1c   : > { %v236_v8 = vsel %vm234_vm0, %v218_v5, 0  ;;  %v239_v9 = vsel %vm234_vm0, %v219_v6, 0  ;;  %v242_v10 = vsel %vm234_vm0, %v220_v7, 0  ;;  %v221_v11 = vld [vmem:[%s4601_s3 + $0x18] sm:$0xff]  ;;  %v222_v12 = vld [vmem:[%s4601_s3 + $0x20] sm:$0xff]  ;;  %v223_v24 = vld [vmem:[%s4601_s3 + $0x28] sm:$0xff]  ;;  %p4441_p12 = scmp.ne.s32.totalorder %s4236_s8, %s4440_s23 }
  0x1d   : > { %314 = vmatprep.subr.mxu0 %v4603_v3  ;;  %v4617_v13 = vsub.f32 %v217_v1, %v4603_v3  ;;  %v4620_v14 = vsub.f32 %v216_v2, %v4605_v4  ;;  %v4622_v15 = vand.u32 4294901760, %v236_v8  ;;  %v4624_v16 = vand.u32 4294901760, %v239_v9  ;;  %v224_v40 = vld [vmem:[%s4601_s3 + $0x30] sm:$0xff]  ;;  %v225_v47 = vld [vmem:[%s4601_s3 + $0x38] sm:$0xff]  ;;  %v226_v54 = vld [vmem:[%s4601_s3 + $0x40] sm:$0xff]  ;;  %s4520_s12 = smov [#allocation3]  }
  0x1e   : > { %316 = vmatpush1.msra.mxu0 %v4605_v4  ;;  %v4627_v17 = vand.u32 4294901760, %v242_v10  ;;  %v245_v18 = vsel %vm234_vm0, %v221_v11, 0  ;;  %v248_v19 = vsel %vm234_vm0, %v222_v12, 0  ;;  %v251_v34 = vsel %vm234_vm0, %v223_v24, 0  ;;  %v227_v60 = vld [vmem:[%s4601_s3 + $0x48] sm:$0xff]  ;;  %v228_v7 = vld [vmem:[%s4601_s3 + $0x50] sm:$0xff]  ;;  %p4442_p13 = pnand %p4441_p12, %p4576_p4 }
  0x1f   : > { %6529 = vst [vmem:[#allocation6_spill] sm:$0xff] %v4617_v13  ;;  %6530 = vst [vmem:[#allocation7_spill] sm:$0xff] %v4620_v14  ;;  %v4632_v20 = vand.u32 4294901760, %v4617_v13  ;;  %v4635_v21 = vand.u32 4294901760, %v4620_v14  ;;  %745 = vmatprep.subr.mxu0 %v4617_v13  ;;  %v4639_v22 = vsub.f32 %v236_v8, %v4622_v15  ;;  %v4642_v23 = vsub.f32 %v239_v9, %v4624_v16  ;;  %s4444_s24 = sshll.u32 %s4520_s12, 4  ;;  %s4445_s24 = int_to_ptr.vmem [resolvable:$false] %s4444_s24 }
  0x20   : > { %v4646_v25 = vsub.f32 %v242_v10, %v4627_v17  ;;  %v4648_v26 = vand.u32 4294901760, %v245_v18  ;;  %v4660_v33 = vand.u32 4294901760, %v248_v19  ;;  %v4676_v41 = vand.u32 4294901760, %v251_v34  ;;  %p4443_p0 = pneg %p4442_p13  ;;  %s4446_s25 = scalar_lea.vmem %s4445_s24, 64 }
  0x21   : > { %6531 = vst [vmem:[#allocation8_spill] sm:$0xff] %v4632_v20  ;;  %6532 = vst [vmem:[#allocation9_spill] sm:$0xff] %v4635_v21  ;;  %v559_v27 = vsub.f32 %v4617_v13, %v4632_v20  ;;  %v565_v28 = vsub.f32 %v4620_v14, %v4635_v21  ;;  %v352_v29 = vand.u32 4294901760, %v4639_v22  ;;  %v363_v30 = vand.u32 4294901760, %v4642_v23  ;;  %p4447_p1 = scmp.lt.s32.totalorder %s4236_s8, %s4445_s24  ;;  %p4448_p2 = scmp.lt.s32.totalorder %s4446_s25, %s4440_s23 }
  0x22   : > { %v374_v31 = vand.u32 4294901760, %v4646_v25  ;;  %v4658_v32 = vsub.f32 %v245_v18, %v4648_v26  ;;  %v4684_v45 = vsub.f32 %v248_v19, %v4660_v33  ;;  %v254_v46 = vsel %vm234_vm0, %v224_v40, 0  ;;  %v229_v19 = vld [vmem:[%s4601_s3 + $0x58] sm:$0xff] }
  0x23   : > { %v4663_v35 = vand.u32 4294901760, %v559_v27  ;;  %v4665_v36 = vand.u32 4294901760, %v565_v28  ;;  %v353_v37 = vsub.f32 %v4639_v22, %v352_v29  ;;  %v364_v38 = vsub.f32 %v4642_v23, %v363_v30  ;;  %p4449_p3 = por %p4448_p2, %p4447_p1 }
  0x24   : > { %v375_v43 = vsub.f32 %v4646_v25, %v374_v31  ;;  %v385_v44 = vand.u32 4294901760, %v4658_v32  ;;  %v4694_v48 = vsub.f32 %v251_v34, %v4676_v41  ;;  %v396_v51 = vand.u32 4294901760, %v4684_v45 }
  0x25   : > { %6533 = vst [vmem:[#allocation10_spill] sm:$0xff] %v4665_v36  ;;  %561 = vmatprep.subr.mxu1 %v4663_v35  ;;  %v354_v39 = vand.u32 4294901760, %v353_v37  ;;  %v365_v42 = vand.u32 4294901760, %v364_v38  ;;  %v4702_v52 = vand.u32 4294901760, %v254_v46  ;;  %v257_v53 = vsel %vm234_vm0, %v225_v47, 0  ;;  %p4450_p5 = pnand %p4449_p3, %p4443_p0 }
  0x26   : > { %567 = vmatpush1.msra.mxu1 %v4665_v36  ;;  %v376_v49 = vand.u32 4294901760, %v375_v43  ;;  %v386_v50 = vsub.f32 %v4658_v32, %v385_v44  ;;  %v407_v55 = vand.u32 4294901760, %v4694_v48  ;;  %v397_v57 = vsub.f32 %v4684_v45, %v396_v51 }
  0x27   : > { %355 = vmatmul.mubr.f32.vlgmr.msra.gmra.mxu0 %v354_v39  ;;  %602 = vmatmul.mubr.f32.vlgmr.msra.gmra.mxu1 %v4622_v15  ;;  %v4715_v58 = vsub.f32 %v254_v46, %v4702_v52  ;;  %v4717_v59 = vand.u32 4294901760, %v257_v53  ;;  %v260_v61 = vsel %vm234_vm0, %v226_v54, 0  ;;  %v263_v63 = vsel %vm234_vm0, %v227_v60, 0  ;;  %v230_v39 = vld [vmem:[%s4601_s3 + $0x60] sm:$0xff] }
  0x28   : > { %748 = vmatpush1.msra.mxu0 %v4620_v14  ;;  %941 = vmatprep.subr.mxu1 %v4603_v3  ;;  %v387_v56 = vand.u32 4294901760, %v386_v50  ;;  %v408_v62 = vsub.f32 %v4694_v48, %v407_v55  ;;  %v398_v1 = vand.u32 4294901760, %v397_v57  ;;  %v4732_v6 = vand.u32 4294901760, %v260_v61  ;;  %v231_v50 = vld [vmem:[%s4601_s3 + $0x68] sm:$0xff] }
  0x29   : > { %943 = vmatpush1.msra.mxu1 %v4605_v4  ;;  %360 = vmatprep.mubr.f32.mxu0 %v6445_v0  ;;  %v418_v2 = vand.u32 4294901760, %v4715_v58  ;;  %v4730_v5 = vsub.f32 %v257_v53, %v4717_v59  ;;  %v4737_v9 = vand.u32 4294901760, %v263_v63  ;;  %v266_v18 = vsel %vm234_vm0, %v228_v7, 0 }
  0x2a   : > { %607 = vmatprep.mubr.f32.mxu1 %v6445_v0  ;;  %1154 = vmatprep.subr.mxu0 %v4632_v20  ;;  %v409_v8 = vand.u32 4294901760, %v408_v62  ;;  %v4745_v12 = vsub.f32 %v260_v61, %v4732_v6  ;;  %v4751_v24 = vand.u32 4294901760, %v266_v18  ;;  %v269_v27 = vsel %vm234_vm0, %v229_v19, 0  ;;  %v232_v62 = vld [vmem:[%s4601_s3 + $0x70] sm:$0xff]  ;;  %v233_v19 = vld [vmem:[%s4601_s3 + $0x78] sm:$0xff] }
  0x2b   : > { %366 = vmatmul.mubr.f32.gmra.mxu0 %v365_v42  ;;  %609 = vmatmul.mubr.f32.gmra.mxu1 %v4624_v16  ;;  %v419_v10 = vsub.f32 %v4715_v58, %v418_v2  ;;  %v429_v11 = vand.u32 4294901760, %v4730_v5  ;;  %v4760_v38 = vsub.f32 %v263_v63, %v4737_v9  ;;  %v4765_v40 = vand.u32 4294901760, %v269_v27 }
  0x2c   : > { %371 = vmatprep.mubr.f32.mxu0 %v6445_v0  ;;  %614 = vmatprep.mubr.f32.mxu1 %v6445_v0  ;;  %v440_v37 = vand.u32 4294901760, %v4745_v12  ;;  %v272_v42 = vsel %vm234_vm0, %v230_v39, 0  ;;  %v275_v61 = vsel %vm234_vm0, %v231_v50, 0 }
  0x2d   : > { %1335 = vmatprep.subr.mxu1 %v4603_v3  ;;  %v420_v28 = vand.u32 4294901760, %v419_v10  ;;  %v430_v34 = vsub.f32 %v4730_v5, %v429_v11  ;;  %v451_v47 = vand.u32 4294901760, %v4760_v38  ;;  %v4779_v53 = vand.u32 4294901760, %v272_v42 }
  0x2e   : > { %v441_v46 = vsub.f32 %v4745_v12, %v440_v37  ;;  %v4787_v60 = vsub.f32 %v269_v27, %v4765_v40  ;;  %v4801_v10 = vand.u32 4294901760, %v275_v61 }
  0x2f   : > { %377 = vmatmul.mubr.f32.gmra.mxu0 %v376_v49  ;;  %616 = vmatmul.mubr.f32.gmra.mxu1 %v4627_v17  ;;  %v431_v43 = vand.u32 4294901760, %v430_v34  ;;  %v4774_v49 = vsub.f32 %v266_v18, %v4751_v24  ;;  %v4794_v63 = vsub.f32 %v272_v42, %v4779_v53  ;;  %v278_v18 = vsel %vm234_vm0, %v232_v62, 0 }
  0x30   : > { %382 = vmatprep.mubr.f32.mxu0 %v6445_v0  ;;  %621 = vmatprep.mubr.f32.mxu1 %v6445_v0  ;;  %v442_v54 = vand.u32 4294901760, %v441_v46  ;;  %v4813_v39 = vsub.f32 %v275_v61, %v4801_v10  ;;  %v4815_v42 = vand.u32 4294901760, %v278_v18 }
  0x31   : > { %v462_v57 = vand.u32 4294901760, %v4774_v49  ;;  %v484_v27 = vand.u32 4294901760, %v4794_v63 }
  0x33   : > { %388 = vmatmul.mubr.f32.gmra.mxu0 %v387_v56  ;;  %623 = vmatmul.mubr.f32.gmra.mxu1 %v4648_v26  ;;  %v452_v56 = vsub.f32 %v4760_v38, %v451_v47  ;;  %v463_v7 = vsub.f32 %v4774_v49, %v462_v57  ;;  %v485_v46 = vsub.f32 %v4794_v63, %v484_v27 }
  0x34   : > { %393 = vmatprep.mubr.f32.mxu0 %v6445_v0  ;;  %628 = vmatprep.mubr.f32.mxu1 %v6445_v0 }
  0x35   : > { %v486_v62 = vand.u32 4294901760, %v485_v46 }
  0x37   : > { %399 = vmatmul.mubr.f32.gmra.mxu0 %v398_v1  ;;  %630 = vmatmul.mubr.f32.gmra.mxu1 %v4660_v33  ;;  %v453_v1 = vand.u32 4294901760, %v452_v56  ;;  %v4826_v56 = vsub.f32 %v278_v18, %v4815_v42 }
  0x38   : > { %404 = vmatprep.mubr.f32.mxu0 %v6445_v0  ;;  %635 = vmatprep.mubr.f32.mxu1 %v6445_v0 }
  0x3b   : > { %410 = vmatmul.mubr.f32.gmra.mxu0 %v409_v8  ;;  %637 = vmatmul.mubr.f32.gmra.mxu1 %v4676_v41  ;;  %v473_v8 = vand.u32 4294901760, %v4787_v60 }
  0x3c   : > { %415 = vmatprep.mubr.f32.mxu0 %v6445_v0  ;;  %642 = vmatprep.mubr.f32.mxu1 %v6445_v0 }
  0x3d   : > { %v474_v34 = vsub.f32 %v4787_v60, %v473_v8 }
  0x3f   : > { %421 = vmatmul.mubr.f32.gmra.mxu0 %v420_v28  ;;  %644 = vmatmul.mubr.f32.gmra.mxu1 %v4702_v52  ;;  %v464_v28 = vand.u32 4294901760, %v463_v7  ;;  %v475_v50 = vand.u32 4294901760, %v474_v34  ;;  %v506_v7 = vand.u32 4294901760, %v4826_v56 }
  0x40   : > { %426 = vmatprep.mubr.f32.mxu0 %v6445_v0  ;;  %649 = vmatprep.mubr.f32.mxu1 %v6445_v0 }
  0x43   : > { %432 = vmatmul.mubr.f32.gmra.mxu0 %v431_v43  ;;  %651 = vmatmul.mubr.f32.gmra.mxu1 %v4717_v59  ;;  %v281_v43 = vsel %vm234_vm0, %v233_v19, 0 }
  0x44   : > { %437 = vmatprep.mubr.f32.mxu0 %v6445_v0  ;;  %656 = vmatprep.mubr.f32.mxu1 %v6445_v0  ;;  %v4828_v61 = vand.u32 4294901760, %v281_v43 }
  0x46   : > { %v4838_v19 = vsub.f32 %v281_v43, %v4828_v61 }
  0x47   : > { %443 = vmatmul.mubr.f32.gmra.mxu0 %v442_v54  ;;  %658 = vmatmul.mubr.f32.gmra.mxu1 %v4732_v6  ;;  %v495_v54 = vand.u32 4294901760, %v4813_v39 }
  0x48   : > { %448 = vmatprep.mubr.f32.mxu0 %v6445_v0  ;;  %663 = vmatprep.mubr.f32.mxu1 %v6445_v0  ;;  %v517_v34 = vand.u32 4294901760, %v4838_v19 }
  0x4a   : > { %v518_v46 = vsub.f32 %v4838_v19, %v517_v34 }
  0x4b   : > { %454 = vmatmul.mubr.f32.gmra.mxu0 %v453_v1  ;;  %665 = vmatmul.mubr.f32.gmra.mxu1 %v4737_v9  ;;  %v496_v1 = vsub.f32 %v4813_v39, %v495_v54 }
  0x4c   : > { %459 = vmatprep.mubr.f32.mxu0 %v6445_v0  ;;  %670 = vmatprep.mubr.f32.mxu1 %v6445_v0 }
  0x4d   : > { %v497_v18 = vand.u32 4294901760, %v496_v1 }
  0x4f   : > { %465 = vmatmul.mubr.f32.gmra.mxu0 %v464_v28  ;;  %672 = vmatmul.mubr.f32.gmra.mxu1 %v4751_v24  ;;  %v507_v28 = vsub.f32 %v4826_v56, %v506_v7 }
  0x50   : > { %470 = vmatprep.mubr.f32.mxu0 %v6445_v0  ;;  %677 = vmatprep.mubr.f32.mxu1 %v6445_v0 }
  0x51   : > { %v508_v43 = vand.u32 4294901760, %v507_v28 }
  0x53   : > { %476 = vmatmul.mubr.f32.gmra.mxu0 %v475_v50  ;;  %679 = vmatmul.mubr.f32.gmra.mxu1 %v4765_v40  ;;  %v519_v50 = vand.u32 4294901760, %v518_v46 }
  0x54   : > { %481 = vmatprep.mubr.f32.mxu0 %v6445_v0  ;;  %684 = vmatprep.mubr.f32.mxu1 %v6445_v0 }
  0x57   : > { %487 = vmatmul.mubr.f32.gmra.mxu0 %v486_v62  ;;  %686 = vmatmul.mubr.f32.gmra.mxu1 %v4779_v53 }
  0x58   : > { %492 = vmatprep.mubr.f32.mxu0 %v6445_v0  ;;  %691 = vmatprep.mubr.f32.mxu1 %v6445_v0 }
  0x5b   : > { %498 = vmatmul.mubr.f32.gmra.mxu0 %v497_v18  ;;  %693 = vmatmul.mubr.f32.gmra.mxu1 %v4801_v10 }
  0x5c   : > { %503 = vmatprep.mubr.f32.mxu0 %v6445_v0  ;;  %698 = vmatprep.mubr.f32.mxu1 %v6445_v0 }
  0x5f   : > { %509 = vmatmul.mubr.f32.gmra.mxu0 %v508_v43  ;;  %700 = vmatmul.mubr.f32.gmra.mxu1 %v4815_v42  ;;  %v4349_v43 = vld [vmem:[%s4601_s3 + $0xc0] sm:$0xff] }
  0x60   : > { %514 = vmatprep.mubr.f32.mxu0 %v6445_v0  ;;  %705 = vmatprep.mubr.f32.mxu1 %v6445_v0 }
  0x63   : > { %520 = vmatmul.mubr.f32.gmra.mxu0 %v519_v50  ;;  %707 = vmatmul.mubr.f32.gmra.mxu1 %v4828_v61 }
  0x64   : > { %781 = vmatprep.mubr.f32.mxu0 %v6445_v0  ;;  %976 = vmatprep.mubr.f32.mxu1 %v6445_v0 }
  0x67   : > { %784 = vmatmul.mubr.f32.vlgmr.msra.gmra.mxu0 %v4639_v22  ;;  %980 = vmatmul.mubr.f32.vlgmr.msra.gmra.mxu1 %v352_v29 }
  0x68   : > { %1158 = vmatpush1.msra.mxu0 %v4635_v21  ;;  %1337 = vmatpush1.msra.mxu1 %v4605_v4 }
  0x69   : > { %789 = vmatprep.mubr.f32.mxu0 %v6445_v0  ;;  %985 = vmatprep.mubr.f32.mxu1 %v6445_v0 }
  0x6a   : > { %1623 = vmatprep.subr.mxu0 %v4603_v3  ;;  %1870 = vmatprep.subr.mxu1 %v4663_v35 }
  0x6b   : > { %792 = vmatmul.mubr.f32.gmra.mxu0 %v4642_v23  ;;  %989 = vmatmul.mubr.f32.gmra.mxu1 %v363_v30 }
  0x6c   : > { %797 = vmatprep.mubr.f32.mxu0 %v6445_v0  ;;  %994 = vmatprep.mubr.f32.mxu1 %v6445_v0 }
  0x6f   : > { %800 = vmatmul.mubr.f32.gmra.mxu0 %v4646_v25  ;;  %998 = vmatmul.mubr.f32.gmra.mxu1 %v374_v31  ;;  %v4343_v25 = vld [vmem:[%s4601_s3 + $0x90] sm:$0xff]  ;;  %v4344_v31 = vld [vmem:[%s4601_s3 + $0x98] sm:$0xff] }
  0x70   : > { %805 = vmatprep.mubr.f32.mxu0 %v6445_v0  ;;  %1003 = vmatprep.mubr.f32.mxu1 %v6445_v0  ;;  %v1551_v30 = vsel %vm234_vm0, %v4343_v25, 0 }
  0x73   : > { %808 = vmatmul.mubr.f32.gmra.mxu0 %v4658_v32  ;;  %1007 = vmatmul.mubr.f32.gmra.mxu1 %v385_v44  ;;  %v1554_v44 = vsel %vm234_vm0, %v4344_v31, 0 }
  0x74   : > { %813 = vmatprep.mubr.f32.mxu0 %v6445_v0  ;;  %1012 = vmatprep.mubr.f32.mxu1 %v6445_v0 }
  0x77   : > { %816 = vmatmul.mubr.f32.gmra.mxu0 %v4684_v45  ;;  %1016 = vmatmul.mubr.f32.gmra.mxu1 %v396_v51  ;;  %v4345_v45 = vld [vmem:[%s4601_s3 + $0xa0] sm:$0xff] }
  0x78   : > { %821 = vmatprep.mubr.f32.mxu0 %v6445_v0  ;;  %1021 = vmatprep.mubr.f32.mxu1 %v6445_v0 }
  0x7b   : > { %824 = vmatmul.mubr.f32.gmra.mxu0 %v4694_v48  ;;  %1025 = vmatmul.mubr.f32.gmra.mxu1 %v407_v55  ;;  %v5036_v55 = vand.u32 4294901760, %v1554_v44 }
  0x7c   : > { %829 = vmatprep.mubr.f32.mxu0 %v6445_v0  ;;  %1030 = vmatprep.mubr.f32.mxu1 %v6445_v0 }
  0x7d   : > { %6537 = vst [vmem:[#allocation14_spill] sm:$0xff] %v5036_v55 }
  0x7f   : > { %832 = vmatmul.mubr.f32.gmra.mxu0 %v4715_v58  ;;  %1034 = vmatmul.mubr.f32.gmra.mxu1 %v418_v2  ;;  %v1557_v58 = vsel %vm234_vm0, %v4345_v45, 0 }
  0x80   : > { %837 = vmatprep.mubr.f32.mxu0 %v6445_v0  ;;  %1039 = vmatprep.mubr.f32.mxu1 %v6445_v0 }
  0x83   : > { %840 = vmatmul.mubr.f32.gmra.mxu0 %v4730_v5  ;;  %1043 = vmatmul.mubr.f32.gmra.mxu1 %v429_v11  ;;  %v5051_v11 = vand.u32 4294901760, %v1557_v58 }
  0x84   : > { %845 = vmatprep.mubr.f32.mxu0 %v6445_v0  ;;  %1048 = vmatprep.mubr.f32.mxu1 %v6445_v0 }
  0x85   : > { %6538 = vst [vmem:[#allocation15_spill] sm:$0xff] %v5051_v11 }
  0x87   : > { %848 = vmatmul.mubr.f32.gmra.mxu0 %v4745_v12  ;;  %1052 = vmatmul.mubr.f32.gmra.mxu1 %v440_v37 }
  0x88   : > { %853 = vmatprep.mubr.f32.mxu0 %v6445_v0  ;;  %1057 = vmatprep.mubr.f32.mxu1 %v6445_v0 }
  0x8b   : > { %856 = vmatmul.mubr.f32.gmra.mxu0 %v4760_v38  ;;  %1061 = vmatmul.mubr.f32.gmra.mxu1 %v451_v47 }
  0x8c   : > { %861 = vmatprep.mubr.f32.mxu0 %v6445_v0  ;;  %1066 = vmatprep.mubr.f32.mxu1 %v6445_v0 }
  0x8f   : > { %864 = vmatmul.mubr.f32.gmra.mxu0 %v4774_v49  ;;  %1070 = vmatmul.mubr.f32.gmra.mxu1 %v462_v57 }
  0x90   : > { %869 = vmatprep.mubr.f32.mxu0 %v6445_v0  ;;  %1075 = vmatprep.mubr.f32.mxu1 %v6445_v0 }
  0x93   : > { %872 = vmatmul.mubr.f32.gmra.mxu0 %v4787_v60  ;;  %1079 = vmatmul.mubr.f32.gmra.mxu1 %v473_v8  ;;  %v4348_v8 = vld [vmem:[%s4601_s3 + $0xb8] sm:$0xff] }
  0x94   : > { %877 = vmatprep.mubr.f32.mxu0 %v6445_v0  ;;  %1084 = vmatprep.mubr.f32.mxu1 %v6445_v0 }
  0x97   : > { %880 = vmatmul.mubr.f32.gmra.mxu0 %v4794_v63  ;;  %1088 = vmatmul.mubr.f32.gmra.mxu1 %v484_v27 }
  0x98   : > { %885 = vmatprep.mubr.f32.mxu0 %v6445_v0  ;;  %1093 = vmatprep.mubr.f32.mxu1 %v6445_v0 }
  0x9b   : > { %888 = vmatmul.mubr.f32.gmra.mxu0 %v4813_v39  ;;  %1097 = vmatmul.mubr.f32.gmra.mxu1 %v495_v54 }
  0x9c   : > { %893 = vmatprep.mubr.f32.mxu0 %v6445_v0  ;;  %1102 = vmatprep.mubr.f32.mxu1 %v6445_v0 }
  0x9f   : > { %896 = vmatmul.mubr.f32.gmra.mxu0 %v4826_v56  ;;  %1106 = vmatmul.mubr.f32.gmra.mxu1 %v506_v7 }
  0xa0   : > { %901 = vmatprep.mubr.f32.mxu0 %v6445_v0  ;;  %1111 = vmatprep.mubr.f32.mxu1 %v6445_v0 }
  0xa3   : > { %904 = vmatmul.mubr.f32.gmra.mxu0 %v4838_v19  ;;  %1115 = vmatmul.mubr.f32.gmra.mxu1 %v517_v34  ;;  %v1566_v19 = vsel %vm234_vm0, %v4348_v8, 0 }
  0xa4   : > { %1191 = vmatprep.mubr.f32.mxu0 %v6445_v0  ;;  %1370 = vmatprep.mubr.f32.mxu1 %v6445_v0 }
  0xa7   : > { %1193 = vmatmul.mubr.f32.vlgmr.msra.gmra.mxu0 %v4622_v15  ;;  %1372 = vmatmul.mubr.f32.vlgmr.msra.gmra.mxu1 %v4622_v15  ;;  %v4341_v15 = vld [vmem:[%s4601_s3 + $0x80] sm:$0xff] }
  0xa8   : > { %1625 = vmatpush1.msra.mxu0 %v4605_v4  ;;  %1876 = vmatpush1.msra.mxu1 %v4665_v36 }
  0xa9   : > { %1198 = vmatprep.mubr.f32.mxu0 %v6445_v0  ;;  %1377 = vmatprep.mubr.f32.mxu1 %v6445_v0 }
  0xaa   : > { %2054 = vmatprep.subr.mxu0 %v4617_v13  ;;  %2250 = vmatprep.subr.mxu1 %v4603_v3 }
  0xab   : > { %1200 = vmatmul.mubr.f32.gmra.mxu0 %v4624_v16  ;;  %1379 = vmatmul.mubr.f32.gmra.mxu1 %v4624_v16  ;;  %v1545_v16 = vsel %vm234_vm0, %v4341_v15, 0  ;;  %v5100_v15 = vand.u32 4294901760, %v1566_v19 }
  0xac   : > { %1205 = vmatprep.mubr.f32.mxu0 %v6445_v0  ;;  %1384 = vmatprep.mubr.f32.mxu1 %v6445_v0  ;;  %v4998_v22 = vand.u32 4294901760, %v1545_v16 }
  0xad   : > { %6541 = vst [vmem:[#allocation18_spill] sm:$0xff] %v5100_v15 }
  0xae   : > { %6534 = vst [vmem:[#allocation11_spill] sm:$0xff] %v4998_v22  ;;  %v5009_v29 = vsub.f32 %v1545_v16, %v4998_v22 }
  0xaf   : > { %1207 = vmatmul.mubr.f32.gmra.mxu0 %v4627_v17  ;;  %1386 = vmatmul.mubr.f32.gmra.mxu1 %v4627_v17  ;;  %v4342_v17 = vld [vmem:[%s4601_s3 + $0x88] sm:$0xff] }
  0xb0   : > { %1212 = vmatprep.mubr.f32.mxu0 %v6445_v0  ;;  %1391 = vmatprep.mubr.f32.mxu1 %v6445_v0  ;;  %v1548_v23 = vsel %vm234_vm0, %v4342_v17, 0 }
  0xb3   : > { %1214 = vmatmul.mubr.f32.gmra.mxu0 %v4648_v26  ;;  %1393 = vmatmul.mubr.f32.gmra.mxu1 %v4648_v26  ;;  %v5004_v26 = vand.u32 4294901760, %v1548_v23 }
  0xb4   : > { %1219 = vmatprep.mubr.f32.mxu0 %v6445_v0  ;;  %1398 = vmatprep.mubr.f32.mxu1 %v6445_v0 }
  0xb5   : > { %6535 = vst [vmem:[#allocation12_spill] sm:$0xff] %v5004_v26  ;;  %v5016_v32 = vsub.f32 %v1548_v23, %v5004_v26 }
  0xb7   : > { %1221 = vmatmul.mubr.f32.gmra.mxu0 %v4660_v33  ;;  %1400 = vmatmul.mubr.f32.gmra.mxu1 %v4660_v33  ;;  %v5018_v33 = vand.u32 4294901760, %v1551_v30  ;;  %v6443_v48 = vand.u32 4294901760, %v5016_v32 }
  0xb8   : > { %1226 = vmatprep.mubr.f32.mxu0 %v6445_v0  ;;  %1405 = vmatprep.mubr.f32.mxu1 %v6445_v0 }
  0xb9   : > { %6536 = vst [vmem:[#allocation13_spill] sm:$0xff] %v5018_v33  ;;  %v5029_v51 = vsub.f32 %v1551_v30, %v5018_v33  ;;  %v1673_v2 = vsub.f32 %v5016_v32, %v6443_v48 }
  0xbb   : > { %1228 = vmatmul.mubr.f32.gmra.mxu0 %v4676_v41  ;;  %1407 = vmatmul.mubr.f32.gmra.mxu1 %v4676_v41  ;;  %v6444_v41 = vand.u32 4294901760, %v5009_v29  ;;  %v6441_v5 = vand.u32 4294901760, %v5029_v51  ;;  %v1674_v37 = vand.u32 4294901760, %v1673_v2 }
  0xbc   : > { %1233 = vmatprep.mubr.f32.mxu0 %v6445_v0  ;;  %1412 = vmatprep.mubr.f32.mxu1 %v6445_v0 }
  0xbd   : > { %v1684_v38 = vsub.f32 %v5029_v51, %v6441_v5  ;;  %v4355_v5 = vld [vmem:[%s4601_s3 + $0xf0] sm:$0xff] }
  0xbf   : > { %1235 = vmatmul.mubr.f32.gmra.mxu0 %v4702_v52  ;;  %1414 = vmatmul.mubr.f32.gmra.mxu1 %v4702_v52  ;;  %v1662_v52 = vsub.f32 %v5009_v29, %v6444_v41 }
  0xc0   : > { %1240 = vmatprep.mubr.f32.mxu0 %v6445_v0  ;;  %1419 = vmatprep.mubr.f32.mxu1 %v6445_v0 }
  0xc3   : > { %1242 = vmatmul.mubr.f32.gmra.mxu0 %v4717_v59  ;;  %1421 = vmatmul.mubr.f32.gmra.mxu1 %v4717_v59  ;;  %v4346_v59 = vld [vmem:[%s4601_s3 + $0xa8] sm:$0xff] }
  0xc4   : > { %1247 = vmatprep.mubr.f32.mxu0 %v6445_v0  ;;  %1426 = vmatprep.mubr.f32.mxu1 %v6445_v0  ;;  %v1560_v12 = vsel %vm234_vm0, %v4346_v59, 0 }
  0xc5   : > { %v5065_v57 = vand.u32 4294901760, %v1560_v12 }
  0xc7   : > { %1249 = vmatmul.mubr.f32.gmra.mxu0 %v4732_v6  ;;  %1428 = vmatmul.mubr.f32.gmra.mxu1 %v4732_v6  ;;  %v1663_v6 = vand.u32 4294901760, %v1662_v52  ;;  %6539 = vst [vmem:[#allocation16_spill] sm:$0xff] %v5065_v57  ;;  %v5087_v7 = vsub.f32 %v1560_v12, %v5065_v57 }
  0xc8   : > { %1254 = vmatprep.mubr.f32.mxu0 %v6445_v0  ;;  %1433 = vmatprep.mubr.f32.mxu1 %v6445_v0 }
  0xc9   : > { %v6437_v30 = vand.u32 4294901760, %v5087_v7 }
  0xcb   : > { %1256 = vmatmul.mubr.f32.gmra.mxu0 %v4737_v9  ;;  %1435 = vmatmul.mubr.f32.gmra.mxu1 %v4737_v9  ;;  %v5049_v9 = vsub.f32 %v1554_v44, %v5036_v55  ;;  %v1569_v44 = vsel %vm234_vm0, %v4349_v43, 0 }
  0xcc   : > { %1261 = vmatprep.mubr.f32.mxu0 %v6445_v0  ;;  %1440 = vmatprep.mubr.f32.mxu1 %v6445_v0 }
  0xcd   : > { %v6440_v49 = vand.u32 4294901760, %v5049_v9 }
  0xcf   : > { %1263 = vmatmul.mubr.f32.gmra.mxu0 %v4751_v24  ;;  %1442 = vmatmul.mubr.f32.gmra.mxu1 %v4751_v24  ;;  %v4347_v24 = vld [vmem:[%s4601_s3 + $0xb0] sm:$0xff]  ;;  %v1695_v62 = vsub.f32 %v5049_v9, %v6440_v49 }
  0xd0   : > { %1268 = vmatprep.mubr.f32.mxu0 %v6445_v0  ;;  %1447 = vmatprep.mubr.f32.mxu1 %v6445_v0  ;;  %v1563_v60 = vsel %vm234_vm0, %v4347_v24, 0 }
  0xd1   : > { %v5077_v54 = vand.u32 4294901760, %v1563_v60  ;;  %v1696_v23 = vand.u32 4294901760, %v1695_v62 }
  0xd3   : > { %1270 = vmatmul.mubr.f32.gmra.mxu0 %v4765_v40  ;;  %1449 = vmatmul.mubr.f32.gmra.mxu1 %v4765_v40  ;;  %6540 = vst [vmem:[#allocation17_spill] sm:$0xff] %v5077_v54  ;;  %v5098_v50 = vsub.f32 %v1563_v60, %v5077_v54 }
  0xd4   : > { %1275 = vmatprep.mubr.f32.mxu0 %v6445_v0  ;;  %1454 = vmatprep.mubr.f32.mxu1 %v6445_v0 }
  0xd5   : > { %v6436_v2 = vand.u32 4294901760, %v5098_v50 }
  0xd7   : > { %1277 = vmatmul.mubr.f32.gmra.mxu0 %v4779_v53  ;;  %1456 = vmatmul.mubr.f32.gmra.mxu1 %v4779_v53  ;;  %v5063_v53 = vsub.f32 %v1557_v58, %v5051_v11  ;;  %v4350_v58 = vld [vmem:[%s4601_s3 + $0xc8] sm:$0xff] }
  0xd8   : > { %1282 = vmatprep.mubr.f32.mxu0 %v6445_v0  ;;  %1461 = vmatprep.mubr.f32.mxu1 %v6445_v0  ;;  %v1572_v60 = vsel %vm234_vm0, %v4350_v58, 0 }
  0xd9   : > { %v6439_v1 = vand.u32 4294901760, %v5063_v53  ;;  %v5141_v43 = vand.u32 4294901760, %v1572_v60 }
  0xdb   : > { %1284 = vmatmul.mubr.f32.gmra.mxu0 %v4801_v10  ;;  %1463 = vmatmul.mubr.f32.gmra.mxu1 %v4801_v10  ;;  %v1706_v25 = vsub.f32 %v5063_v53, %v6439_v1  ;;  %6543 = vst [vmem:[#allocation20_spill] sm:$0xff] %v5141_v43 }
  0xdc   : > { %1289 = vmatprep.mubr.f32.mxu0 %v6445_v0  ;;  %1468 = vmatprep.mubr.f32.mxu1 %v6445_v0 }
  0xdf   : > { %1291 = vmatmul.mubr.f32.gmra.mxu0 %v4815_v42  ;;  %1470 = vmatmul.mubr.f32.gmra.mxu1 %v4815_v42  ;;  %v1685_v42 = vand.u32 4294901760, %v1684_v38  ;;  %v1717_v38 = vsub.f32 %v5087_v7, %v6437_v30 }
  0xe0   : > { %1296 = vmatprep.mubr.f32.mxu0 %v6445_v0  ;;  %1475 = vmatprep.mubr.f32.mxu1 %v6445_v0 }
  0xe3   : > { %1298 = vmatmul.mubr.f32.gmra.mxu0 %v4828_v61  ;;  %1477 = vmatmul.mubr.f32.gmra.mxu1 %v4828_v61 }
  0xe4   : > { %1658 = vmatprep.mubr.f32.mxu0 %v6445_v0  ;;  %1909 = vmatprep.mubr.f32.mxu1 %v6445_v0 }
  0xe7   : > { %v356_v40 = vpop.f32.mrf.mxu0  ;;  %v603_v47 = vpop.f32.mrf.mxu1  ;;  %1664 = vmatmul.mubr.f32.vlgmr.msra.gmra.mxu0 %v1663_v6  ;;  %1911 = vmatmul.mubr.f32.vlgmr.msra.gmra.mxu1 %v4998_v22  ;;  %v5117_v6 = vsub.f32 %v1566_v19, %v5100_v15 }
  0xe8   : > { %v5068_v63 = vadd.f32 %v603_v47, %v356_v40  ;;  %2057 = vmatpush1.msra.mxu0 %v4620_v14  ;;  %2252 = vmatpush1.msra.mxu1 %v4605_v4  ;;  %v5123_v40 = vand.u32 4294901760, %v1569_v44 }
  0xe9   : > { %v358_v10 = vpop.f32.mrf.mxu0  ;;  %v605_v27 = vpop.f32.mrf.mxu1  ;;  %1669 = vmatprep.mubr.f32.mxu0 %v6445_v0  ;;  %1916 = vmatprep.mubr.f32.mxu1 %v6445_v0 }
  0xea   : > { %v5075_v39 = vadd.f32 %v605_v27, %v358_v10  ;;  %2463 = vmatprep.subr.mxu0 %v4632_v20  ;;  %2644 = vmatprep.subr.mxu1 %v4603_v3  ;;  %6542 = vst [vmem:[#allocation19_spill] sm:$0xff] %v5123_v40  ;;  %v4351_v27 = vld [vmem:[%s4601_s3 + $0xd0] sm:$0xff] }
  0xeb   : > { %v367_v56 = vpop.f32.mrf.mxu0  ;;  %v610_v61 = vpop.f32.mrf.mxu1  ;;  %1675 = vmatmul.mubr.f32.gmra.mxu0 %v1674_v37  ;;  %1918 = vmatmul.mubr.f32.gmra.mxu1 %v5004_v26  ;;  %v1707_v37 = vand.u32 4294901760, %v1706_v25 }
  0xec   : > { %v5090_v18 = vadd.f32 %v610_v61, %v367_v56  ;;  %1680 = vmatprep.mubr.f32.mxu0 %v6445_v0  ;;  %1923 = vmatprep.mubr.f32.mxu1 %v6445_v0  ;;  %v1728_v56 = vsub.f32 %v5098_v50, %v6436_v2  ;;  %v6435_v61 = vand.u32 4294901760, %v5117_v6 }
  0xed   : > { %v369_v28 = vpop.f32.mrf.mxu0  ;;  %v612_v34 = vpop.f32.mrf.mxu1 }
  0xee   : > { %v5095_v46 = vadd.f32 %v612_v34, %v369_v28  ;;  %v1718_v28 = vand.u32 4294901760, %v1717_v38  ;;  %v5139_v34 = vsub.f32 %v1569_v44, %v5123_v40  ;;  %v1729_v58 = vand.u32 4294901760, %v1728_v56 }
  0xef   : > { %v378_v16 = vpop.f32.mrf.mxu0  ;;  %v617_v17 = vpop.f32.mrf.mxu1  ;;  %1686 = vmatmul.mubr.f32.gmra.mxu0 %v1685_v42  ;;  %1925 = vmatmul.mubr.f32.gmra.mxu1 %v5018_v33  ;;  %v1739_v44 = vsub.f32 %v5117_v6, %v6435_v61  ;;  %v5157_v38 = vsub.f32 %v1572_v60, %v5141_v43 }
  0xf0   : > { %v5107_v31 = vadd.f32 %v617_v17, %v378_v16  ;;  %1691 = vmatprep.mubr.f32.mxu0 %v6445_v0  ;;  %1930 = vmatprep.mubr.f32.mxu1 %v6445_v0  ;;  %v1575_v17 = vsel %vm234_vm0, %v4351_v27, 0 }
  0xf1   : > { %v380_v45 = vpop.f32.mrf.mxu0  ;;  %v619_v52 = vpop.f32.mrf.mxu1 }
  0xf2   : > { %v5113_v59 = vadd.f32 %v619_v52, %v380_v45 }
  0xf3   : > { %v389_v12 = vpop.f32.mrf.mxu0  ;;  %v624_v24 = vpop.f32.mrf.mxu1  ;;  %1697 = vmatmul.mubr.f32.gmra.mxu0 %v1696_v23  ;;  %1932 = vmatmul.mubr.f32.gmra.mxu1 %v5036_v55  ;;  %v4352_v23 = vld [vmem:[%s4601_s3 + $0xd8] sm:$0xff] }
  0xf4   : > { %v5125_v47 = vadd.f32 %v624_v24, %v389_v12  ;;  %1702 = vmatprep.mubr.f32.mxu0 %v6445_v0  ;;  %1937 = vmatprep.mubr.f32.mxu1 %v6445_v0 }
  0xf5   : > { %v391_v8 = vpop.f32.mrf.mxu0  ;;  %v626_v10 = vpop.f32.mrf.mxu1 }
  0xf6   : > { %v5131_v42 = vadd.f32 %v626_v10, %v391_v8  ;;  %v5159_v8 = vand.u32 4294901760, %v1575_v17  ;;  %v1578_v10 = vsel %vm234_vm0, %v4352_v23, 0  ;;  %v1740_v23 = vand.u32 4294901760, %v1739_v44  ;;  %v4354_v44 = vld [vmem:[%s4601_s3 + $0xe8] sm:$0xff] }
  0xf7   : > { %v400_v62 = vpop.f32.mrf.mxu0  ;;  %v631_v19 = vpop.f32.mrf.mxu1  ;;  %1708 = vmatmul.mubr.f32.gmra.mxu0 %v1707_v37  ;;  %1939 = vmatmul.mubr.f32.gmra.mxu1 %v5051_v11  ;;  %v6438_v37 = vand.u32 4294901760, %v5139_v34 }
  0xf8   : > { %v5143_v16 = vadd.f32 %v631_v19, %v400_v62  ;;  %1713 = vmatprep.mubr.f32.mxu0 %v6445_v0  ;;  %1944 = vmatprep.mubr.f32.mxu1 %v6445_v0  ;;  %6544 = vst [vmem:[#allocation21_spill] sm:$0xff] %v5159_v8  ;;  %v4353_v19 = vld [vmem:[%s4601_s3 + $0xe0] sm:$0xff]  ;;  %v5177_v61 = vsub.f32 %v1575_v17, %v5159_v8 }
  0xf9   : > { %v402_v25 = vpop.f32.mrf.mxu0  ;;  %v633_v45 = vpop.f32.mrf.mxu1 }
  0xfa   : > { %v5149_v52 = vadd.f32 %v633_v45, %v402_v25  ;;  %v5169_v25 = vand.u32 4294901760, %v1578_v10 }
  0xfb   : > { %v411_v12 = vpop.f32.mrf.mxu0  ;;  %v638_v24 = vpop.f32.mrf.mxu1  ;;  %1719 = vmatmul.mubr.f32.gmra.mxu0 %v1718_v28  ;;  %1946 = vmatmul.mubr.f32.gmra.mxu1 %v5065_v57 }
  0xfc   : > { %v5162_v27 = vadd.f32 %v638_v24, %v411_v12  ;;  %1724 = vmatprep.mubr.f32.mxu0 %v6445_v0  ;;  %1951 = vmatprep.mubr.f32.mxu1 %v6445_v0  ;;  %6545 = vst [vmem:[#allocation22_spill] sm:$0xff] %v5169_v25  ;;  %v1750_v12 = vsub.f32 %v5139_v34, %v6438_v37  ;;  %v6442_v24 = vand.u32 4294901760, %v5157_v38 }
  0xfd   : > { %v413_v56 = vpop.f32.mrf.mxu0  ;;  %v640_v62 = vpop.f32.mrf.mxu1  ;;  %v5188_v37 = vsub.f32 %v1578_v10, %v5169_v25  ;;  %v1584_v10 = vsel %vm234_vm0, %v4354_v44, 0 }
  0xfe   : > { %v5167_v28 = vadd.f32 %v640_v62, %v413_v56 }
  0xff   : > { %v422_v60 = vpop.f32.mrf.mxu0  ;;  %v645_v45 = vpop.f32.mrf.mxu1  ;;  %1730 = vmatmul.mubr.f32.gmra.mxu0 %v1729_v58  ;;  %1953 = vmatmul.mubr.f32.gmra.mxu1 %v5077_v54  ;;  %v1581_v58 = vsel %vm234_vm0, %v4353_v19, 0  ;;  %v6449_v19 = vand.u32 4294901760, %v5177_v61 }
 0x100   : > { %v5179_v56 = vadd.f32 %v645_v45, %v422_v60  ;;  %1735 = vmatprep.mubr.f32.mxu0 %v6445_v0  ;;  %1958 = vmatprep.mubr.f32.mxu1 %v6445_v0  ;;  %v1751_v60 = vand.u32 4294901760, %v1750_v12  ;;  %v1761_v45 = vsub.f32 %v5157_v38, %v6442_v24  ;;  %v5195_v49 = vand.u32 4294901760, %v1581_v58 }
 0x101   : > { %v424_v62 = vpop.f32.mrf.mxu0  ;;  %v647_v2 = vpop.f32.mrf.mxu1 }
 0x102   : > { %v5185_v30 = vadd.f32 %v647_v2, %v424_v62  ;;  %6546 = vst [vmem:[#allocation23_spill] sm:$0xff] %v5195_v49  ;;  %v5211_v44 = vsub.f32 %v1581_v58, %v5195_v49 }
 0x103   : > { %v433_v1 = vpop.f32.mrf.mxu0  ;;  %v652_v17 = vpop.f32.mrf.mxu1  ;;  %1741 = vmatmul.mubr.f32.gmra.mxu0 %v1740_v23  ;;  %1960 = vmatmul.mubr.f32.gmra.mxu1 %v5100_v15 }
 0x104   : > { %v5197_v2 = vadd.f32 %v652_v17, %v433_v1  ;;  %1746 = vmatprep.mubr.f32.mxu0 %v6445_v0  ;;  %1965 = vmatprep.mubr.f32.mxu1 %v6445_v0  ;;  %v1762_v1 = vand.u32 4294901760, %v1761_v45  ;;  %v1772_v17 = vsub.f32 %v5177_v61, %v6449_v19  ;;  %v5213_v0 = vand.u32 4294901760, %v1584_v10  ;;  %v4356_v45 = vld [vmem:[%s4601_s3 + $0xf8] sm:$0xff] }
 0x105   : > { %v435_v23 = vpop.f32.mrf.mxu0  ;;  %v654_v62 = vpop.f32.mrf.mxu1  ;;  %v6549_v19 = vand.u32 4294901760, %v5188_v37 }
 0x106   : > { %v5203_v12 = vadd.f32 %v654_v62, %v435_v23  ;;  %6547 = vst [vmem:[#allocation24_spill] sm:$0xff] %v5213_v0  ;;  %v6548_v62 = vmov 0.0   ;;  %v5229_v54 = vsub.f32 %v1584_v10, %v5213_v0  ;;  %v6550_v10 = vand.u32 4294901760, %v5211_v44 }
 0x107   : > { %v444_v48 = vpop.f32.mrf.mxu0  ;;  %v659_v41 = vpop.f32.mrf.mxu1  ;;  %1752 = vmatmul.mubr.f32.gmra.mxu0 %v1751_v60  ;;  %1967 = vmatmul.mubr.f32.gmra.mxu1 %v5123_v40  ;;  %v1587_v60 = vsel %vm234_vm0, %v4355_v5, 0  ;;  %v1783_v58 = vsub.f32 %v5188_v37, %v6549_v19 }
 0x108   : > { %v5215_v23 = vadd.f32 %v659_v41, %v444_v48  ;;  %1757 = vmatprep.mubr.f32.mxu0 %v6548_v62  ;;  %1972 = vmatprep.mubr.f32.mxu1 %v6548_v62  ;;  %v1773_v41 = vand.u32 4294901760, %v1772_v17  ;;  %v5231_v5 = vand.u32 4294901760, %v1587_v60 }
 0x109   : > { %v446_v24 = vpop.f32.mrf.mxu0  ;;  %v661_v20 = vpop.f32.mrf.mxu1  ;;  %v1784_v17 = vand.u32 4294901760, %v1783_v58 }
 0x10a   : > { %v5221_v14 = vadd.f32 %v661_v20, %v446_v24  ;;  %v1590_v20 = vsel %vm234_vm0, %v4356_v45, 0  ;;  %v5246_v11 = vsub.f32 %v1587_v60, %v5231_v5 }
 0x10b   : > { %v455_v40 = vpop.f32.mrf.mxu0  ;;  %v666_v15 = vpop.f32.mrf.mxu1  ;;  %1763 = vmatmul.mubr.f32.gmra.mxu0 %v1762_v1  ;;  %1974 = vmatmul.mubr.f32.gmra.mxu1 %v5141_v43  ;;  %v5248_v45 = vand.u32 4294901760, %v1590_v20 }
 0x10c   : > { %v5233_v57 = vadd.f32 %v666_v15, %v455_v40  ;;  %1768 = vmatprep.mubr.f32.mxu0 %v6548_v62  ;;  %1979 = vmatprep.mubr.f32.mxu1 %v6548_v62  ;;  %v1794_v15 = vsub.f32 %v5211_v44, %v6550_v10  ;;  %v6470_v40 = vand.u32 4294901760, %v5229_v54 }
 0x10d   : > { %v457_v24 = vpop.f32.mrf.mxu0  ;;  %v668_v19 = vpop.f32.mrf.mxu1 }
 0x10e   : > { %v5238_v1 = vadd.f32 %v668_v19, %v457_v24  ;;  %v1795_v10 = vand.u32 4294901760, %v1794_v15  ;;  %v1805_v60 = vsub.f32 %v5229_v54, %v6470_v40 }
 0x10f   : > { %v466_v43 = vpop.f32.mrf.mxu0  ;;  %v673_v48 = vpop.f32.mrf.mxu1  ;;  %1774 = vmatmul.mubr.f32.gmra.mxu0 %v1773_v41  ;;  %1981 = vmatmul.mubr.f32.gmra.mxu1 %v5159_v8 }
 0x110   : > { %v5250_v55 = vadd.f32 %v673_v48, %v466_v43  ;;  %1779 = vmatprep.mubr.f32.mxu0 %v6548_v62  ;;  %1986 = vmatprep.mubr.f32.mxu1 %v6548_v62  ;;  %v6474_v43 = vand.u32 4294901760, %v5246_v11  ;;  %v5262_v48 = vsub.f32 %v1590_v20, %v5248_v45  ;;  %v1806_v40 = vand.u32 4294901760, %v1805_v60 }
 0x111   : > { %v468_v58 = vpop.f32.mrf.mxu0  ;;  %v675_v41 = vpop.f32.mrf.mxu1 }
 0x112   : > { %v5254_v24 = vadd.f32 %v675_v41, %v468_v58  ;;  %v1816_v20 = vsub.f32 %v5246_v11, %v6474_v43 }
 0x113   : > { %v477_v19 = vpop.f32.mrf.mxu0  ;;  %v680_v8 = vpop.f32.mrf.mxu1  ;;  %1785 = vmatmul.mubr.f32.gmra.mxu0 %v1784_v17  ;;  %1988 = vmatmul.mubr.f32.gmra.mxu1 %v5169_v25 }
 0x114   : > { %v5264_v33 = vadd.f32 %v680_v8, %v477_v19  ;;  %1790 = vmatprep.mubr.f32.mxu0 %v6548_v62  ;;  %1993 = vmatprep.mubr.f32.mxu1 %v6548_v62  ;;  %v6478_v8 = vand.u32 4294901760, %v5262_v48  ;;  %v1817_v60 = vand.u32 4294901760, %v1816_v20 }
 0x115   : > { %v479_v58 = vpop.f32.mrf.mxu0  ;;  %v682_v17 = vpop.f32.mrf.mxu1 }
 0x116   : > { %v5268_v41 = vadd.f32 %v682_v17, %v479_v58  ;;  %v1827_v43 = vsub.f32 %v5262_v48, %v6478_v8 }
 0x117   : > { %v488_v15 = vpop.f32.mrf.mxu0  ;;  %v687_v25 = vpop.f32.mrf.mxu1  ;;  %1796 = vmatmul.mubr.f32.gmra.mxu0 %v1795_v10  ;;  %1995 = vmatmul.mubr.f32.gmra.mxu1 %v5195_v49 }
 0x118   : > { %v5275_v19 = vadd.f32 %v687_v25, %v488_v15  ;;  %1801 = vmatprep.mubr.f32.mxu0 %v6548_v62  ;;  %2000 = vmatprep.mubr.f32.mxu1 %v6548_v62 }
 0x119   : > { %v490_v58 = vpop.f32.mrf.mxu0  ;;  %v689_v17 = vpop.f32.mrf.mxu1 }
 0x11a   : > { %v5279_v26 = vadd.f32 %v689_v17, %v490_v58 }
 0x11b   : > { %v499_v10 = vpop.f32.mrf.mxu0  ;;  %v694_v13 = vpop.f32.mrf.mxu1  ;;  %1807 = vmatmul.mubr.f32.gmra.mxu0 %v1806_v40  ;;  %2002 = vmatmul.mubr.f32.gmra.mxu1 %v5213_v0  ;;  %v1828_v40 = vand.u32 4294901760, %v1827_v43 }
 0x11c   : > { %v5285_v25 = vadd.f32 %v694_v13, %v499_v10  ;;  %1812 = vmatprep.mubr.f32.mxu0 %v6548_v62  ;;  %2007 = vmatprep.mubr.f32.mxu1 %v6548_v62 }
 0x11d   : > { %v501_v15 = vpop.f32.mrf.mxu0  ;;  %v696_v49 = vpop.f32.mrf.mxu1 }
 0x11e   : > { %v5289_v58 = vadd.f32 %v696_v49, %v501_v15 }
 0x11f   : > { %v510_v17 = vpop.f32.mrf.mxu0  ;;  %v701_v36 = vpop.f32.mrf.mxu1  ;;  %1818 = vmatmul.mubr.f32.gmra.mxu0 %v1817_v60  ;;  %2009 = vmatmul.mubr.f32.gmra.mxu1 %v5231_v5 }
 0x120   : > { %v5292_v20 = vadd.f32 %v701_v36, %v510_v17  ;;  %1823 = vmatprep.mubr.f32.mxu0 %v6548_v62  ;;  %2014 = vmatprep.mubr.f32.mxu1 %v6548_v62 }
 0x121   : > { %v512_v13 = vpop.f32.mrf.mxu0  ;;  %v703_v10 = vpop.f32.mrf.mxu1 }
 0x122   : > { %v5296_v8 = vadd.f32 %v703_v10, %v512_v13  ;;  %v6551_v13 = vand.u32 4294901760, %v5009_v29 }
 0x123   : > { %v521_v0 = vpop.f32.mrf.mxu0  ;;  %v708_v22 = vpop.f32.mrf.mxu1  ;;  %1829 = vmatmul.mubr.f32.gmra.mxu0 %v1828_v40  ;;  %2016 = vmatmul.mubr.f32.gmra.mxu1 %v5248_v45 }
 0x124   : > { %v5299_v49 = vadd.f32 %v708_v22, %v521_v0  ;;  %2090 = vmatprep.mubr.f32.mxu0 %v6548_v62  ;;  %2285 = vmatprep.mubr.f32.mxu1 %v6548_v62 }
 0x125   : > { %v523_v36 = vpop.f32.mrf.mxu0  ;;  %v710_v43 = vpop.f32.mrf.mxu1 }
 0x126   : > { %v5303_v60 = vadd.f32 %v710_v43, %v523_v36  ;;  %v6552_v43 = vand.u32 4294901760, %v5016_v32 }
 0x127   : > { %v785_v15 = vpop.f32.mrf.mxu0  ;;  %v981_v17 = vpop.f32.mrf.mxu1  ;;  %2093 = vmatmul.mubr.f32.vlgmr.msra.gmra.mxu0 %v5009_v29  ;;  %2289 = vmatmul.mubr.f32.vlgmr.msra.gmra.mxu1 %v6551_v13 }
 0x128   : > { %v786_v40 = vadd.f32 %v785_v15, %v5068_v63  ;;  %2467 = vmatpush1.msra.mxu0 %v4635_v21  ;;  %2646 = vmatpush1.msra.mxu1 %v4605_v4 }
 0x129   : > { %v787_v0 = vpop.f32.mrf.mxu0  ;;  %v983_v22 = vpop.f32.mrf.mxu1  ;;  %2098 = vmatprep.mubr.f32.mxu0 %v6548_v62  ;;  %2294 = vmatprep.mubr.f32.mxu1 %v6548_v62 }
 0x12a   : > { %v5313_v10 = vadd.f32 %v981_v17, %v786_v40  ;;  %v788_v36 = vadd.f32 %v787_v0, %v5075_v39  ;;  %2932 = vmatprep.subr.mxu0 %v4603_v3  ;;  %3179 = vmatprep.subr.mxu1 %v4663_v35 }
 0x12b   : > { %v793_v29 = vpop.f32.mrf.mxu0  ;;  %v990_v63 = vpop.f32.mrf.mxu1  ;;  %2101 = vmatmul.mubr.f32.gmra.mxu0 %v5016_v32  ;;  %2298 = vmatmul.mubr.f32.gmra.mxu1 %v6552_v43  ;;  %v6553_v32 = vand.u32 4294901760, %v5029_v51 }
 0x12c   : > { %v5321_v15 = vadd.f32 %v983_v22, %v788_v36  ;;  %v794_v13 = vadd.f32 %v793_v29, %v5090_v18  ;;  %2106 = vmatprep.mubr.f32.mxu0 %v6548_v62  ;;  %2303 = vmatprep.mubr.f32.mxu1 %v6548_v62 }
 0x12d   : > { %v795_v39 = vpop.f32.mrf.mxu0  ;;  %v992_v17 = vpop.f32.mrf.mxu1 }
 0x12e   : > { %v5326_v40 = vadd.f32 %v990_v63, %v794_v13  ;;  %v796_v35 = vadd.f32 %v795_v39, %v5095_v46 }
 0x12f   : > { %v801_v0 = vpop.f32.mrf.mxu0  ;;  %v999_v21 = vpop.f32.mrf.mxu1  ;;  %2109 = vmatmul.mubr.f32.gmra.mxu0 %v5029_v51  ;;  %2307 = vmatmul.mubr.f32.gmra.mxu1 %v6553_v32  ;;  %v6554_v51 = vand.u32 4294901760, %v5049_v9 }
 0x130   : > { %v5332_v22 = vadd.f32 %v992_v17, %v796_v35  ;;  %v802_v18 = vadd.f32 %v801_v0, %v5107_v31  ;;  %2114 = vmatprep.mubr.f32.mxu0 %v6548_v62  ;;  %2312 = vmatprep.mubr.f32.mxu1 %v6548_v62 }
 0x131   : > { %v803_v36 = vpop.f32.mrf.mxu0  ;;  %v1001_v29 = vpop.f32.mrf.mxu1 }
 0x132   : > { %v5337_v63 = vadd.f32 %v999_v21, %v802_v18  ;;  %v804_v46 = vadd.f32 %v803_v36, %v5113_v59 }
 0x133   : > { %v809_v43 = vpop.f32.mrf.mxu0  ;;  %v1008_v13 = vpop.f32.mrf.mxu1  ;;  %2117 = vmatmul.mubr.f32.gmra.mxu0 %v5049_v9  ;;  %2316 = vmatmul.mubr.f32.gmra.mxu1 %v6554_v51  ;;  %v6555_v9 = vand.u32 4294901760, %v5063_v53 }
 0x134   : > { %v5343_v39 = vadd.f32 %v1001_v29, %v804_v46  ;;  %v810_v31 = vadd.f32 %v809_v43, %v5125_v47  ;;  %2122 = vmatprep.mubr.f32.mxu0 %v6548_v62  ;;  %2321 = vmatprep.mubr.f32.mxu1 %v6548_v62 }
 0x135   : > { %v811_v17 = vpop.f32.mrf.mxu0  ;;  %v1010_v21 = vpop.f32.mrf.mxu1 }
 0x136   : > { %v5348_v35 = vadd.f32 %v1008_v13, %v810_v31  ;;  %v812_v59 = vadd.f32 %v811_v17, %v5131_v42 }
 0x137   : > { %v817_v0 = vpop.f32.mrf.mxu0  ;;  %v1017_v32 = vpop.f32.mrf.mxu1  ;;  %2125 = vmatmul.mubr.f32.gmra.mxu0 %v5063_v53  ;;  %2325 = vmatmul.mubr.f32.gmra.mxu1 %v6555_v9  ;;  %v6556_v53 = vand.u32 4294901760, %v5087_v7 }
 0x138   : > { %v5354_v18 = vadd.f32 %v1010_v21, %v812_v59  ;;  %v818_v47 = vadd.f32 %v817_v0, %v5143_v16  ;;  %2130 = vmatprep.mubr.f32.mxu0 %v6548_v62  ;;  %2330 = vmatprep.mubr.f32.mxu1 %v6548_v62 }
 0x139   : > { %v819_v36 = vpop.f32.mrf.mxu0  ;;  %v1019_v29 = vpop.f32.mrf.mxu1 }
 0x13a   : > { %v5359_v46 = vadd.f32 %v1017_v32, %v818_v47  ;;  %v820_v42 = vadd.f32 %v819_v36, %v5149_v52 }
 0x13b   : > { %v825_v43 = vpop.f32.mrf.mxu0  ;;  %v1026_v13 = vpop.f32.mrf.mxu1  ;;  %2133 = vmatmul.mubr.f32.gmra.mxu0 %v5087_v7  ;;  %2334 = vmatmul.mubr.f32.gmra.mxu1 %v6556_v53  ;;  %v6557_v7 = vand.u32 4294901760, %v5098_v50 }
 0x13c   : > { %v5365_v51 = vadd.f32 %v1019_v29, %v820_v42  ;;  %v826_v16 = vadd.f32 %v825_v43, %v5162_v27  ;;  %2138 = vmatprep.mubr.f32.mxu0 %v6548_v62  ;;  %2339 = vmatprep.mubr.f32.mxu1 %v6548_v62 }
 0x13d   : > { %v827_v31 = vpop.f32.mrf.mxu0  ;;  %v1028_v17 = vpop.f32.mrf.mxu1 }
 0x13e   : > { %v5370_v21 = vadd.f32 %v1026_v13, %v826_v16  ;;  %v828_v52 = vadd.f32 %v827_v31, %v5167_v28 }
 0x13f   : > { %v833_v59 = vpop.f32.mrf.mxu0  ;;  %v1035_v0 = vpop.f32.mrf.mxu1  ;;  %2141 = vmatmul.mubr.f32.gmra.mxu0 %v5098_v50  ;;  %2343 = vmatmul.mubr.f32.gmra.mxu1 %v6557_v7  ;;  %v6558_v50 = vand.u32 4294901760, %v5117_v6 }
 0x140   : > { %v5376_v32 = vadd.f32 %v1028_v17, %v828_v52  ;;  %v834_v27 = vadd.f32 %v833_v59, %v5179_v56  ;;  %2146 = vmatprep.mubr.f32.mxu0 %v6548_v62  ;;  %2348 = vmatprep.mubr.f32.mxu1 %v6548_v62 }
 0x141   : > { %v835_v9 = vpop.f32.mrf.mxu0  ;;  %v1037_v47 = vpop.f32.mrf.mxu1 }
 0x142   : > { %v5381_v36 = vadd.f32 %v1035_v0, %v834_v27  ;;  %v836_v28 = vadd.f32 %v835_v9, %v5185_v30 }
 0x143   : > { %v841_v29 = vpop.f32.mrf.mxu0  ;;  %v1044_v42 = vpop.f32.mrf.mxu1  ;;  %2149 = vmatmul.mubr.f32.gmra.mxu0 %v5117_v6  ;;  %2352 = vmatmul.mubr.f32.gmra.mxu1 %v6558_v50  ;;  %v6559_v6 = vand.u32 4294901760, %v5139_v34 }
 0x144   : > { %v5387_v43 = vadd.f32 %v1037_v47, %v836_v28  ;;  %v842_v56 = vadd.f32 %v841_v29, %v5197_v2  ;;  %2154 = vmatprep.mubr.f32.mxu0 %v6548_v62  ;;  %2357 = vmatprep.mubr.f32.mxu1 %v6548_v62 }
 0x145   : > { %v843_v13 = vpop.f32.mrf.mxu0  ;;  %v1046_v53 = vpop.f32.mrf.mxu1 }
 0x146   : > { %v5392_v16 = vadd.f32 %v1044_v42, %v842_v56  ;;  %v844_v30 = vadd.f32 %v843_v13, %v5203_v12 }
 0x147   : > { %v849_v31 = vpop.f32.mrf.mxu0  ;;  %v1053_v17 = vpop.f32.mrf.mxu1  ;;  %2157 = vmatmul.mubr.f32.gmra.mxu0 %v5139_v34  ;;  %2361 = vmatmul.mubr.f32.gmra.mxu1 %v6559_v6  ;;  %v6560_v34 = vand.u32 4294901760, %v5157_v38 }
 0x148   : > { %v5398_v52 = vadd.f32 %v1046_v53, %v844_v30  ;;  %v850_v2 = vadd.f32 %v849_v31, %v5215_v23  ;;  %2162 = vmatprep.mubr.f32.mxu0 %v6548_v62  ;;  %2366 = vmatprep.mubr.f32.mxu1 %v6548_v62 }
 0x149   : > { %v851_v59 = vpop.f32.mrf.mxu0  ;;  %v1055_v0 = vpop.f32.mrf.mxu1 }
 0x14a   : > { %v5403_v7 = vadd.f32 %v1053_v17, %v850_v2  ;;  %v852_v12 = vadd.f32 %v851_v59, %v5221_v14 }
 0x14b   : > { %v857_v27 = vpop.f32.mrf.mxu0  ;;  %v1062_v9 = vpop.f32.mrf.mxu1  ;;  %2165 = vmatmul.mubr.f32.gmra.mxu0 %v5157_v38  ;;  %2370 = vmatmul.mubr.f32.gmra.mxu1 %v6560_v34  ;;  %v6561_v38 = vand.u32 4294901760, %v5177_v61 }
 0x14c   : > { %v5409_v47 = vadd.f32 %v1055_v0, %v852_v12  ;;  %v858_v23 = vadd.f32 %v857_v27, %v5233_v57  ;;  %2170 = vmatprep.mubr.f32.mxu0 %v6548_v62  ;;  %2375 = vmatprep.mubr.f32.mxu1 %v6548_v62 }
 0x14d   : > { %v859_v28 = vpop.f32.mrf.mxu0  ;;  %v1064_v29 = vpop.f32.mrf.mxu1 }
 0x14e   : > { %v5414_v42 = vadd.f32 %v1062_v9, %v858_v23  ;;  %v860_v14 = vadd.f32 %v859_v28, %v5238_v1 }
 0x14f   : > { %v865_v50 = vpop.f32.mrf.mxu0  ;;  %v1071_v56 = vpop.f32.mrf.mxu1  ;;  %2173 = vmatmul.mubr.f32.gmra.mxu0 %v5177_v61  ;;  %2379 = vmatmul.mubr.f32.gmra.mxu1 %v6561_v38  ;;  %v6562_v61 = vand.u32 4294901760, %v5188_v37 }
 0x150   : > { %v5420_v13 = vadd.f32 %v1064_v29, %v860_v14  ;;  %v866_v57 = vadd.f32 %v865_v50, %v5250_v55  ;;  %2178 = vmatprep.mubr.f32.mxu0 %v6548_v62  ;;  %2384 = vmatprep.mubr.f32.mxu1 %v6548_v62 }
 0x151   : > { %v867_v53 = vpop.f32.mrf.mxu0  ;;  %v1073_v30 = vpop.f32.mrf.mxu1 }
 0x152   : > { %v5425_v31 = vadd.f32 %v1071_v56, %v866_v57  ;;  %v868_v1 = vadd.f32 %v867_v53, %v5254_v24 }
 0x153   : > { %v873_v17 = vpop.f32.mrf.mxu0  ;;  %v1080_v6 = vpop.f32.mrf.mxu1  ;;  %2181 = vmatmul.mubr.f32.gmra.mxu0 %v5188_v37  ;;  %2388 = vmatmul.mubr.f32.gmra.mxu1 %v6562_v61  ;;  %v6563_v37 = vand.u32 4294901760, %v5211_v44 }
 0x154   : > { %v5431_v2 = vadd.f32 %v1073_v30, %v868_v1  ;;  %v874_v55 = vadd.f32 %v873_v17, %v5264_v33  ;;  %2186 = vmatprep.mubr.f32.mxu0 %v6548_v62  ;;  %2393 = vmatprep.mubr.f32.mxu1 %v6548_v62 }
 0x155   : > { %v875_v59 = vpop.f32.mrf.mxu0  ;;  %v1082_v0 = vpop.f32.mrf.mxu1 }
 0x156   : > { %v5436_v12 = vadd.f32 %v1080_v6, %v874_v55  ;;  %v876_v24 = vadd.f32 %v875_v59, %v5268_v41 }
 0x157   : > { %v881_v27 = vpop.f32.mrf.mxu0  ;;  %v1089_v9 = vpop.f32.mrf.mxu1  ;;  %2189 = vmatmul.mubr.f32.gmra.mxu0 %v5211_v44  ;;  %2397 = vmatmul.mubr.f32.gmra.mxu1 %v6563_v37  ;;  %v6564_v44 = vand.u32 4294901760, %v5229_v54 }
 0x158   : > { %v5442_v34 = vadd.f32 %v1082_v0, %v876_v24  ;;  %v882_v33 = vadd.f32 %v881_v27, %v5275_v19  ;;  %2194 = vmatprep.mubr.f32.mxu0 %v6548_v62  ;;  %2402 = vmatprep.mubr.f32.mxu1 %v6548_v62 }
 0x159   : > { %v883_v23 = vpop.f32.mrf.mxu0  ;;  %v1091_v28 = vpop.f32.mrf.mxu1 }
 0x15a   : > { %v5447_v29 = vadd.f32 %v1089_v9, %v882_v33  ;;  %v884_v41 = vadd.f32 %v883_v23, %v5279_v26 }
 0x15b   : > { %v889_v14 = vpop.f32.mrf.mxu0  ;;  %v1098_v50 = vpop.f32.mrf.mxu1  ;;  %2197 = vmatmul.mubr.f32.gmra.mxu0 %v5229_v54  ;;  %2406 = vmatmul.mubr.f32.gmra.mxu1 %v6564_v44  ;;  %v6565_v54 = vand.u32 4294901760, %v5246_v11 }
 0x15c   : > { %v5453_v56 = vadd.f32 %v1091_v28, %v884_v41  ;;  %v890_v19 = vadd.f32 %v889_v14, %v5285_v25  ;;  %2202 = vmatprep.mubr.f32.mxu0 %v6548_v62  ;;  %2411 = vmatprep.mubr.f32.mxu1 %v6548_v62  ;;  %v6567_v28 = vld [vmem:[#allocation11_spill] sm:$0xff]  ;;  %v6568_v41 = vld [vmem:[#allocation10_spill] sm:$0xff] }
 0x15d   : > { %v891_v38 = vpop.f32.mrf.mxu0  ;;  %v1100_v57 = vpop.f32.mrf.mxu1 }
 0x15e   : > { %v5458_v53 = vadd.f32 %v1098_v50, %v890_v19  ;;  %v892_v26 = vadd.f32 %v891_v38, %v5289_v58  ;;  %v6569_v19 = vld [vmem:[#allocation6_spill] sm:$0xff] }
 0x15f   : > { %v897_v30 = vpop.f32.mrf.mxu0  ;;  %v1107_v1 = vpop.f32.mrf.mxu1  ;;  %2205 = vmatmul.mubr.f32.gmra.mxu0 %v5246_v11  ;;  %2415 = vmatmul.mubr.f32.gmra.mxu1 %v6565_v54  ;;  %v6566_v11 = vand.u32 4294901760, %v5262_v48 }
 0x160   : > { %v5464_v17 = vadd.f32 %v1100_v57, %v892_v26  ;;  %v898_v25 = vadd.f32 %v897_v30, %v5292_v20  ;;  %2210 = vmatprep.mubr.f32.mxu0 %v6548_v62  ;;  %2420 = vmatprep.mubr.f32.mxu1 %v6548_v62 }
 0x161   : > { %v899_v6 = vpop.f32.mrf.mxu0  ;;  %v1109_v61 = vpop.f32.mrf.mxu1 }
 0x162   : > { %v5469_v55 = vadd.f32 %v1107_v1, %v898_v25  ;;  %v900_v58 = vadd.f32 %v899_v6, %v5296_v8 }
 0x163   : > { %v905_v59 = vpop.f32.mrf.mxu0  ;;  %v1116_v0 = vpop.f32.mrf.mxu1  ;;  %2213 = vmatmul.mubr.f32.gmra.mxu0 %v5262_v48  ;;  %2424 = vmatmul.mubr.f32.gmra.mxu1 %v6566_v11 }
 0x164   : > { %v5475_v24 = vadd.f32 %v1109_v61, %v900_v58  ;;  %v906_v20 = vadd.f32 %v905_v59, %v5299_v49  ;;  %2500 = vmatprep.mubr.f32.mxu0 %v6548_v62  ;;  %2679 = vmatprep.mubr.f32.mxu1 %v6548_v62  ;;  %v6571_v58 = vld [vmem:[#allocation13_spill] sm:$0xff] }
 0x165   : > { %v907_v27 = vpop.f32.mrf.mxu0  ;;  %v1118_v9 = vpop.f32.mrf.mxu1 }
 0x166   : > { %v5480_v37 = vadd.f32 %v1116_v0, %v906_v20  ;;  %v908_v8 = vadd.f32 %v907_v27, %v5303_v60 }
 0x167   : > { %v1194_v33 = vpop.f32.mrf.mxu0  ;;  %v1373_v23 = vpop.f32.mrf.mxu1  ;;  %2502 = vmatmul.mubr.f32.vlgmr.msra.gmra.mxu0 %v6567_v28  ;;  %2681 = vmatmul.mubr.f32.vlgmr.msra.gmra.mxu1 %v6567_v28 }
 0x168   : > { %v5485_v48 = vadd.f32 %v1118_v9, %v908_v8  ;;  %v1195_v49 = vadd.f32 %v1194_v33, %v5313_v10  ;;  %2934 = vmatpush1.msra.mxu0 %v4605_v4  ;;  %3185 = vmatpush1.msra.mxu1 %v6568_v41  ;;  %v6570_v10 = vld [vmem:[#allocation12_spill] sm:$0xff]  ;;  %v6572_v8 = vld [vmem:[#allocation14_spill] sm:$0xff] }
 0x169   : > { %v1196_v14 = vpop.f32.mrf.mxu0  ;;  %v1375_v50 = vpop.f32.mrf.mxu1  ;;  %2507 = vmatprep.mubr.f32.mxu0 %v6548_v62  ;;  %2686 = vmatprep.mubr.f32.mxu1 %v6548_v62 }
 0x16a   : > { %v1374_v60 = vadd.f32 %v1373_v23, %v1195_v49  ;;  %v1197_v44 = vadd.f32 %v1196_v14, %v5321_v15  ;;  %3363 = vmatprep.subr.mxu0 %v6569_v19  ;;  %3559 = vmatprep.subr.mxu1 %v4603_v3  ;;  %v6573_v19 = vld [vmem:[#allocation15_spill] sm:$0xff] }
 0x16b   : > { %v1201_v38 = vpop.f32.mrf.mxu0  ;;  %v1380_v57 = vpop.f32.mrf.mxu1  ;;  %2509 = vmatmul.mubr.f32.gmra.mxu0 %v6570_v10  ;;  %2688 = vmatmul.mubr.f32.gmra.mxu1 %v6570_v10 }
 0x16c   : > { %v1376_v26 = vadd.f32 %v1375_v50, %v1197_v44  ;;  %v1202_v30 = vadd.f32 %v1201_v38, %v5326_v40  ;;  %2514 = vmatprep.mubr.f32.mxu0 %v6548_v62  ;;  %2693 = vmatprep.mubr.f32.mxu1 %v6548_v62 }
 0x16d   : > { %v1203_v1 = vpop.f32.mrf.mxu0  ;;  %v1382_v54 = vpop.f32.mrf.mxu1 }
 0x16e   : > { %v1381_v15 = vadd.f32 %v1380_v57, %v1202_v30  ;;  %v1204_v25 = vadd.f32 %v1203_v1, %v5332_v22 }
 0x16f   : > { %v1208_v6 = vpop.f32.mrf.mxu0  ;;  %v1387_v61 = vpop.f32.mrf.mxu1  ;;  %2516 = vmatmul.mubr.f32.gmra.mxu0 %v6571_v58  ;;  %2695 = vmatmul.mubr.f32.gmra.mxu1 %v6571_v58 }
 0x170   : > { %v1383_v59 = vadd.f32 %v1382_v54, %v1204_v25  ;;  %v1209_v0 = vadd.f32 %v1208_v6, %v5337_v63  ;;  %2521 = vmatprep.mubr.f32.mxu0 %v6548_v62  ;;  %2700 = vmatprep.mubr.f32.mxu1 %v6548_v62  ;;  %v6574_v25 = vld [vmem:[#allocation16_spill] sm:$0xff] }
 0x171   : > { %v1210_v40 = vpop.f32.mrf.mxu0  ;;  %v1389_v11 = vpop.f32.mrf.mxu1 }
 0x172   : > { %v1388_v20 = vadd.f32 %v1387_v61, %v1209_v0  ;;  %v1211_v27 = vadd.f32 %v1210_v40, %v5343_v39 }
 0x173   : > { %v1215_v9 = vpop.f32.mrf.mxu0  ;;  %v1394_v22 = vpop.f32.mrf.mxu1  ;;  %2523 = vmatmul.mubr.f32.gmra.mxu0 %v6572_v8  ;;  %2702 = vmatmul.mubr.f32.gmra.mxu1 %v6572_v8 }
 0x174   : > { %v1483_v33 = vmin.f32 %v1374_v60, %v1388_v20  ;;  %v1390_v23 = vadd.f32 %v1389_v11, %v1211_v27  ;;  %v1216_v28 = vadd.f32 %v1215_v9, %v5348_v35  ;;  %2528 = vmatprep.mubr.f32.mxu0 %v6548_v62  ;;  %2707 = vmatprep.mubr.f32.mxu1 %v6548_v62  ;;  %v6575_v20 = vld [vmem:[#allocation17_spill] sm:$0xff] }
 0x175   : > { %v1217_v63 = vpop.f32.mrf.mxu0  ;;  %v1396_v49 = vpop.f32.mrf.mxu1 }
 0x176   : > { %v1504_v41 = vmin.f32 %v1376_v26, %v1390_v23  ;;  %v1395_v14 = vadd.f32 %v1394_v22, %v1216_v28  ;;  %v1218_v39 = vadd.f32 %v1217_v63, %v5354_v18 }
 0x177   : > { %v1222_v50 = vpop.f32.mrf.mxu0  ;;  %v1401_v44 = vpop.f32.mrf.mxu1  ;;  %2530 = vmatmul.mubr.f32.gmra.mxu0 %v6573_v19  ;;  %2709 = vmatmul.mubr.f32.gmra.mxu1 %v6573_v19 }
 0x178   : > { %v1484_v60 = vmin.f32 %v1381_v15, %v1395_v14  ;;  %v1397_v38 = vadd.f32 %v1396_v49, %v1218_v39  ;;  %v1223_v35 = vadd.f32 %v1222_v50, %v5359_v46  ;;  %2535 = vmatprep.mubr.f32.mxu0 %v6548_v62  ;;  %2714 = vmatprep.mubr.f32.mxu1 %v6548_v62  ;;  %v6576_v49 = vld [vmem:[#allocation18_spill] sm:$0xff] }
 0x179   : > { %v1224_v57 = vpop.f32.mrf.mxu0  ;;  %v1403_v10 = vpop.f32.mrf.mxu1 }
 0x17a   : > { %v1505_v26 = vmin.f32 %v1383_v59, %v1397_v38  ;;  %v1402_v30 = vadd.f32 %v1401_v44, %v1223_v35  ;;  %v1225_v18 = vadd.f32 %v1224_v57, %v5365_v51  ;;  %v6577_v35 = vld [vmem:[#allocation19_spill] sm:$0xff] }
 0x17b   : > { %v1229_v1 = vpop.f32.mrf.mxu0  ;;  %v1408_v54 = vpop.f32.mrf.mxu1  ;;  %2537 = vmatmul.mubr.f32.gmra.mxu0 %v6574_v25  ;;  %2716 = vmatmul.mubr.f32.gmra.mxu1 %v6574_v25 }
 0x17c   : > { %v1485_v15 = vmin.f32 %v1483_v33, %v1402_v30  ;;  %v1404_v6 = vadd.f32 %v1403_v10, %v1225_v18  ;;  %v1230_v46 = vadd.f32 %v1229_v1, %v5370_v21  ;;  %2542 = vmatprep.mubr.f32.mxu0 %v6548_v62  ;;  %2721 = vmatprep.mubr.f32.mxu1 %v6548_v62 }
 0x17d   : > { %v1231_v61 = vpop.f32.mrf.mxu0  ;;  %v1410_v58 = vpop.f32.mrf.mxu1 }
 0x17e   : > { %v1506_v59 = vmin.f32 %v1504_v41, %v1404_v6  ;;  %v1409_v0 = vadd.f32 %v1408_v54, %v1230_v46  ;;  %v1232_v51 = vadd.f32 %v1231_v61, %v5376_v32 }
 0x17f   : > { %v1236_v40 = vpop.f32.mrf.mxu0  ;;  %v1415_v11 = vpop.f32.mrf.mxu1  ;;  %2544 = vmatmul.mubr.f32.gmra.mxu0 %v6575_v20  ;;  %2723 = vmatmul.mubr.f32.gmra.mxu1 %v6575_v20  ;;  %v6579_v20 = vld [vmem:[#allocation21_spill] sm:$0xff] }
 0x180   : > { %v1486_v27 = vmin.f32 %v1484_v60, %v1409_v0  ;;  %v1411_v9 = vadd.f32 %v1410_v58, %v1232_v51  ;;  %v1237_v21 = vadd.f32 %v1236_v40, %v5381_v36  ;;  %2549 = vmatprep.mubr.f32.mxu0 %v6548_v62  ;;  %2728 = vmatprep.mubr.f32.mxu1 %v6548_v62 }
 0x181   : > { %v1238_v22 = vpop.f32.mrf.mxu0  ;;  %v1417_v8 = vpop.f32.mrf.mxu1 }
 0x182   : > { %v1507_v33 = vmin.f32 %v1505_v26, %v1411_v9  ;;  %v1416_v23 = vadd.f32 %v1415_v11, %v1237_v21  ;;  %v1239_v32 = vadd.f32 %v1238_v22, %v5387_v43 }
 0x183   : > { %v1243_v28 = vpop.f32.mrf.mxu0  ;;  %v1422_v63 = vpop.f32.mrf.mxu1  ;;  %2551 = vmatmul.mubr.f32.gmra.mxu0 %v6576_v49  ;;  %2730 = vmatmul.mubr.f32.gmra.mxu1 %v6576_v49 }
 0x184   : > { %v1487_v41 = vmin.f32 %v1485_v15, %v1416_v23  ;;  %v1418_v14 = vadd.f32 %v1417_v8, %v1239_v32  ;;  %v1244_v36 = vadd.f32 %v1243_v28, %v5392_v16  ;;  %2556 = vmatprep.mubr.f32.mxu0 %v6548_v62  ;;  %2735 = vmatprep.mubr.f32.mxu1 %v6548_v62  ;;  %v6578_v15 = vld [vmem:[#allocation20_spill] sm:$0xff] }
 0x185   : > { %v1245_v39 = vpop.f32.mrf.mxu0  ;;  %v1424_v50 = vpop.f32.mrf.mxu1 }
 0x186   : > { %v1508_v44 = vmin.f32 %v1506_v59, %v1418_v14  ;;  %v1423_v19 = vadd.f32 %v1422_v63, %v1244_v36  ;;  %v1246_v43 = vadd.f32 %v1245_v39, %v5398_v52  ;;  %v4357_v59 = vld [vmem:[%s4601_s3 + $0x100] sm:$0xff]  ;;  %v4359_v14 = vld [vmem:[%s4601_s3 + $0x110] sm:$0xff] }
 0x187   : > { %v1250_v60 = vpop.f32.mrf.mxu0  ;;  %v1429_v38 = vpop.f32.mrf.mxu1  ;;  %2558 = vmatmul.mubr.f32.gmra.mxu0 %v6577_v35  ;;  %2737 = vmatmul.mubr.f32.gmra.mxu1 %v6577_v35  ;;  %v2854_v22 = vsel %vm234_vm0, %v4357_v59, 0  ;;  %v2860_v35 = vsel %vm234_vm0, %v4359_v14, 0 }
 0x188   : > { %v1488_v57 = vmin.f32 %v1486_v27, %v1423_v19  ;;  %v1425_v10 = vadd.f32 %v1424_v50, %v1246_v43  ;;  %v1251_v16 = vadd.f32 %v1250_v60, %v5403_v7  ;;  %2563 = vmatprep.mubr.f32.mxu0 %v6548_v62  ;;  %2742 = vmatprep.mubr.f32.mxu1 %v6548_v62  ;;  %v4358_v27 = vld [vmem:[%s4601_s3 + $0x108] sm:$0xff] }
 0x189   : > { %v1252_v26 = vpop.f32.mrf.mxu0  ;;  %v1431_v30 = vpop.f32.mrf.mxu1  ;;  %v2857_v28 = vsel %vm234_vm0, %v4358_v27, 0 }
 0x18a   : > { %v1509_v18 = vmin.f32 %v1507_v33, %v1425_v10  ;;  %v1430_v1 = vadd.f32 %v1429_v38, %v1251_v16  ;;  %v1253_v52 = vadd.f32 %v1252_v26, %v5409_v47  ;;  %v5576_v19 = vand.u32 4294901760, %v2857_v28  ;;  %v6581_v16 = vld [vmem:[#allocation23_spill] sm:$0xff] }
 0x18b   : > { %v1257_v54 = vpop.f32.mrf.mxu0  ;;  %v1436_v25 = vpop.f32.mrf.mxu1  ;;  %2565 = vmatmul.mubr.f32.gmra.mxu0 %v6578_v15  ;;  %2744 = vmatmul.mubr.f32.gmra.mxu1 %v6578_v15 }
 0x18c   : > { %v5545_v6 = vmin.f32 %v1487_v41, %v1430_v1  ;;  %v1432_v7 = vadd.f32 %v1431_v30, %v1253_v52  ;;  %v1258_v46 = vadd.f32 %v1257_v54, %v5414_v42  ;;  %2570 = vmatprep.mubr.f32.mxu0 %v6548_v62  ;;  %2749 = vmatprep.mubr.f32.mxu1 %v6548_v62  ;;  %v6580_v41 = vld [vmem:[#allocation22_spill] sm:$0xff]  ;;  %v5590_v52 = vand.u32 4294901760, %v2860_v35  ;;  %v4360_v54 = vld [vmem:[%s4601_s3 + $0x118] sm:$0xff] }
 0x18d   : > { %v1259_v61 = vpop.f32.mrf.mxu0  ;;  %v1438_v58 = vpop.f32.mrf.mxu1 }
 0x18e   : > { %v5551_v47 = vmin.f32 %v1508_v44, %v1432_v7  ;;  %v1437_v0 = vadd.f32 %v1436_v25, %v1258_v46  ;;  %v1260_v51 = vadd.f32 %v1259_v61, %v5420_v13  ;;  %v5596_v7 = vsub.f32 %v2857_v28, %v5576_v19  ;;  %v6582_v61 = vld [vmem:[#allocation24_spill] sm:$0xff] }
 0x18f   : > { %v1264_v40 = vpop.f32.mrf.mxu0  ;;  %v1443_v11 = vpop.f32.mrf.mxu1  ;;  %2572 = vmatmul.mubr.f32.gmra.mxu0 %v6579_v20  ;;  %2751 = vmatmul.mubr.f32.gmra.mxu1 %v6579_v20  ;;  %v4361_v20 = vld [vmem:[%s4601_s3 + $0x120] sm:$0xff] }
 0x190   : > { %v5557_v42 = vmin.f32 %v1488_v57, %v1437_v0  ;;  %v1439_v9 = vadd.f32 %v1438_v58, %v1260_v51  ;;  %v1265_v21 = vadd.f32 %v1264_v40, %v5425_v31  ;;  %2577 = vmatprep.mubr.f32.mxu0 %v6548_v62  ;;  %2756 = vmatprep.mubr.f32.mxu1 %v6548_v62  ;;  %v5569_v31 = vand.u32 4294901760, %v2854_v22 }
 0x191   : > { %v1266_v13 = vpop.f32.mrf.mxu0  ;;  %v1445_v8 = vpop.f32.mrf.mxu1 }
 0x192   : > { %v5563_v33 = vmin.f32 %v1509_v18, %v1439_v9  ;;  %v1444_v23 = vadd.f32 %v1443_v11, %v1265_v21  ;;  %v1267_v32 = vadd.f32 %v1266_v13, %v5431_v2  ;;  %v5608_v11 = vsub.f32 %v2860_v35, %v5590_v52 }
 0x193   : > { %v1271_v63 = vpop.f32.mrf.mxu0  ;;  %v1450_v49 = vpop.f32.mrf.mxu1  ;;  %2579 = vmatmul.mubr.f32.gmra.mxu0 %v6580_v41  ;;  %2758 = vmatmul.mubr.f32.gmra.mxu1 %v6580_v41  ;;  %v6493_v21 = vand.u32 4294901760, %v5596_v7 }
 0x194   : > { %v1491_v36 = vmin.f32 %v5545_v6, %v1444_v23  ;;  %v1446_v39 = vadd.f32 %v1445_v8, %v1267_v32  ;;  %v1272_v50 = vadd.f32 %v1271_v63, %v5436_v12  ;;  %2584 = vmatprep.mubr.f32.mxu0 %v6548_v62  ;;  %2763 = vmatprep.mubr.f32.mxu1 %v6548_v62 }
 0x195   : > { %v1273_v2 = vpop.f32.mrf.mxu0  ;;  %v1452_v44 = vpop.f32.mrf.mxu1  ;;  %v5584_v12 = vsub.f32 %v2854_v22, %v5569_v31 }
 0x196   : > { %v1512_v43 = vmin.f32 %v5551_v47, %v1446_v39  ;;  %v1451_v60 = vadd.f32 %v1450_v49, %v1272_v50  ;;  %v1274_v38 = vadd.f32 %v1273_v2, %v5442_v34  ;;  %v4362_v49 = vld [vmem:[%s4601_s3 + $0x128] sm:$0xff] }
 0x197   : > { %v1278_v57 = vpop.f32.mrf.mxu0  ;;  %v1457_v10 = vpop.f32.mrf.mxu1  ;;  %2586 = vmatmul.mubr.f32.gmra.mxu0 %v6581_v16  ;;  %2765 = vmatmul.mubr.f32.gmra.mxu1 %v6581_v16  ;;  %v6494_v58 = vand.u32 4294901760, %v5584_v12  ;;  %v2869_v35 = vsel %vm234_vm0, %v4362_v49, 0 }
 0x198   : > { %v1492_v26 = vmin.f32 %v5557_v42, %v1451_v60  ;;  %v1453_v30 = vadd.f32 %v1452_v44, %v1274_v38  ;;  %v1279_v18 = vadd.f32 %v1278_v57, %v5447_v29  ;;  %2591 = vmatprep.mubr.f32.mxu0 %v6548_v62  ;;  %2770 = vmatprep.mubr.f32.mxu1 %v6548_v62  ;;  %v4363_v57 = vld [vmem:[%s4601_s3 + $0x130] sm:$0xff] }
 0x199   : > { %v1280_v34 = vpop.f32.mrf.mxu0  ;;  %v1459_v1 = vpop.f32.mrf.mxu1  ;;  %v2971_v13 = vsub.f32 %v5584_v12, %v6494_v58 }
 0x19a   : > { %v1513_v25 = vmin.f32 %v5563_v33, %v1453_v30  ;;  %v1458_v15 = vadd.f32 %v1457_v10, %v1279_v18  ;;  %v1281_v6 = vadd.f32 %v1280_v34, %v5453_v56  ;;  %v2863_v56 = vsel %vm234_vm0, %v4360_v54, 0 }
 0x19b   : > { %v1285_v46 = vpop.f32.mrf.mxu0  ;;  %v1464_v29 = vpop.f32.mrf.mxu1  ;;  %2593 = vmatmul.mubr.f32.gmra.mxu0 %v6582_v61  ;;  %2772 = vmatmul.mubr.f32.gmra.mxu1 %v6582_v61  ;;  %v5620_v8 = vand.u32 4294901760, %v2863_v56  ;;  %v2972_v2 = vand.u32 4294901760, %v2971_v13 }
 0x19c   : > { %v5601_v59 = vmin.f32 %v1491_v36, %v1458_v15  ;;  %v1460_v47 = vadd.f32 %v1459_v1, %v1281_v6  ;;  %v1286_v0 = vadd.f32 %v1285_v46, %v5458_v53  ;;  %2598 = vmatprep.mubr.f32.mxu0 %v6548_v62  ;;  %2777 = vmatprep.mubr.f32.mxu1 %v6548_v62  ;;  %v5655_v15 = vand.u32 4294901760, %v2869_v35 }
 0x19d   : > { %v1287_v51 = vpop.f32.mrf.mxu0  ;;  %v1466_v40 = vpop.f32.mrf.mxu1  ;;  %6583 = vst [vmem:[#allocation11_spill] sm:$0xff] %v5620_v8  ;;  %v5635_v44 = vsub.f32 %v2863_v56, %v5620_v8  ;;  %v2872_v6 = vsel %vm234_vm0, %v4363_v57, 0  ;;  %v4366_v57 = vld [vmem:[%s4601_s3 + $0x148] sm:$0xff] }
 0x19e   : > { %v5611_v27 = vmin.f32 %v1512_v43, %v1460_v47  ;;  %v1465_v42 = vadd.f32 %v1464_v29, %v1286_v0  ;;  %v1288_v9 = vadd.f32 %v1287_v51, %v5464_v17  ;;  %v2866_v17 = vsel %vm234_vm0, %v4361_v20, 0  ;;  %6585 = vst [vmem:[#allocation6_spill] sm:$0xff] %v5655_v15 }
 0x19f   : > { %v1292_v53 = vpop.f32.mrf.mxu0  ;;  %v1471_v22 = vpop.f32.mrf.mxu1  ;;  %2600 = vmatmul.mubr.f32.gmra.mxu0 %v5231_v5  ;;  %2779 = vmatmul.mubr.f32.gmra.mxu1 %v5231_v5  ;;  %v6491_v5 = vand.u32 4294901760, %v5608_v11  ;;  %v5637_v43 = vand.u32 4294901760, %v2866_v17  ;;  %v6490_v54 = vand.u32 4294901760, %v5635_v44 }
 0x1a0   : > { %v1494_v33 = vmin.f32 %v1492_v26, %v1465_v42  ;;  %v1467_v23 = vadd.f32 %v1466_v40, %v1288_v9  ;;  %v1293_v32 = vadd.f32 %v1292_v53, %v5469_v55  ;;  %2605 = vmatprep.mubr.f32.mxu0 %v6548_v62  ;;  %2784 = vmatprep.mubr.f32.mxu1 %v6548_v62  ;;  %v6589_v42 = vld [vmem:[#allocation8_spill] sm:$0xff] }
 0x1a1   : > { %v1294_v28 = vpop.f32.mrf.mxu0  ;;  %v1473_v63 = vpop.f32.mrf.mxu1  ;;  %v2982_v55 = vsub.f32 %v5596_v7, %v6493_v21  ;;  %6584 = vst [vmem:[#allocation10_spill] sm:$0xff] %v5637_v43  ;;  %v2993_v16 = vsub.f32 %v5608_v11, %v6491_v5 }
 0x1a2   : > { %v1515_v41 = vmin.f32 %v1513_v25, %v1467_v23  ;;  %v1472_v14 = vadd.f32 %v1471_v22, %v1293_v32  ;;  %v1295_v36 = vadd.f32 %v1294_v28, %v5475_v24  ;;  %v5653_v25 = vsub.f32 %v2866_v17, %v5637_v43 }
 0x1a3   : > { %v1299_v39 = vpop.f32.mrf.mxu0  ;;  %v1478_v50 = vpop.f32.mrf.mxu1  ;;  %2607 = vmatmul.mubr.f32.gmra.mxu0 %v5248_v45  ;;  %2786 = vmatmul.mubr.f32.gmra.mxu1 %v5248_v45  ;;  %v2994_v56 = vand.u32 4294901760, %v2993_v16  ;;  %v3004_v22 = vsub.f32 %v5635_v44, %v6490_v54 }
 0x1a4   : > { %v1495_v60 = vmin.f32 %v5601_v59, %v1472_v14  ;;  %v1474_v38 = vadd.f32 %v1473_v63, %v1295_v36  ;;  %v1300_v24 = vadd.f32 %v1299_v39, %v5480_v37  ;;  %2967 = vmatprep.mubr.f32.mxu0 %v6548_v62  ;;  %3218 = vmatprep.mubr.f32.mxu1 %v6548_v62  ;;  %v2983_v37 = vand.u32 4294901760, %v2982_v55  ;;  %v4364_v59 = vld [vmem:[%s4601_s3 + $0x138] sm:$0xff]  ;;  %v4365_v63 = vld [vmem:[%s4601_s3 + $0x140] sm:$0xff] }
 0x1a5   : > { %v1301_v10 = vpop.f32.mrf.mxu0  ;;  %v1480_v45 = vpop.f32.mrf.mxu1  ;;  %v6489_v13 = vand.u32 4294901760, %v5653_v25  ;;  %v2875_v23 = vsel %vm234_vm0, %v4364_v59, 0  ;;  %v3005_v39 = vand.u32 4294901760, %v3004_v22 }
 0x1a6   : > { %v1516_v26 = vmin.f32 %v5611_v27, %v1474_v38  ;;  %v1479_v30 = vadd.f32 %v1478_v50, %v1300_v24  ;;  %v1302_v18 = vadd.f32 %v1301_v10, %v5485_v48  ;;  %v6586_v48 = vld [vmem:[#allocation7_spill] sm:$0xff]  ;;  %v5669_v27 = vand.u32 4294901760, %v2872_v6 }
 0x1a7   : > { %v1665_v34 = vpop.f32.mrf.mxu0  ;;  %v1912_v1 = vpop.f32.mrf.mxu1  ;;  %2973 = vmatmul.mubr.f32.vlgmr.msra.gmra.mxu0 %v2972_v2  ;;  %3220 = vmatmul.mubr.f32.vlgmr.msra.gmra.mxu1 %v5569_v31  ;;  %v5694_v14 = vand.u32 4294901760, %v2875_v23  ;;  %v3015_v50 = vsub.f32 %v5653_v25, %v6489_v13  ;;  %v2878_v38 = vsel %vm234_vm0, %v4365_v63, 0 }
 0x1a8   : > { %v1496_v46 = vmin.f32 %v1494_v33, %v1479_v30  ;;  %v1481_v29 = vadd.f32 %v1480_v45, %v1302_v18  ;;  %v5658_v61 = vadd.f32 %v1912_v1, %v1665_v34  ;;  %3366 = vmatpush1.msra.mxu0 %v6586_v48  ;;  %3561 = vmatpush1.msra.mxu1 %v4605_v4  ;;  %v5717_v34 = vand.u32 4294901760, %v2878_v38  ;;  %v4367_v48 = vld [vmem:[%s4601_s3 + $0x150] sm:$0xff] }
 0x1a9   : > { %v1667_v47 = vpop.f32.mrf.mxu0  ;;  %v1914_v0 = vpop.f32.mrf.mxu1  ;;  %2978 = vmatprep.mubr.f32.mxu0 %v6548_v62  ;;  %3225 = vmatprep.mubr.f32.mxu1 %v6548_v62  ;;  %6588 = vst [vmem:[#allocation13_spill] sm:$0xff] %v5669_v27  ;;  %v5679_v33 = vsub.f32 %v2869_v35, %v5655_v15  ;;  %6591 = vst [vmem:[#allocation15_spill] sm:$0xff] %v5694_v14  ;;  %v5711_v16 = vsub.f32 %v2875_v23, %v5694_v14  ;;  %v3016_v18 = vand.u32 4294901760, %v3015_v50 }
 0x1aa   : > { %v5665_v51 = vmin.f32 %v1495_v60, %v1496_v46  ;;  %v1517_v40 = vmin.f32 %v1515_v41, %v1481_v29  ;;  %v5667_v20 = vadd.f32 %v1914_v0, %v1667_v47  ;;  %3772 = vmatprep.subr.mxu0 %v6589_v42  ;;  %3953 = vmatprep.subr.mxu1 %v4603_v3  ;;  %v2884_v23 = vsel %vm234_vm0, %v4367_v48, 0 }
 0x1ab   : > { %v1676_v9 = vpop.f32.mrf.mxu0  ;;  %v1919_v53 = vpop.f32.mrf.mxu1  ;;  %2984 = vmatmul.mubr.f32.gmra.mxu0 %v2983_v37  ;;  %3227 = vmatmul.mubr.f32.gmra.mxu1 %v5576_v19  ;;  %v5692_v41 = vsub.f32 %v2872_v6, %v5669_v27  ;;  %v6488_v2 = vand.u32 4294901760, %v5679_v33  ;;  %6592 = vst [vmem:[#allocation16_spill] sm:$0xff] %v5717_v34  ;;  %v2881_v6 = vsel %vm234_vm0, %v4366_v57, 0  ;;  %v6485_v0 = vand.u32 4294901760, %v5711_v16 }
 0x1ac   : > { %6587 = vst [vmem:[#allocation12_spill] sm:$0xff] %v5665_v51  ;;  %v5682_v32 = vmin.f32 %v1516_v26, %v1517_v40  ;;  %v5684_v17 = vadd.f32 %v1919_v53, %v1676_v9  ;;  %2989 = vmatprep.mubr.f32.mxu0 %v6548_v62  ;;  %3232 = vmatprep.mubr.f32.mxu1 %v6548_v62  ;;  %v5735_v53 = vand.u32 4294901760, %v2881_v6  ;;  %v5753_v57 = vand.u32 4294901760, %v2884_v23 }
 0x1ad   : > { %v1678_v3 = vpop.f32.mrf.mxu0  ;;  %v1921_v28 = vpop.f32.mrf.mxu1  ;;  %v6487_v45 = vand.u32 4294901760, %v5692_v41  ;;  %v3026_v37 = vsub.f32 %v5679_v33, %v6488_v2  ;;  %v5733_v9 = vsub.f32 %v2878_v38, %v5717_v34 }
 0x1ae   : > { %6590 = vst [vmem:[#allocation14_spill] sm:$0xff] %v5682_v32  ;;  %v5689_v49 = vadd.f32 %v1921_v28, %v1678_v3  ;;  %6593 = vst [vmem:[#allocation17_spill] sm:$0xff] %v5735_v53  ;;  %v4368_v3 = vld [vmem:[%s4601_s3 + $0x158] sm:$0xff] }
 0x1af   : > { %v1687_v36 = vpop.f32.mrf.mxu0  ;;  %v1926_v55 = vpop.f32.mrf.mxu1  ;;  %2995 = vmatmul.mubr.f32.gmra.mxu0 %v2994_v56  ;;  %3234 = vmatmul.mubr.f32.gmra.mxu1 %v5590_v52  ;;  %v3037_v47 = vsub.f32 %v5692_v41, %v6487_v45  ;;  %v3027_v42 = vand.u32 4294901760, %v3026_v37  ;;  %6594 = vst [vmem:[#allocation18_spill] sm:$0xff] %v5753_v57 }
 0x1b0   : > { %v5701_v60 = vadd.f32 %v1926_v55, %v1687_v36  ;;  %3000 = vmatprep.mubr.f32.mxu0 %v6548_v62  ;;  %3239 = vmatprep.mubr.f32.mxu1 %v6548_v62 }
 0x1b1   : > { %v1689_v24 = vpop.f32.mrf.mxu0  ;;  %v1928_v35 = vpop.f32.mrf.mxu1  ;;  %v3038_v55 = vand.u32 4294901760, %v3037_v47 }
 0x1b2   : > { %v5707_v10 = vadd.f32 %v1928_v35, %v1689_v24  ;;  %v6484_v24 = vand.u32 4294901760, %v5733_v9  ;;  %v5751_v35 = vsub.f32 %v2881_v6, %v5735_v53 }
 0x1b3   : > { %v1698_v26 = vpop.f32.mrf.mxu0  ;;  %v1933_v30 = vpop.f32.mrf.mxu1  ;;  %3006 = vmatmul.mubr.f32.gmra.mxu0 %v3005_v39  ;;  %3241 = vmatmul.mubr.f32.gmra.mxu1 %v5620_v8  ;;  %v3048_v39 = vsub.f32 %v5711_v16, %v6485_v0  ;;  %v4371_v0 = vld [vmem:[%s4601_s3 + $0x170] sm:$0xff] }
 0x1b4   : > { %v5719_v1 = vadd.f32 %v1933_v30, %v1698_v26  ;;  %3011 = vmatprep.mubr.f32.mxu0 %v6548_v62  ;;  %3246 = vmatprep.mubr.f32.mxu1 %v6548_v62  ;;  %v2887_v26 = vsel %vm234_vm0, %v4368_v3, 0  ;;  %v5771_v3 = vsub.f32 %v2884_v23, %v5753_v57 }
 0x1b5   : > { %v1700_v46 = vpop.f32.mrf.mxu0  ;;  %v1935_v29 = vpop.f32.mrf.mxu1  ;;  %v5763_v48 = vand.u32 4294901760, %v2887_v26 }
 0x1b6   : > { %v5725_v59 = vadd.f32 %v1935_v29, %v1700_v46  ;;  %v4369_v46 = vld [vmem:[%s4601_s3 + $0x160] sm:$0xff] }
 0x1b7   : > { %v1709_v56 = vpop.f32.mrf.mxu0  ;;  %v1940_v40 = vpop.f32.mrf.mxu1  ;;  %3017 = vmatmul.mubr.f32.gmra.mxu0 %v3016_v18  ;;  %3248 = vmatmul.mubr.f32.gmra.mxu1 %v5637_v43  ;;  %6595 = vst [vmem:[#allocation19_spill] sm:$0xff] %v5763_v48 }
 0x1b8   : > { %v5737_v22 = vadd.f32 %v1940_v40, %v1709_v56  ;;  %3022 = vmatprep.mubr.f32.mxu0 %v6548_v62  ;;  %3253 = vmatprep.mubr.f32.mxu1 %v6548_v62  ;;  %v3049_v56 = vand.u32 4294901760, %v3048_v39  ;;  %v3059_v40 = vsub.f32 %v5733_v9, %v6484_v24  ;;  %v4370_v39 = vld [vmem:[%s4601_s3 + $0x168] sm:$0xff] }
 0x1b9   : > { %v1711_v28 = vpop.f32.mrf.mxu0  ;;  %v1942_v63 = vpop.f32.mrf.mxu1 }
 0x1ba   : > { %v5743_v36 = vadd.f32 %v1942_v63, %v1711_v28  ;;  %v2890_v63 = vsel %vm234_vm0, %v4369_v46, 0  ;;  %v6492_v46 = vand.u32 4294901760, %v5771_v3 }
 0x1bb   : > { %v1720_v50 = vpop.f32.mrf.mxu0  ;;  %v1947_v38 = vpop.f32.mrf.mxu1  ;;  %3028 = vmatmul.mubr.f32.gmra.mxu0 %v3027_v42  ;;  %3255 = vmatmul.mubr.f32.gmra.mxu1 %v5655_v15  ;;  %v6486_v42 = vand.u32 4294901760, %v5751_v35  ;;  %v5789_v24 = vand.u32 4294901760, %v2890_v63 }
 0x1bc   : > { %v5756_v30 = vadd.f32 %v1947_v38, %v1720_v50  ;;  %3033 = vmatprep.mubr.f32.mxu0 %v6548_v62  ;;  %3260 = vmatprep.mubr.f32.mxu1 %v6548_v62 }
 0x1bd   : > { %v1722_v18 = vpop.f32.mrf.mxu0  ;;  %v1949_v37 = vpop.f32.mrf.mxu1  ;;  %6596 = vst [vmem:[#allocation20_spill] sm:$0xff] %v5789_v24 }
 0x1be   : > { %v5761_v29 = vadd.f32 %v1949_v37, %v1722_v18  ;;  %v5782_v18 = vsub.f32 %v2887_v26, %v5763_v48  ;;  %v2893_v26 = vsel %vm234_vm0, %v4370_v39, 0  ;;  %v5805_v39 = vsub.f32 %v2890_v63, %v5789_v24 }
 0x1bf   : > { %v1731_v6 = vpop.f32.mrf.mxu0  ;;  %v1954_v47 = vpop.f32.mrf.mxu1  ;;  %3039 = vmatmul.mubr.f32.gmra.mxu0 %v3038_v55  ;;  %3262 = vmatmul.mubr.f32.gmra.mxu1 %v5669_v27  ;;  %v5807_v13 = vand.u32 4294901760, %v2893_v26 }
 0x1c0   : > { %v5773_v28 = vadd.f32 %v1954_v47, %v1731_v6  ;;  %3044 = vmatprep.mubr.f32.mxu0 %v6548_v62  ;;  %3267 = vmatprep.mubr.f32.mxu1 %v6548_v62  ;;  %v3060_v6 = vand.u32 4294901760, %v3059_v40  ;;  %v3070_v47 = vsub.f32 %v5751_v35, %v6486_v42  ;;  %v6496_v42 = vand.u32 4294901760, %v5782_v18 }
 0x1c1   : > { %v1733_v55 = vpop.f32.mrf.mxu0  ;;  %v1956_v50 = vpop.f32.mrf.mxu1  ;;  %6597 = vst [vmem:[#allocation21_spill] sm:$0xff] %v5807_v13  ;;  %v5823_v58 = vsub.f32 %v2893_v26, %v5807_v13  ;;  %v6599_v26 = vand.u32 4294901760, %v5805_v39 }
 0x1c2   : > { %v5779_v38 = vadd.f32 %v1956_v50, %v1733_v55  ;;  %v3092_v63 = vsub.f32 %v5782_v18, %v6496_v42 }
 0x1c3   : > { %v1742_v37 = vpop.f32.mrf.mxu0  ;;  %v1961_v23 = vpop.f32.mrf.mxu1  ;;  %3050 = vmatmul.mubr.f32.gmra.mxu0 %v3049_v56  ;;  %3269 = vmatmul.mubr.f32.gmra.mxu1 %v5694_v14 }
 0x1c4   : > { %v5791_v55 = vadd.f32 %v1961_v23, %v1742_v37  ;;  %3055 = vmatprep.mubr.f32.mxu0 %v6548_v62  ;;  %3274 = vmatprep.mubr.f32.mxu1 %v6548_v62  ;;  %v3071_v37 = vand.u32 4294901760, %v3070_v47  ;;  %v3081_v23 = vsub.f32 %v5771_v3, %v6492_v46  ;;  %v4372_v47 = vld [vmem:[%s4601_s3 + $0x178] sm:$0xff] }
 0x1c5   : > { %v1744_v56 = vpop.f32.mrf.mxu0  ;;  %v1963_v50 = vpop.f32.mrf.mxu1 }
 0x1c6   : > { %v5797_v40 = vadd.f32 %v1963_v50, %v1744_v56 }
 0x1c7   : > { %v1753_v45 = vpop.f32.mrf.mxu0  ;;  %v1968_v2 = vpop.f32.mrf.mxu1  ;;  %3061 = vmatmul.mubr.f32.gmra.mxu0 %v3060_v6  ;;  %3276 = vmatmul.mubr.f32.gmra.mxu1 %v5717_v34  ;;  %v2896_v6 = vsel %vm234_vm0, %v4371_v0, 0 }
 0x1c8   : > { %v5809_v56 = vadd.f32 %v1968_v2, %v1753_v45  ;;  %3066 = vmatprep.mubr.f32.mxu0 %v6548_v62  ;;  %3281 = vmatprep.mubr.f32.mxu1 %v6548_v62  ;;  %v3082_v2 = vand.u32 4294901760, %v3081_v23  ;;  %v5825_v0 = vand.u32 4294901760, %v2896_v6  ;;  %v3093_v23 = vand.u32 4294901760, %v3092_v63 }
 0x1c9   : > { %v1755_v50 = vpop.f32.mrf.mxu0  ;;  %v1970_v54 = vpop.f32.mrf.mxu1 }
 0x1ca   : > { %v5815_v5 = vadd.f32 %v1970_v54, %v1755_v50  ;;  %6598 = vst [vmem:[#allocation22_spill] sm:$0xff] %v5825_v0  ;;  %v2899_v54 = vsel %vm234_vm0, %v4372_v47, 0 }
 0x1cb   : > { %v1764_v46 = vpop.f32.mrf.mxu0  ;;  %v1975_v21 = vpop.f32.mrf.mxu1  ;;  %3072 = vmatmul.mubr.f32.gmra.mxu0 %v3071_v37  ;;  %3283 = vmatmul.mubr.f32.gmra.mxu1 %v5735_v53  ;;  %v5840_v53 = vsub.f32 %v2896_v6, %v5825_v0  ;;  %v5842_v47 = vand.u32 4294901760, %v2899_v54 }
 0x1cc   : > { %v5827_v32 = vadd.f32 %v1975_v21, %v1764_v46  ;;  %3077 = vmatprep.mubr.f32.mxu0 %v6548_v62  ;;  %3288 = vmatprep.mubr.f32.mxu1 %v6548_v62  ;;  %v3103_v21 = vsub.f32 %v5805_v39, %v6599_v26  ;;  %v6508_v46 = vand.u32 4294901760, %v5823_v58 }
 0x1cd   : > { %v1766_v50 = vpop.f32.mrf.mxu0  ;;  %v1977_v37 = vpop.f32.mrf.mxu1  ;;  %6600 = vst [vmem:[#allocation23_spill] sm:$0xff] %v5842_v47 }
 0x1ce   : > { %v5832_v42 = vadd.f32 %v1977_v37, %v1766_v50  ;;  %v3104_v26 = vand.u32 4294901760, %v3103_v21  ;;  %v3114_v6 = vsub.f32 %v5823_v58, %v6508_v46 }
 0x1cf   : > { %v1775_v51 = vpop.f32.mrf.mxu0  ;;  %v1982_v45 = vpop.f32.mrf.mxu1  ;;  %3083 = vmatmul.mubr.f32.gmra.mxu0 %v3082_v2  ;;  %3290 = vmatmul.mubr.f32.gmra.mxu1 %v5753_v57 }
 0x1d0   : > { %v5844_v34 = vadd.f32 %v1982_v45, %v1775_v51  ;;  %3088 = vmatprep.mubr.f32.mxu0 %v6548_v62  ;;  %3295 = vmatprep.mubr.f32.mxu1 %v6548_v62  ;;  %v6513_v51 = vand.u32 4294901760, %v5840_v53  ;;  %v5856_v45 = vsub.f32 %v2899_v54, %v5842_v47  ;;  %v3115_v46 = vand.u32 4294901760, %v3114_v6 }
 0x1d1   : > { %v1777_v63 = vpop.f32.mrf.mxu0  ;;  %v1984_v2 = vpop.f32.mrf.mxu1 }
 0x1d2   : > { %v5848_v50 = vadd.f32 %v1984_v2, %v1777_v63  ;;  %v3125_v54 = vsub.f32 %v5840_v53, %v6513_v51 }
 0x1d3   : > { %v1786_v37 = vpop.f32.mrf.mxu0  ;;  %v1989_v57 = vpop.f32.mrf.mxu1  ;;  %3094 = vmatmul.mubr.f32.gmra.mxu0 %v3093_v23  ;;  %3297 = vmatmul.mubr.f32.gmra.mxu1 %v5763_v48 }
 0x1d4   : > { %v5858_v14 = vadd.f32 %v1989_v57, %v1786_v37  ;;  %3099 = vmatprep.mubr.f32.mxu0 %v6548_v62  ;;  %3302 = vmatprep.mubr.f32.mxu1 %v6548_v62  ;;  %v6518_v57 = vand.u32 4294901760, %v5856_v45  ;;  %v3126_v6 = vand.u32 4294901760, %v3125_v54 }
 0x1d5   : > { %v1788_v63 = vpop.f32.mrf.mxu0  ;;  %v1991_v23 = vpop.f32.mrf.mxu1 }
 0x1d6   : > { %v5862_v2 = vadd.f32 %v1991_v23, %v1788_v63  ;;  %v3136_v51 = vsub.f32 %v5856_v45, %v6518_v57 }
 0x1d7   : > { %v1797_v21 = vpop.f32.mrf.mxu0  ;;  %v1996_v48 = vpop.f32.mrf.mxu1  ;;  %3105 = vmatmul.mubr.f32.gmra.mxu0 %v3104_v26  ;;  %3304 = vmatmul.mubr.f32.gmra.mxu1 %v5789_v24 }
 0x1d8   : > { %v5869_v37 = vadd.f32 %v1996_v48, %v1797_v21  ;;  %3110 = vmatprep.mubr.f32.mxu0 %v6548_v62  ;;  %3309 = vmatprep.mubr.f32.mxu1 %v6548_v62 }
 0x1d9   : > { %v1799_v63 = vpop.f32.mrf.mxu0  ;;  %v1998_v23 = vpop.f32.mrf.mxu1 }
 0x1da   : > { %v5873_v27 = vadd.f32 %v1998_v23, %v1799_v63 }
 0x1db   : > { %v1808_v26 = vpop.f32.mrf.mxu0  ;;  %v2003_v15 = vpop.f32.mrf.mxu1  ;;  %3116 = vmatmul.mubr.f32.gmra.mxu0 %v3115_v46  ;;  %3311 = vmatmul.mubr.f32.gmra.mxu1 %v5807_v13  ;;  %v3137_v46 = vand.u32 4294901760, %v3136_v51 }
 0x1dc   : > { %v5879_v48 = vadd.f32 %v2003_v15, %v1808_v26  ;;  %3121 = vmatprep.mubr.f32.mxu0 %v6548_v62  ;;  %3316 = vmatprep.mubr.f32.mxu1 %v6548_v62 }
 0x1dd   : > { %v1810_v21 = vpop.f32.mrf.mxu0  ;;  %v2005_v24 = vpop.f32.mrf.mxu1 }
 0x1de   : > { %v5883_v63 = vadd.f32 %v2005_v24, %v1810_v21 }
 0x1df   : > { %v1819_v23 = vpop.f32.mrf.mxu0  ;;  %v2010_v43 = vpop.f32.mrf.mxu1  ;;  %3127 = vmatmul.mubr.f32.gmra.mxu0 %v3126_v6  ;;  %3318 = vmatmul.mubr.f32.gmra.mxu1 %v5825_v0 }
 0x1e0   : > { %v5886_v54 = vadd.f32 %v2010_v43, %v1819_v23  ;;  %3132 = vmatprep.mubr.f32.mxu0 %v6548_v62  ;;  %3323 = vmatprep.mubr.f32.mxu1 %v6548_v62 }
 0x1e1   : > { %v1821_v15 = vpop.f32.mrf.mxu0  ;;  %v2012_v26 = vpop.f32.mrf.mxu1 }
 0x1e2   : > { %v5890_v57 = vadd.f32 %v2012_v26, %v1821_v15  ;;  %v6601_v15 = vand.u32 4294901760, %v5584_v12  ;;  %v6602_v26 = vld [vmem:[#allocation9_spill] sm:$0xff] }
 0x1e3   : > { %v1830_v13 = vpop.f32.mrf.mxu0  ;;  %v2017_v8 = vpop.f32.mrf.mxu1  ;;  %3138 = vmatmul.mubr.f32.gmra.mxu0 %v3137_v46  ;;  %3325 = vmatmul.mubr.f32.gmra.mxu1 %v5842_v47 }
 0x1e4   : > { %v5893_v24 = vadd.f32 %v2017_v8, %v1830_v13  ;;  %3399 = vmatprep.mubr.f32.mxu0 %v6548_v62  ;;  %3594 = vmatprep.mubr.f32.mxu1 %v6548_v62 }
 0x1e5   : > { %v1832_v43 = vpop.f32.mrf.mxu0  ;;  %v2019_v51 = vpop.f32.mrf.mxu1 }
 0x1e6   : > { %v5897_v6 = vadd.f32 %v2019_v51, %v1832_v43 }
 0x1e7   : > { %v2094_v21 = vpop.f32.mrf.mxu0  ;;  %v2290_v23 = vpop.f32.mrf.mxu1  ;;  %3402 = vmatmul.mubr.f32.vlgmr.msra.gmra.mxu0 %v5584_v12  ;;  %3598 = vmatmul.mubr.f32.vlgmr.msra.gmra.mxu1 %v6601_v15  ;;  %v6603_v12 = vand.u32 4294901760, %v5596_v7 }
 0x1e8   : > { %v2095_v46 = vadd.f32 %v2094_v21, %v5658_v61  ;;  %3776 = vmatpush1.msra.mxu0 %v6602_v26  ;;  %3955 = vmatpush1.msra.mxu1 %v4605_v4 }
 0x1e9   : > { %v2096_v8 = vpop.f32.mrf.mxu0  ;;  %v2292_v13 = vpop.f32.mrf.mxu1  ;;  %3407 = vmatprep.mubr.f32.mxu0 %v6548_v62  ;;  %3603 = vmatprep.mubr.f32.mxu1 %v6548_v62 }
 0x1ea   : > { %v5907_v43 = vadd.f32 %v2290_v23, %v2095_v46  ;;  %v2097_v51 = vadd.f32 %v2096_v8, %v5667_v20 }
 0x1eb   : > { %v2102_v47 = vpop.f32.mrf.mxu0  ;;  %v2299_v0 = vpop.f32.mrf.mxu1  ;;  %3410 = vmatmul.mubr.f32.gmra.mxu0 %v5596_v7  ;;  %3607 = vmatmul.mubr.f32.gmra.mxu1 %v6603_v12  ;;  %v6604_v7 = vand.u32 4294901760, %v5608_v11 }
 0x1ec   : > { %v5913_v61 = vadd.f32 %v2292_v13, %v2097_v51  ;;  %v2103_v4 = vadd.f32 %v2102_v47, %v5684_v17  ;;  %3415 = vmatprep.mubr.f32.mxu0 %v6548_v62  ;;  %3612 = vmatprep.mubr.f32.mxu1 %v6548_v62 }
 0x1ed   : > { %v2104_v21 = vpop.f32.mrf.mxu0  ;;  %v2301_v23 = vpop.f32.mrf.mxu1 }
 0x1ee   : > { %v5918_v15 = vadd.f32 %v2299_v0, %v2103_v4  ;;  %v2105_v20 = vadd.f32 %v2104_v21, %v5689_v49 }
 0x1ef   : > { %v2110_v46 = vpop.f32.mrf.mxu0  ;;  %v2308_v26 = vpop.f32.mrf.mxu1  ;;  %3418 = vmatmul.mubr.f32.gmra.mxu0 %v5608_v11  ;;  %3616 = vmatmul.mubr.f32.gmra.mxu1 %v6604_v7  ;;  %v6605_v11 = vand.u32 4294901760, %v5635_v44 }
 0x1f0   : > { %v5924_v8 = vadd.f32 %v2301_v23, %v2105_v20  ;;  %v2111_v17 = vadd.f32 %v2110_v46, %v5701_v60  ;;  %3423 = vmatprep.mubr.f32.mxu0 %v6548_v62  ;;  %3621 = vmatprep.mubr.f32.mxu1 %v6548_v62 }
 0x1f1   : > { %v2112_v47 = vpop.f32.mrf.mxu0  ;;  %v2310_v0 = vpop.f32.mrf.mxu1 }
 0x1f2   : > { %v5929_v13 = vadd.f32 %v2308_v26, %v2111_v17  ;;  %v2113_v49 = vadd.f32 %v2112_v47, %v5707_v10 }
 0x1f3   : > { %v2118_v51 = vpop.f32.mrf.mxu0  ;;  %v2317_v12 = vpop.f32.mrf.mxu1  ;;  %3426 = vmatmul.mubr.f32.gmra.mxu0 %v5635_v44  ;;  %3625 = vmatmul.mubr.f32.gmra.mxu1 %v6605_v11  ;;  %v6606_v44 = vand.u32 4294901760, %v5653_v25 }
 0x1f4   : > { %v5935_v4 = vadd.f32 %v2310_v0, %v2113_v49  ;;  %v2119_v60 = vadd.f32 %v2118_v51, %v5719_v1  ;;  %3431 = vmatprep.mubr.f32.mxu0 %v6548_v62  ;;  %3630 = vmatprep.mubr.f32.mxu1 %v6548_v62 }
 0x1f5   : > { %v2120_v21 = vpop.f32.mrf.mxu0  ;;  %v2319_v23 = vpop.f32.mrf.mxu1 }
 0x1f6   : > { %v5940_v20 = vadd.f32 %v2317_v12, %v2119_v60  ;;  %v2121_v10 = vadd.f32 %v2120_v21, %v5725_v59 }
 0x1f7   : > { %v2126_v46 = vpop.f32.mrf.mxu0  ;;  %v2326_v26 = vpop.f32.mrf.mxu1  ;;  %3434 = vmatmul.mubr.f32.gmra.mxu0 %v5653_v25  ;;  %3634 = vmatmul.mubr.f32.gmra.mxu1 %v6606_v44  ;;  %v6607_v25 = vand.u32 4294901760, %v5679_v33 }
 0x1f8   : > { %v5946_v7 = vadd.f32 %v2319_v23, %v2121_v10  ;;  %v2127_v1 = vadd.f32 %v2126_v46, %v5737_v22  ;;  %3439 = vmatprep.mubr.f32.mxu0 %v6548_v62  ;;  %3639 = vmatprep.mubr.f32.mxu1 %v6548_v62 }
 0x1f9   : > { %v2128_v17 = vpop.f32.mrf.mxu0  ;;  %v2328_v47 = vpop.f32.mrf.mxu1 }
 0x1fa   : > { %v5951_v0 = vadd.f32 %v2326_v26, %v2127_v1  ;;  %v2129_v59 = vadd.f32 %v2128_v17, %v5743_v36 }
 0x1fb   : > { %v2134_v49 = vpop.f32.mrf.mxu0  ;;  %v2335_v51 = vpop.f32.mrf.mxu1  ;;  %3442 = vmatmul.mubr.f32.gmra.mxu0 %v5679_v33  ;;  %3643 = vmatmul.mubr.f32.gmra.mxu1 %v6607_v25  ;;  %v6608_v33 = vand.u32 4294901760, %v5692_v41 }
 0x1fc   : > { %v5957_v12 = vadd.f32 %v2328_v47, %v2129_v59  ;;  %v2135_v22 = vadd.f32 %v2134_v49, %v5756_v30  ;;  %3447 = vmatprep.mubr.f32.mxu0 %v6548_v62  ;;  %3648 = vmatprep.mubr.f32.mxu1 %v6548_v62 }
 0x1fd   : > { %v2136_v11 = vpop.f32.mrf.mxu0  ;;  %v2337_v60 = vpop.f32.mrf.mxu1 }
 0x1fe   : > { %v5962_v21 = vadd.f32 %v2335_v51, %v2135_v22  ;;  %v2137_v36 = vadd.f32 %v2136_v11, %v5761_v29 }
 0x1ff   : > { %v2142_v23 = vpop.f32.mrf.mxu0  ;;  %v2344_v10 = vpop.f32.mrf.mxu1  ;;  %3450 = vmatmul.mubr.f32.gmra.mxu0 %v5692_v41  ;;  %3652 = vmatmul.mubr.f32.gmra.mxu1 %v6608_v33  ;;  %v6609_v41 = vand.u32 4294901760, %v5711_v16 }
 0x200   : > { %v5968_v46 = vadd.f32 %v2337_v60, %v2137_v36  ;;  %v2143_v30 = vadd.f32 %v2142_v23, %v5773_v28  ;;  %3455 = vmatprep.mubr.f32.mxu0 %v6548_v62  ;;  %3657 = vmatprep.mubr.f32.mxu1 %v6548_v62 }
 0x201   : > { %v2144_v26 = vpop.f32.mrf.mxu0  ;;  %v2346_v44 = vpop.f32.mrf.mxu1 }
 0x202   : > { %v5973_v1 = vadd.f32 %v2344_v10, %v2143_v30  ;;  %v2145_v29 = vadd.f32 %v2144_v26, %v5779_v38 }
 0x203   : > { %v2150_v17 = vpop.f32.mrf.mxu0  ;;  %v2353_v47 = vpop.f32.mrf.mxu1  ;;  %3458 = vmatmul.mubr.f32.gmra.mxu0 %v5711_v16  ;;  %3661 = vmatmul.mubr.f32.gmra.mxu1 %v6609_v41  ;;  %v6610_v16 = vand.u32 4294901760, %v5733_v9 }
 0x204   : > { %v5979_v59 = vadd.f32 %v2346_v44, %v2145_v29  ;;  %v2151_v28 = vadd.f32 %v2150_v17, %v5791_v55  ;;  %3463 = vmatprep.mubr.f32.mxu0 %v6548_v62  ;;  %3666 = vmatprep.mubr.f32.mxu1 %v6548_v62 }
 0x205   : > { %v2152_v49 = vpop.f32.mrf.mxu0  ;;  %v2355_v51 = vpop.f32.mrf.mxu1 }
 0x206   : > { %v5984_v25 = vadd.f32 %v2353_v47, %v2151_v28  ;;  %v2153_v38 = vadd.f32 %v2152_v49, %v5797_v40 }
 0x207   : > { %v2158_v22 = vpop.f32.mrf.mxu0  ;;  %v2362_v11 = vpop.f32.mrf.mxu1  ;;  %3466 = vmatmul.mubr.f32.gmra.mxu0 %v5733_v9  ;;  %3670 = vmatmul.mubr.f32.gmra.mxu1 %v6610_v16  ;;  %v6611_v9 = vand.u32 4294901760, %v5751_v35 }
 0x208   : > { %v5990_v60 = vadd.f32 %v2355_v51, %v2153_v38  ;;  %v2159_v55 = vadd.f32 %v2158_v22, %v5809_v56  ;;  %3471 = vmatprep.mubr.f32.mxu0 %v6548_v62  ;;  %3675 = vmatprep.mubr.f32.mxu1 %v6548_v62 }
 0x209   : > { %v2160_v36 = vpop.f32.mrf.mxu0  ;;  %v2364_v23 = vpop.f32.mrf.mxu1 }
 0x20a   : > { %v5995_v10 = vadd.f32 %v2362_v11, %v2159_v55  ;;  %v2161_v40 = vadd.f32 %v2160_v36, %v5815_v5 }
 0x20b   : > { %v2166_v33 = vpop.f32.mrf.mxu0  ;;  %v2371_v30 = vpop.f32.mrf.mxu1  ;;  %3474 = vmatmul.mubr.f32.gmra.mxu0 %v5751_v35  ;;  %3679 = vmatmul.mubr.f32.gmra.mxu1 %v6611_v9  ;;  %v6612_v35 = vand.u32 4294901760, %v5771_v3 }
 0x20c   : > { %v6001_v26 = vadd.f32 %v2364_v23, %v2161_v40  ;;  %v2167_v56 = vadd.f32 %v2166_v33, %v5827_v32  ;;  %3479 = vmatprep.mubr.f32.mxu0 %v6548_v62  ;;  %3684 = vmatprep.mubr.f32.mxu1 %v6548_v62 }
 0x20d   : > { %v2168_v44 = vpop.f32.mrf.mxu0  ;;  %v2373_v29 = vpop.f32.mrf.mxu1 }
 0x20e   : > { %v6006_v17 = vadd.f32 %v2371_v30, %v2167_v56  ;;  %v2169_v5 = vadd.f32 %v2168_v44, %v5832_v42 }
 0x20f   : > { %v2174_v47 = vpop.f32.mrf.mxu0  ;;  %v2380_v41 = vpop.f32.mrf.mxu1  ;;  %3482 = vmatmul.mubr.f32.gmra.mxu0 %v5771_v3  ;;  %3688 = vmatmul.mubr.f32.gmra.mxu1 %v6612_v35  ;;  %v6613_v3 = vand.u32 4294901760, %v5782_v18 }
 0x210   : > { %v6012_v28 = vadd.f32 %v2373_v29, %v2169_v5  ;;  %v2175_v32 = vadd.f32 %v2174_v47, %v5844_v34  ;;  %3487 = vmatprep.mubr.f32.mxu0 %v6548_v62  ;;  %3693 = vmatprep.mubr.f32.mxu1 %v6548_v62 }
 0x211   : > { %v2176_v49 = vpop.f32.mrf.mxu0  ;;  %v2382_v51 = vpop.f32.mrf.mxu1 }
 0x212   : > { %v6017_v38 = vadd.f32 %v2380_v41, %v2175_v32  ;;  %v2177_v42 = vadd.f32 %v2176_v49, %v5848_v50 }
 0x213   : > { %v2182_v22 = vpop.f32.mrf.mxu0  ;;  %v2389_v11 = vpop.f32.mrf.mxu1  ;;  %3490 = vmatmul.mubr.f32.gmra.mxu0 %v5782_v18  ;;  %3697 = vmatmul.mubr.f32.gmra.mxu1 %v6613_v3  ;;  %v6614_v18 = vand.u32 4294901760, %v5805_v39 }
 0x214   : > { %v6023_v16 = vadd.f32 %v2382_v51, %v2177_v42  ;;  %v2183_v34 = vadd.f32 %v2182_v22, %v5858_v14  ;;  %3495 = vmatprep.mubr.f32.mxu0 %v6548_v62  ;;  %3702 = vmatprep.mubr.f32.mxu1 %v6548_v62 }
 0x215   : > { %v2184_v55 = vpop.f32.mrf.mxu0  ;;  %v2391_v36 = vpop.f32.mrf.mxu1 }
 0x216   : > { %v6028_v23 = vadd.f32 %v2389_v11, %v2183_v34  ;;  %v2185_v50 = vadd.f32 %v2184_v55, %v5862_v2 }
 0x217   : > { %v2190_v40 = vpop.f32.mrf.mxu0  ;;  %v2398_v33 = vpop.f32.mrf.mxu1  ;;  %3498 = vmatmul.mubr.f32.gmra.mxu0 %v5805_v39  ;;  %3706 = vmatmul.mubr.f32.gmra.mxu1 %v6614_v18  ;;  %v6615_v39 = vand.u32 4294901760, %v5823_v58 }
 0x218   : > { %v6034_v30 = vadd.f32 %v2391_v36, %v2185_v50  ;;  %v2191_v14 = vadd.f32 %v2190_v40, %v5869_v37  ;;  %3503 = vmatprep.mubr.f32.mxu0 %v6548_v62  ;;  %3711 = vmatprep.mubr.f32.mxu1 %v6548_v62 }
 0x219   : > { %v2192_v9 = vpop.f32.mrf.mxu0  ;;  %v2400_v56 = vpop.f32.mrf.mxu1 }
 0x21a   : > { %v6039_v44 = vadd.f32 %v2398_v33, %v2191_v14  ;;  %v2193_v2 = vadd.f32 %v2192_v9, %v5873_v27 }
 0x21b   : > { %v2198_v29 = vpop.f32.mrf.mxu0  ;;  %v2407_v5 = vpop.f32.mrf.mxu1  ;;  %3506 = vmatmul.mubr.f32.gmra.mxu0 %v5823_v58  ;;  %3715 = vmatmul.mubr.f32.gmra.mxu1 %v6615_v39  ;;  %v6616_v58 = vand.u32 4294901760, %v5840_v53 }
 0x21c   : > { %v6045_v47 = vadd.f32 %v2400_v56, %v2193_v2  ;;  %v2199_v37 = vadd.f32 %v2198_v29, %v5879_v48  ;;  %3511 = vmatprep.mubr.f32.mxu0 %v6548_v62  ;;  %3720 = vmatprep.mubr.f32.mxu1 %v6548_v62 }
 0x21d   : > { %v2200_v41 = vpop.f32.mrf.mxu0  ;;  %v2409_v35 = vpop.f32.mrf.mxu1 }
 0x21e   : > { %v6050_v32 = vadd.f32 %v2407_v5, %v2199_v37  ;;  %v2201_v27 = vadd.f32 %v2200_v41, %v5883_v63 }
 0x21f   : > { %v2206_v49 = vpop.f32.mrf.mxu0  ;;  %v2416_v51 = vpop.f32.mrf.mxu1  ;;  %3514 = vmatmul.mubr.f32.gmra.mxu0 %v5840_v53  ;;  %3724 = vmatmul.mubr.f32.gmra.mxu1 %v6616_v58  ;;  %v6617_v53 = vand.u32 4294901760, %v5856_v45 }
 0x220   : > { %v6056_v42 = vadd.f32 %v2409_v35, %v2201_v27  ;;  %v2207_v48 = vadd.f32 %v2206_v49, %v5886_v54  ;;  %3519 = vmatprep.mubr.f32.mxu0 %v6548_v62  ;;  %3729 = vmatprep.mubr.f32.mxu1 %v6548_v62 }
 0x221   : > { %v2208_v22 = vpop.f32.mrf.mxu0  ;;  %v2418_v11 = vpop.f32.mrf.mxu1 }
 0x222   : > { %v6061_v3 = vadd.f32 %v2416_v51, %v2207_v48  ;;  %v2209_v63 = vadd.f32 %v2208_v22, %v5890_v57 }
 0x223   : > { %v2214_v34 = vpop.f32.mrf.mxu0  ;;  %v2425_v55 = vpop.f32.mrf.mxu1  ;;  %3522 = vmatmul.mubr.f32.gmra.mxu0 %v5856_v45  ;;  %3733 = vmatmul.mubr.f32.gmra.mxu1 %v6617_v53 }
 0x224   : > { %v6067_v36 = vadd.f32 %v2418_v11, %v2209_v63  ;;  %v2215_v54 = vadd.f32 %v2214_v34, %v5893_v24  ;;  %3809 = vmatprep.mubr.f32.mxu0 %v6548_v62  ;;  %3988 = vmatprep.mubr.f32.mxu1 %v6548_v62  ;;  %v6618_v11 = vld [vmem:[#allocation11_spill] sm:$0xff] }
 0x225   : > { %v2216_v50 = vpop.f32.mrf.mxu0  ;;  %v2427_v40 = vpop.f32.mrf.mxu1 }
 0x226   : > { %v6072_v33 = vadd.f32 %v2425_v55, %v2215_v54  ;;  %v2217_v57 = vadd.f32 %v2216_v50, %v5897_v6 }
 0x227   : > { %v2503_v18 = vpop.f32.mrf.mxu0  ;;  %v2682_v14 = vpop.f32.mrf.mxu1  ;;  %3811 = vmatmul.mubr.f32.vlgmr.msra.gmra.mxu0 %v5569_v31  ;;  %3990 = vmatmul.mubr.f32.vlgmr.msra.gmra.mxu1 %v5569_v31 }
 0x228   : > { %v6077_v45 = vadd.f32 %v2427_v40, %v2217_v57  ;;  %v2504_v24 = vadd.f32 %v2503_v18, %v5907_v43  ;;  %3816 = vmatprep.mubr.f32.mxu0 %v6548_v62  ;;  %3995 = vmatprep.mubr.f32.mxu1 %v6548_v62  ;;  %v6619_v57 = vld [vmem:[#allocation10_spill] sm:$0xff] }
 0x229   : > { %v2505_v9 = vpop.f32.mrf.mxu0  ;;  %v2684_v56 = vpop.f32.mrf.mxu1 }
 0x22a   : > { %v2683_v2 = vadd.f32 %v2682_v14, %v2504_v24  ;;  %v2506_v29 = vadd.f32 %v2505_v9, %v5913_v61 }
 0x22b   : > { %v2510_v6 = vpop.f32.mrf.mxu0  ;;  %v2689_v5 = vpop.f32.mrf.mxu1  ;;  %3818 = vmatmul.mubr.f32.gmra.mxu0 %v5576_v19  ;;  %3997 = vmatmul.mubr.f32.gmra.mxu1 %v5576_v19 }
 0x22c   : > { %v2685_v31 = vadd.f32 %v2684_v56, %v2506_v29  ;;  %v2511_v39 = vadd.f32 %v2510_v6, %v5918_v15  ;;  %3823 = vmatprep.mubr.f32.mxu0 %v6548_v62  ;;  %4002 = vmatprep.mubr.f32.mxu1 %v6548_v62 }
 0x22d   : > { %v2512_v43 = vpop.f32.mrf.mxu0  ;;  %v2691_v37 = vpop.f32.mrf.mxu1 }
 0x22e   : > { %v2690_v41 = vadd.f32 %v2689_v5, %v2511_v39  ;;  %v2513_v35 = vadd.f32 %v2512_v43, %v5924_v8  ;;  %v6620_v5 = vld [vmem:[#allocation6_spill] sm:$0xff] }
 0x22f   : > { %v2517_v27 = vpop.f32.mrf.mxu0  ;;  %v2696_v61 = vpop.f32.mrf.mxu1  ;;  %3825 = vmatmul.mubr.f32.gmra.mxu0 %v5590_v52  ;;  %4004 = vmatmul.mubr.f32.gmra.mxu1 %v5590_v52 }
 0x230   : > { %v2692_v49 = vadd.f32 %v2691_v37, %v2513_v35  ;;  %v2518_v19 = vadd.f32 %v2517_v27, %v5929_v13  ;;  %3830 = vmatprep.mubr.f32.mxu0 %v6548_v62  ;;  %4009 = vmatprep.mubr.f32.mxu1 %v6548_v62 }
 0x231   : > { %v2519_v15 = vpop.f32.mrf.mxu0  ;;  %v2698_v51 = vpop.f32.mrf.mxu1 }
 0x232   : > { %v2697_v58 = vadd.f32 %v2696_v61, %v2518_v19  ;;  %v2520_v48 = vadd.f32 %v2519_v15, %v5935_v4 }
 0x233   : > { %v2524_v22 = vpop.f32.mrf.mxu0  ;;  %v2703_v8 = vpop.f32.mrf.mxu1  ;;  %3832 = vmatmul.mubr.f32.gmra.mxu0 %v6618_v11  ;;  %4011 = vmatmul.mubr.f32.gmra.mxu1 %v6618_v11 }
 0x234   : > { %v2792_v63 = vmin.f32 %v2683_v2, %v2697_v58  ;;  %v2699_v52 = vadd.f32 %v2698_v51, %v2520_v48  ;;  %v2525_v34 = vadd.f32 %v2524_v22, %v5940_v20  ;;  %3837 = vmatprep.mubr.f32.mxu0 %v6548_v62  ;;  %4016 = vmatprep.mubr.f32.mxu1 %v6548_v62 }
 0x235   : > { %v2526_v13 = vpop.f32.mrf.mxu0  ;;  %v2705_v55 = vpop.f32.mrf.mxu1 }
 0x236   : > { %v2813_v53 = vmin.f32 %v2685_v31, %v2699_v52  ;;  %v2704_v54 = vadd.f32 %v2703_v8, %v2525_v34  ;;  %v2527_v4 = vadd.f32 %v2526_v13, %v5946_v7 }
 0x237   : > { %v2531_v50 = vpop.f32.mrf.mxu0  ;;  %v2710_v40 = vpop.f32.mrf.mxu1  ;;  %3839 = vmatmul.mubr.f32.gmra.mxu0 %v6619_v57  ;;  %4018 = vmatmul.mubr.f32.gmra.mxu1 %v6619_v57 }
 0x238   : > { %v2793_v18 = vmin.f32 %v2690_v41, %v2704_v54  ;;  %v2706_v14 = vadd.f32 %v2705_v55, %v2527_v4  ;;  %v2532_v20 = vadd.f32 %v2531_v50, %v5951_v0  ;;  %3844 = vmatprep.mubr.f32.mxu0 %v6548_v62  ;;  %4023 = vmatprep.mubr.f32.mxu1 %v6548_v62 }
 0x239   : > { %v2533_v24 = vpop.f32.mrf.mxu0  ;;  %v2712_v9 = vpop.f32.mrf.mxu1 }
 0x23a   : > { %v2814_v56 = vmin.f32 %v2692_v49, %v2706_v14  ;;  %v2711_v2 = vadd.f32 %v2710_v40, %v2532_v20  ;;  %v2534_v7 = vadd.f32 %v2533_v24, %v5957_v12  ;;  %v6621_v49 = vld [vmem:[#allocation13_spill] sm:$0xff]  ;;  %v6623_v40 = vld [vmem:[#allocation16_spill] sm:$0xff] }
 0x23b   : > { %v2538_v29 = vpop.f32.mrf.mxu0  ;;  %v2717_v6 = vpop.f32.mrf.mxu1  ;;  %3846 = vmatmul.mubr.f32.gmra.mxu0 %v6620_v5  ;;  %4025 = vmatmul.mubr.f32.gmra.mxu1 %v6620_v5 }
 0x23c   : > { %v2794_v31 = vmin.f32 %v2792_v63, %v2711_v2  ;;  %v2713_v39 = vadd.f32 %v2712_v9, %v2534_v7  ;;  %v2539_v0 = vadd.f32 %v2538_v29, %v5962_v21  ;;  %3851 = vmatprep.mubr.f32.mxu0 %v6548_v62  ;;  %4030 = vmatprep.mubr.f32.mxu1 %v6548_v62  ;;  %v6622_v63 = vld [vmem:[#allocation15_spill] sm:$0xff]  ;;  %v6624_v7 = vld [vmem:[#allocation17_spill] sm:$0xff] }
 0x23d   : > { %v2540_v43 = vpop.f32.mrf.mxu0  ;;  %v2719_v37 = vpop.f32.mrf.mxu1 }
 0x23e   : > { %v2815_v41 = vmin.f32 %v2813_v53, %v2713_v39  ;;  %v2718_v35 = vadd.f32 %v2717_v6, %v2539_v0  ;;  %v2541_v12 = vadd.f32 %v2540_v43, %v5968_v46 }
 0x23f   : > { %v2545_v27 = vpop.f32.mrf.mxu0  ;;  %v2724_v61 = vpop.f32.mrf.mxu1  ;;  %3853 = vmatmul.mubr.f32.gmra.mxu0 %v6621_v49  ;;  %4032 = vmatmul.mubr.f32.gmra.mxu1 %v6621_v49 }
 0x240   : > { %v2795_v19 = vmin.f32 %v2793_v18, %v2718_v35  ;;  %v2720_v15 = vadd.f32 %v2719_v37, %v2541_v12  ;;  %v2546_v21 = vadd.f32 %v2545_v27, %v5973_v1  ;;  %3858 = vmatprep.mubr.f32.mxu0 %v6548_v62  ;;  %4037 = vmatprep.mubr.f32.mxu1 %v6548_v62 }
 0x241   : > { %v2547_v51 = vpop.f32.mrf.mxu0  ;;  %v2726_v58 = vpop.f32.mrf.mxu1 }
 0x242   : > { %v2816_v48 = vmin.f32 %v2814_v56, %v2720_v15  ;;  %v2725_v22 = vadd.f32 %v2724_v61, %v2546_v21  ;;  %v2548_v46 = vadd.f32 %v2547_v51, %v5979_v59  ;;  %v6626_v51 = vld [vmem:[#allocation19_spill] sm:$0xff] }
 0x243   : > { %v2552_v8 = vpop.f32.mrf.mxu0  ;;  %v2731_v11 = vpop.f32.mrf.mxu1  ;;  %3860 = vmatmul.mubr.f32.gmra.mxu0 %v6622_v63  ;;  %4039 = vmatmul.mubr.f32.gmra.mxu1 %v6622_v63 }
 0x244   : > { %v2796_v52 = vmin.f32 %v2794_v31, %v2725_v22  ;;  %v2727_v34 = vadd.f32 %v2726_v58, %v2548_v46  ;;  %v2553_v1 = vadd.f32 %v2552_v8, %v5984_v25  ;;  %3865 = vmatprep.mubr.f32.mxu0 %v6548_v62  ;;  %4044 = vmatprep.mubr.f32.mxu1 %v6548_v62 }
 0x245   : > { %v2554_v13 = vpop.f32.mrf.mxu0  ;;  %v2733_v55 = vpop.f32.mrf.mxu1 }
 0x246   : > { %v2817_v53 = vmin.f32 %v2815_v41, %v2727_v34  ;;  %v2732_v54 = vadd.f32 %v2731_v11, %v2553_v1  ;;  %v2555_v59 = vadd.f32 %v2554_v13, %v5990_v60  ;;  %v6625_v41 = vld [vmem:[#allocation18_spill] sm:$0xff]  ;;  %v6627_v34 = vld [vmem:[#allocation20_spill] sm:$0xff] }
 0x247   : > { %v2559_v4 = vpop.f32.mrf.mxu0  ;;  %v2738_v50 = vpop.f32.mrf.mxu1  ;;  %3867 = vmatmul.mubr.f32.gmra.mxu0 %v6623_v40  ;;  %4046 = vmatmul.mubr.f32.gmra.mxu1 %v6623_v40  ;;  %v6628_v40 = vld [vmem:[#allocation21_spill] sm:$0xff] }
 0x248   : > { %v2797_v57 = vmin.f32 %v2795_v19, %v2732_v54  ;;  %v2734_v18 = vadd.f32 %v2733_v55, %v2555_v59  ;;  %v2560_v25 = vadd.f32 %v2559_v4, %v5995_v10  ;;  %3872 = vmatprep.mubr.f32.mxu0 %v6548_v62  ;;  %4051 = vmatprep.mubr.f32.mxu1 %v6548_v62 }
 0x249   : > { %v2561_v14 = vpop.f32.mrf.mxu0  ;;  %v2740_v20 = vpop.f32.mrf.mxu1 }
 0x24a   : > { %v2818_v24 = vmin.f32 %v2816_v48, %v2734_v18  ;;  %v2739_v9 = vadd.f32 %v2738_v50, %v2560_v25  ;;  %v2562_v60 = vadd.f32 %v2561_v14, %v6001_v26 }
 0x24b   : > { %v2566_v56 = vpop.f32.mrf.mxu0  ;;  %v2745_v2 = vpop.f32.mrf.mxu1  ;;  %3874 = vmatmul.mubr.f32.gmra.mxu0 %v6624_v7  ;;  %4053 = vmatmul.mubr.f32.gmra.mxu1 %v6624_v7  ;;  %v6630_v7 = vld [vmem:[#allocation22_spill] sm:$0xff] }
 0x24c   : > { %v2798_v29 = vmin.f32 %v2796_v52, %v2739_v9  ;;  %v2741_v6 = vadd.f32 %v2740_v20, %v2562_v60  ;;  %v2567_v10 = vadd.f32 %v2566_v56, %v6006_v17  ;;  %3879 = vmatprep.mubr.f32.mxu0 %v6548_v62  ;;  %4058 = vmatprep.mubr.f32.mxu1 %v6548_v62  ;;  %v6629_v20 = vld [vmem:[#allocation12_spill] sm:$0xff] }
 0x24d   : > { %v2568_v5 = vpop.f32.mrf.mxu0  ;;  %v2747_v31 = vpop.f32.mrf.mxu1 }
 0x24e   : > { %v2819_v39 = vmin.f32 %v2817_v53, %v2741_v6  ;;  %v2746_v0 = vadd.f32 %v2745_v2, %v2567_v10  ;;  %v2569_v26 = vadd.f32 %v2568_v5, %v6012_v28 }
 0x24f   : > { %v2573_v43 = vpop.f32.mrf.mxu0  ;;  %v2752_v37 = vpop.f32.mrf.mxu1  ;;  %3881 = vmatmul.mubr.f32.gmra.mxu0 %v6625_v41  ;;  %4060 = vmatmul.mubr.f32.gmra.mxu1 %v6625_v41 }
 0x250   : > { %v2799_v35 = vmin.f32 %v2797_v57, %v2746_v0  ;;  %v2748_v12 = vadd.f32 %v2747_v31, %v2569_v26  ;;  %v2574_v17 = vadd.f32 %v2573_v43, %v6017_v38  ;;  %3886 = vmatprep.mubr.f32.mxu0 %v6548_v62  ;;  %4065 = vmatprep.mubr.f32.mxu1 %v6548_v62 }
 0x251   : > { %v2575_v27 = vpop.f32.mrf.mxu0  ;;  %v2754_v61 = vpop.f32.mrf.mxu1 }
 0x252   : > { %v2820_v49 = vmin.f32 %v2818_v24, %v2748_v12  ;;  %v2753_v19 = vadd.f32 %v2752_v37, %v2574_v17  ;;  %v2576_v28 = vadd.f32 %v2575_v27, %v6023_v16  ;;  %v1498_v24 = vrot.slane %v6629_v20, 4 }
 0x253   : > { %v2580_v15 = vpop.f32.mrf.mxu0  ;;  %v2759_v21 = vpop.f32.mrf.mxu1  ;;  %3888 = vmatmul.mubr.f32.gmra.mxu0 %v6626_v51  ;;  %4067 = vmatmul.mubr.f32.gmra.mxu1 %v6626_v51 }
 0x254   : > { %v2800_v58 = vmin.f32 %v2798_v29, %v2753_v19  ;;  %v2755_v48 = vadd.f32 %v2754_v61, %v2576_v28  ;;  %v2581_v38 = vadd.f32 %v2580_v15, %v6028_v23  ;;  %3893 = vmatprep.mubr.f32.mxu0 %v6548_v62  ;;  %4072 = vmatprep.mubr.f32.mxu1 %v6548_v62  ;;  %v6631_v29 = vld [vmem:[#allocation14_spill] sm:$0xff] }
 0x255   : > { %v2582_v22 = vpop.f32.mrf.mxu0  ;;  %v2761_v46 = vpop.f32.mrf.mxu1 }
 0x256   : > { %v2821_v8 = vmin.f32 %v2819_v39, %v2755_v48  ;;  %v2760_v11 = vadd.f32 %v2759_v21, %v2581_v38  ;;  %v2583_v16 = vadd.f32 %v2582_v22, %v6034_v30 }
 0x257   : > { %v2587_v63 = vpop.f32.mrf.mxu0  ;;  %v2766_v52 = vpop.f32.mrf.mxu1  ;;  %3895 = vmatmul.mubr.f32.gmra.mxu0 %v6627_v34  ;;  %4074 = vmatmul.mubr.f32.gmra.mxu1 %v6627_v34 }
 0x258   : > { %v2801_v1 = vmin.f32 %v2799_v35, %v2760_v11  ;;  %v2762_v13 = vadd.f32 %v2761_v46, %v2583_v16  ;;  %v2588_v23 = vadd.f32 %v2587_v63, %v6039_v44  ;;  %3900 = vmatprep.mubr.f32.mxu0 %v6548_v62  ;;  %4079 = vmatprep.mubr.f32.mxu1 %v6548_v62  ;;  %v6632_v35 = vld [vmem:[#allocation23_spill] sm:$0xff] }
 0x259   : > { %v2589_v55 = vpop.f32.mrf.mxu0  ;;  %v2768_v53 = vpop.f32.mrf.mxu1 }
 0x25a   : > { %v2822_v54 = vmin.f32 %v2820_v49, %v2762_v13  ;;  %v2767_v59 = vadd.f32 %v2766_v52, %v2588_v23  ;;  %v2590_v30 = vadd.f32 %v2589_v55, %v6045_v47 }
 0x25b   : > { %v2594_v4 = vpop.f32.mrf.mxu0  ;;  %v2773_v50 = vpop.f32.mrf.mxu1  ;;  %3902 = vmatmul.mubr.f32.gmra.mxu0 %v6628_v40  ;;  %4081 = vmatmul.mubr.f32.gmra.mxu1 %v6628_v40 }
 0x25c   : > { %v2802_v57 = vmin.f32 %v2800_v58, %v2767_v59  ;;  %v2769_v18 = vadd.f32 %v2768_v53, %v2590_v30  ;;  %v2595_v44 = vadd.f32 %v2594_v4, %v6050_v32  ;;  %3907 = vmatprep.mubr.f32.mxu0 %v6548_v62  ;;  %4086 = vmatprep.mubr.f32.mxu1 %v6548_v62  ;;  %v1519_v32 = vrot.slane %v6631_v29, 4 }
 0x25d   : > { %v2596_v25 = vpop.f32.mrf.mxu0  ;;  %v2775_v14 = vpop.f32.mrf.mxu1 }
 0x25e   : > { %v2823_v9 = vmin.f32 %v2821_v8, %v2769_v18  ;;  %v2774_v47 = vadd.f32 %v2773_v50, %v2595_v44  ;;  %v2597_v60 = vadd.f32 %v2596_v25, %v6056_v42  ;;  %v1499_v42 = vmin.f32 %v6629_v20, %v1498_v24 }
 0x25f   : > { %v2601_v56 = vpop.f32.mrf.mxu0  ;;  %v2780_v2 = vpop.f32.mrf.mxu1  ;;  %3909 = vmatmul.mubr.f32.gmra.mxu0 %v6630_v7  ;;  %4088 = vmatmul.mubr.f32.gmra.mxu1 %v6630_v7 }
 0x260   : > { %v2803_v6 = vmin.f32 %v2801_v1, %v2774_v47  ;;  %v2776_v10 = vadd.f32 %v2775_v14, %v2597_v60  ;;  %v2602_v5 = vadd.f32 %v2601_v56, %v6061_v3  ;;  %3914 = vmatprep.mubr.f32.mxu0 %v6548_v62  ;;  %4093 = vmatprep.mubr.f32.mxu1 %v6548_v62  ;;  %v1500_v49 = vrot.slane %v1499_v42, 2 }
 0x261   : > { %v2603_v31 = vpop.f32.mrf.mxu0  ;;  %v2782_v39 = vpop.f32.mrf.mxu1  ;;  %v1520_v3 = vmin.f32 %v6631_v29, %v1519_v32 }
 0x262   : > { %v2824_v0 = vmin.f32 %v2822_v54, %v2776_v10  ;;  %v2781_v26 = vadd.f32 %v2780_v2, %v2602_v5  ;;  %v2604_v43 = vadd.f32 %v2603_v31, %v6067_v36  ;;  %v1501_v8 = vmin.f32 %v1499_v42, %v1500_v49 }
 0x263   : > { %v2608_v37 = vpop.f32.mrf.mxu0  ;;  %v2787_v41 = vpop.f32.mrf.mxu1  ;;  %3916 = vmatmul.mubr.f32.gmra.mxu0 %v6632_v35  ;;  %4095 = vmatmul.mubr.f32.gmra.mxu1 %v6632_v35  ;;  %v1521_v51 = vrot.slane %v1520_v3, 2 }
 0x264   : > { %v2804_v12 = vmin.f32 %v2802_v57, %v2781_v26  ;;  %v2783_v17 = vadd.f32 %v2782_v39, %v2604_v43  ;;  %v2609_v62 = vadd.f32 %v2608_v37, %v6072_v33  ;;  %v1502_v53 = vrot.slane %v1501_v8, 1 }
 0x265   : > { %v2610_v27 = vpop.f32.mrf.mxu0  ;;  %v2789_v61 = vpop.f32.mrf.mxu1  ;;  %v1522_v34 = vmin.f32 %v1520_v3, %v1521_v51 }
 0x266   : > { %v2825_v19 = vmin.f32 %v2823_v9, %v2783_v17  ;;  %v2788_v28 = vadd.f32 %v2787_v41, %v2609_v62  ;;  %v2611_v15 = vadd.f32 %v2610_v27, %v6077_v45  ;;  %v1503_v20 = vmin.f32 %v1501_v8, %v1502_v53 }
 0x267   : > { %v2974_v36 = vpop.f32.mrf.mxu0  ;;  %v3221_v21 = vpop.f32.mrf.mxu1  ;;  %v1523_v40 = vrot.slane %v1522_v34, 1 }
 0x268   : > { %v2805_v58 = vmin.f32 %v2803_v6, %v2788_v28  ;;  %v2790_v48 = vadd.f32 %v2789_v61, %v2611_v15  ;;  %v6175_v38 = vadd.f32 %v3221_v21, %v2974_v36  ;;  %v1525_v5 = vmin.f32 %v1503_v20, 3e+38 }
 0x269   : > { %v2976_v22 = vpop.f32.mrf.mxu0  ;;  %v3223_v46 = vpop.f32.mrf.mxu1  ;;  %v1524_v2 = vmin.f32 %v1522_v34, %v1523_v40 }
 0x26a   : > { %v2806_v11 = vmin.f32 %v2804_v12, %v2805_v58  ;;  %v2826_v16 = vmin.f32 %v2824_v0, %v2790_v48  ;;  %v6177_v33 = vadd.f32 %v3223_v46, %v2976_v22 }
 0x26b   : > { %v2985_v63 = vpop.f32.mrf.mxu0  ;;  %v3228_v52 = vpop.f32.mrf.mxu1  ;;  %v1526_v43 = vmin.f32 %v1524_v2, 3e+38 }
 0x26c   : > { %v2807_v1 = vrot.slane %v2806_v11, 4  ;;  %v2827_v13 = vmin.f32 %v2825_v19, %v2826_v16  ;;  %v6179_v45 = vadd.f32 %v3228_v52, %v2985_v63 }
 0x26d   : > { %v2987_v23 = vpop.f32.mrf.mxu0  ;;  %v3230_v55 = vpop.f32.mrf.mxu1 }
 0x26e   : > { %v2808_v54 = vmin.f32 %v2806_v11, %v2807_v1  ;;  %v2828_v59 = vrot.slane %v2827_v13, 4  ;;  %v6181_v30 = vadd.f32 %v3230_v55, %v2987_v23 }
 0x26f   : > { %v2996_v4 = vpop.f32.mrf.mxu0  ;;  %v3235_v50 = vpop.f32.mrf.mxu1 }
 0x270   : > { %v2809_v57 = vrot.slane %v2808_v54, 2  ;;  %v2829_v18 = vmin.f32 %v2827_v13, %v2828_v59  ;;  %v6183_v44 = vadd.f32 %v3235_v50, %v2996_v4 }
 0x271   : > { %v2998_v25 = vpop.f32.mrf.mxu0  ;;  %v3237_v14 = vpop.f32.mrf.mxu1 }
 0x272   : > { %v2810_v24 = vmin.f32 %v2808_v54, %v2809_v57  ;;  %v2830_v9 = vrot.slane %v2829_v18, 2  ;;  %v6185_v47 = vadd.f32 %v3237_v14, %v2998_v25 }
 0x273   : > { %v3007_v60 = vpop.f32.mrf.mxu0  ;;  %v3242_v56 = vpop.f32.mrf.mxu1 }
 0x274   : > { %v2811_v7 = vrot.slane %v2810_v24, 1  ;;  %v2831_v29 = vmin.f32 %v2829_v18, %v2830_v9  ;;  %v6187_v32 = vadd.f32 %v3242_v56, %v3007_v60 }
 0x275   : > { %v3009_v6 = vpop.f32.mrf.mxu0  ;;  %v3244_v10 = vpop.f32.mrf.mxu1 }
 0x276   : > { %v2812_v31 = vmin.f32 %v2810_v24, %v2811_v7  ;;  %v2832_v39 = vrot.slane %v2831_v29, 1  ;;  %v6189_v42 = vadd.f32 %v3244_v10, %v3009_v6 }
 0x277   : > { %v3018_v0 = vpop.f32.mrf.mxu0  ;;  %v3249_v26 = vpop.f32.mrf.mxu1 }
 0x278   : > { %v6191_v37 = vmin.f32 %v1525_v5, %v2812_v31  ;;  %v2833_v41 = vmin.f32 %v2831_v29, %v2832_v39  ;;  %v6193_v35 = vadd.f32 %v3249_v26, %v3018_v0 }
 0x279   : > { %v3020_v3 = vpop.f32.mrf.mxu0  ;;  %v3251_v12 = vpop.f32.mrf.mxu1 }
 0x27a   : > { %v6195_v17 = vmin.f32 %v1526_v43, %v2833_v41  ;;  %v6197_v62 = vadd.f32 %v3251_v12, %v3020_v3 }
 0x27b   : > { %v3029_v27 = vpop.f32.mrf.mxu0  ;;  %v3256_v61 = vpop.f32.mrf.mxu1 }
 0x27c   : > { %v6199_v49 = vadd.f32 %v3256_v61, %v3029_v27 }
 0x27d   : > { %v3031_v19 = vpop.f32.mrf.mxu0  ;;  %v3258_v28 = vpop.f32.mrf.mxu1 }
 0x27e   : > { %v6201_v15 = vadd.f32 %v3258_v28, %v3031_v19 }
 0x27f   : > { %v3040_v36 = vpop.f32.mrf.mxu0  ;;  %v3263_v21 = vpop.f32.mrf.mxu1 }
 0x280   : > { %v6203_v51 = vadd.f32 %v3263_v21, %v3040_v36 }
 0x281   : > { %v3042_v58 = vpop.f32.mrf.mxu0  ;;  %v3265_v48 = vpop.f32.mrf.mxu1 }
 0x282   : > { %v6205_v22 = vadd.f32 %v3265_v48, %v3042_v58 }
 0x283   : > { %v3051_v46 = vpop.f32.mrf.mxu0  ;;  %v3270_v8 = vpop.f32.mrf.mxu1 }
 0x284   : > { %v6207_v11 = vadd.f32 %v3270_v8, %v3051_v46 }
 0x285   : > { %v3053_v16 = vpop.f32.mrf.mxu0  ;;  %v3272_v63 = vpop.f32.mrf.mxu1 }
 0x286   : > { %v6209_v52 = vadd.f32 %v3272_v63, %v3053_v16 }
 0x287   : > { %v3062_v34 = vpop.f32.mrf.mxu0  ;;  %v3277_v1 = vpop.f32.mrf.mxu1 }
 0x288   : > { %v6211_v13 = vadd.f32 %v3277_v1, %v3062_v34 }
 0x289   : > { %v3064_v23 = vpop.f32.mrf.mxu0  ;;  %v3279_v55 = vpop.f32.mrf.mxu1 }
 0x28a   : > { %v6213_v53 = vadd.f32 %v3279_v55, %v3064_v23 }
 0x28b   : > { %v3073_v54 = vpop.f32.mrf.mxu0  ;;  %v3284_v59 = vpop.f32.mrf.mxu1 }
 0x28c   : > { %v6215_v4 = vadd.f32 %v3284_v59, %v3073_v54 }
 0x28d   : > { %v3075_v50 = vpop.f32.mrf.mxu0  ;;  %v3286_v40 = vpop.f32.mrf.mxu1 }
 0x28e   : > { %v6217_v57 = vadd.f32 %v3286_v40, %v3075_v50 }
 0x28f   : > { %v3084_v18 = vpop.f32.mrf.mxu0  ;;  %v3291_v25 = vpop.f32.mrf.mxu1 }
 0x290   : > { %v6219_v14 = vadd.f32 %v3291_v25, %v3084_v18 }
 0x291   : > { %v3086_v20 = vpop.f32.mrf.mxu0  ;;  %v3293_v24 = vpop.f32.mrf.mxu1 }
 0x292   : > { %v6221_v9 = vadd.f32 %v3293_v24, %v3086_v20 }
 0x293   : > { %v3095_v60 = vpop.f32.mrf.mxu0  ;;  %v3298_v56 = vpop.f32.mrf.mxu1 }
 0x294   : > { %v6223_v2 = vadd.f32 %v3298_v56, %v3095_v60 }
 0x295   : > { %v3097_v7 = vpop.f32.mrf.mxu0  ;;  %v3300_v29 = vpop.f32.mrf.mxu1 }
 0x296   : > { %v6225_v6 = vadd.f32 %v3300_v29, %v3097_v7 }
 0x297   : > { %v3106_v10 = vpop.f32.mrf.mxu0  ;;  %v3305_v5 = vpop.f32.mrf.mxu1 }
 0x298   : > { %v6227_v31 = vadd.f32 %v3305_v5, %v3106_v10 }
 0x299   : > { %v3108_v39 = vpop.f32.mrf.mxu0  ;;  %v3307_v0 = vpop.f32.mrf.mxu1 }
 0x29a   : > { %v6229_v26 = vadd.f32 %v3307_v0, %v3108_v39 }
 0x29b   : > { %v3117_v43 = vpop.f32.mrf.mxu0  ;;  %v3312_v41 = vpop.f32.mrf.mxu1 }
 0x29c   : > { %v6231_v3 = vadd.f32 %v3312_v41, %v3117_v43 }
 0x29d   : > { %v3119_v12 = vpop.f32.mrf.mxu0  ;;  %v3314_v27 = vpop.f32.mrf.mxu1 }
 0x29e   : > { %v6233_v61 = vadd.f32 %v3314_v27, %v3119_v12 }
 0x29f   : > { %v3128_v19 = vpop.f32.mrf.mxu0  ;;  %v3319_v28 = vpop.f32.mrf.mxu1 }
 0x2a0   : > { %v6235_v36 = vadd.f32 %v3319_v28, %v3128_v19 }
 0x2a1   : > { %v3130_v21 = vpop.f32.mrf.mxu0  ;;  %v3321_v58 = vpop.f32.mrf.mxu1 }
 0x2a2   : > { %v6237_v48 = vadd.f32 %v3321_v58, %v3130_v21 }
 0x2a3   : > { %v3139_v46 = vpop.f32.mrf.mxu0  ;;  %v3326_v8 = vpop.f32.mrf.mxu1 }
 0x2a4   : > { %v6239_v16 = vadd.f32 %v3326_v8, %v3139_v46 }
 0x2a5   : > { %v3141_v63 = vpop.f32.mrf.mxu0  ;;  %v3328_v34 = vpop.f32.mrf.mxu1 }
 0x2a6   : > { %v6241_v1 = vadd.f32 %v3328_v34, %v3141_v63 }
 0x2a7   : > { %v3403_v23 = vpop.f32.mrf.mxu0  ;;  %v3599_v55 = vpop.f32.mrf.mxu1 }
 0x2a8   : > { %v3404_v54 = vadd.f32 %v3403_v23, %v6175_v38 }
 0x2a9   : > { %v3405_v59 = vpop.f32.mrf.mxu0  ;;  %v3601_v50 = vpop.f32.mrf.mxu1 }
 0x2aa   : > { %v6244_v40 = vadd.f32 %v3599_v55, %v3404_v54  ;;  %v3406_v18 = vadd.f32 %v3405_v59, %v6177_v33 }
 0x2ab   : > { %v3411_v25 = vpop.f32.mrf.mxu0  ;;  %v3608_v20 = vpop.f32.mrf.mxu1 }
 0x2ac   : > { %v6247_v24 = vadd.f32 %v3601_v50, %v3406_v18  ;;  %v3412_v60 = vadd.f32 %v3411_v25, %v6179_v45 }
 0x2ad   : > { %v3413_v56 = vpop.f32.mrf.mxu0  ;;  %v3610_v7 = vpop.f32.mrf.mxu1 }
 0x2ae   : > { %v6250_v29 = vadd.f32 %v3608_v20, %v3412_v60  ;;  %v3414_v10 = vadd.f32 %v3413_v56, %v6181_v30 }
 0x2af   : > { %v3419_v5 = vpop.f32.mrf.mxu0  ;;  %v3617_v38 = vpop.f32.mrf.mxu1 }
 0x2b0   : > { %v6253_v39 = vadd.f32 %v3610_v7, %v3414_v10  ;;  %v3420_v0 = vadd.f32 %v3419_v5, %v6183_v44 }
 0x2b1   : > { %v3421_v43 = vpop.f32.mrf.mxu0  ;;  %v3619_v33 = vpop.f32.mrf.mxu1 }
 0x2b2   : > { %v6256_v41 = vadd.f32 %v3617_v38, %v3420_v0  ;;  %v3422_v12 = vadd.f32 %v3421_v43, %v6185_v47 }
 0x2b3   : > { %v3427_v27 = vpop.f32.mrf.mxu0  ;;  %v3626_v45 = vpop.f32.mrf.mxu1 }
 0x2b4   : > { %v6259_v19 = vadd.f32 %v3619_v33, %v3422_v12  ;;  %v3428_v28 = vadd.f32 %v3427_v27, %v6187_v32 }
 0x2b5   : > { %v3429_v21 = vpop.f32.mrf.mxu0  ;;  %v3628_v30 = vpop.f32.mrf.mxu1 }
 0x2b6   : > { %v6262_v58 = vadd.f32 %v3626_v45, %v3428_v28  ;;  %v3430_v46 = vadd.f32 %v3429_v21, %v6189_v42 }
 0x2b7   : > { %v3435_v8 = vpop.f32.mrf.mxu0  ;;  %v3635_v44 = vpop.f32.mrf.mxu1 }
 0x2b8   : > { %v6265_v63 = vadd.f32 %v3628_v30, %v3430_v46  ;;  %v3436_v34 = vadd.f32 %v3435_v8, %v6193_v35 }
 0x2b9   : > { %v3437_v23 = vpop.f32.mrf.mxu0  ;;  %v3637_v47 = vpop.f32.mrf.mxu1 }
 0x2ba   : > { %v6268_v55 = vadd.f32 %v3635_v44, %v3436_v34  ;;  %v3438_v54 = vadd.f32 %v3437_v23, %v6197_v62 }
 0x2bb   : > { %v3443_v59 = vpop.f32.mrf.mxu0  ;;  %v3644_v32 = vpop.f32.mrf.mxu1 }
 0x2bc   : > { %v6271_v50 = vadd.f32 %v3637_v47, %v3438_v54  ;;  %v3444_v18 = vadd.f32 %v3443_v59, %v6199_v49 }
 0x2bd   : > { %v3445_v25 = vpop.f32.mrf.mxu0  ;;  %v3646_v42 = vpop.f32.mrf.mxu1 }
 0x2be   : > { %v6274_v20 = vadd.f32 %v3644_v32, %v3444_v18  ;;  %v3446_v60 = vadd.f32 %v3445_v25, %v6201_v15 }
 0x2bf   : > { %v3451_v56 = vpop.f32.mrf.mxu0  ;;  %v3653_v35 = vpop.f32.mrf.mxu1 }
 0x2c0   : > { %v6277_v7 = vadd.f32 %v3646_v42, %v3446_v60  ;;  %v3452_v10 = vadd.f32 %v3451_v56, %v6203_v51 }
 0x2c1   : > { %v3453_v5 = vpop.f32.mrf.mxu0  ;;  %v3655_v62 = vpop.f32.mrf.mxu1 }
 0x2c2   : > { %v6280_v38 = vadd.f32 %v3653_v35, %v3452_v10  ;;  %v3454_v0 = vadd.f32 %v3453_v5, %v6205_v22 }
 0x2c3   : > { %v3459_v43 = vpop.f32.mrf.mxu0  ;;  %v3662_v49 = vpop.f32.mrf.mxu1 }
 0x2c4   : > { %v6283_v33 = vadd.f32 %v3655_v62, %v3454_v0  ;;  %v3460_v12 = vadd.f32 %v3459_v43, %v6207_v11 }
 0x2c5   : > { %v3461_v27 = vpop.f32.mrf.mxu0  ;;  %v3664_v15 = vpop.f32.mrf.mxu1 }
 0x2c6   : > { %v6286_v45 = vadd.f32 %v3662_v49, %v3460_v12  ;;  %v3462_v28 = vadd.f32 %v3461_v27, %v6209_v52 }
 0x2c7   : > { %v3467_v21 = vpop.f32.mrf.mxu0  ;;  %v3671_v51 = vpop.f32.mrf.mxu1 }
 0x2c8   : > { %v6289_v30 = vadd.f32 %v3664_v15, %v3462_v28  ;;  %v3468_v46 = vadd.f32 %v3467_v21, %v6211_v13 }
 0x2c9   : > { %v3469_v8 = vpop.f32.mrf.mxu0  ;;  %v3673_v22 = vpop.f32.mrf.mxu1 }
 0x2ca   : > { %v6292_v44 = vadd.f32 %v3671_v51, %v3468_v46  ;;  %v3470_v34 = vadd.f32 %v3469_v8, %v6213_v53 }
 0x2cb   : > { %v3475_v23 = vpop.f32.mrf.mxu0  ;;  %v3680_v11 = vpop.f32.mrf.mxu1 }
 0x2cc   : > { %v6295_v47 = vadd.f32 %v3673_v22, %v3470_v34  ;;  %v3476_v54 = vadd.f32 %v3475_v23, %v6215_v4 }
 0x2cd   : > { %v3477_v59 = vpop.f32.mrf.mxu0  ;;  %v3682_v52 = vpop.f32.mrf.mxu1 }
 0x2ce   : > { %v6298_v32 = vadd.f32 %v3680_v11, %v3476_v54  ;;  %v3478_v18 = vadd.f32 %v3477_v59, %v6217_v57 }
 0x2cf   : > { %v3483_v25 = vpop.f32.mrf.mxu0  ;;  %v3689_v13 = vpop.f32.mrf.mxu1 }
 0x2d0   : > { %v6301_v42 = vadd.f32 %v3682_v52, %v3478_v18  ;;  %v3484_v60 = vadd.f32 %v3483_v25, %v6219_v14 }
 0x2d1   : > { %v3485_v56 = vpop.f32.mrf.mxu0  ;;  %v3691_v53 = vpop.f32.mrf.mxu1 }
 0x2d2   : > { %v6304_v35 = vadd.f32 %v3689_v13, %v3484_v60  ;;  %v3486_v10 = vadd.f32 %v3485_v56, %v6221_v9 }
 0x2d3   : > { %v3491_v5 = vpop.f32.mrf.mxu0  ;;  %v3698_v4 = vpop.f32.mrf.mxu1 }
 0x2d4   : > { %v6307_v62 = vadd.f32 %v3691_v53, %v3486_v10  ;;  %v3492_v0 = vadd.f32 %v3491_v5, %v6223_v2 }
 0x2d5   : > { %v3493_v43 = vpop.f32.mrf.mxu0  ;;  %v3700_v57 = vpop.f32.mrf.mxu1 }
 0x2d6   : > { %v6310_v49 = vadd.f32 %v3698_v4, %v3492_v0  ;;  %v3494_v12 = vadd.f32 %v3493_v43, %v6225_v6 }
 0x2d7   : > { %v3499_v27 = vpop.f32.mrf.mxu0  ;;  %v3707_v14 = vpop.f32.mrf.mxu1 }
 0x2d8   : > { %v6313_v15 = vadd.f32 %v3700_v57, %v3494_v12  ;;  %v3500_v28 = vadd.f32 %v3499_v27, %v6227_v31 }
 0x2d9   : > { %v3501_v21 = vpop.f32.mrf.mxu0  ;;  %v3709_v9 = vpop.f32.mrf.mxu1 }
 0x2da   : > { %v6316_v51 = vadd.f32 %v3707_v14, %v3500_v28  ;;  %v3502_v46 = vadd.f32 %v3501_v21, %v6229_v26 }
 0x2db   : > { %v3507_v8 = vpop.f32.mrf.mxu0  ;;  %v3716_v2 = vpop.f32.mrf.mxu1 }
 0x2dc   : > { %v6319_v22 = vadd.f32 %v3709_v9, %v3502_v46  ;;  %v3508_v34 = vadd.f32 %v3507_v8, %v6231_v3 }
 0x2dd   : > { %v3509_v23 = vpop.f32.mrf.mxu0  ;;  %v3718_v6 = vpop.f32.mrf.mxu1 }
 0x2de   : > { %v6322_v11 = vadd.f32 %v3716_v2, %v3508_v34  ;;  %v3510_v54 = vadd.f32 %v3509_v23, %v6233_v61 }
 0x2df   : > { %v3515_v59 = vpop.f32.mrf.mxu0  ;;  %v3725_v31 = vpop.f32.mrf.mxu1 }
 0x2e0   : > { %v6325_v52 = vadd.f32 %v3718_v6, %v3510_v54  ;;  %v3516_v18 = vadd.f32 %v3515_v59, %v6235_v36 }
 0x2e1   : > { %v3517_v25 = vpop.f32.mrf.mxu0  ;;  %v3727_v26 = vpop.f32.mrf.mxu1 }
 0x2e2   : > { %v6328_v13 = vadd.f32 %v3725_v31, %v3516_v18  ;;  %v3518_v60 = vadd.f32 %v3517_v25, %v6237_v48 }
 0x2e3   : > { %v6331_v56 = vpop.f32.mrf.mxu0  ;;  %v6333_v3 = vpop.f32.mrf.mxu1 }
 0x2e4   : > { %v6335_v53 = vadd.f32 %v3727_v26, %v3518_v60 }
 0x2e5   : > { %v6337_v10 = vpop.f32.mrf.mxu0  ;;  %v6339_v61 = vpop.f32.mrf.mxu1 }
 0x2e7   : > { %v3812_v5 = vpop.f32.mrf.mxu0  ;;  %v3991_v4 = vpop.f32.mrf.mxu1 }
 0x2e8   : > { %v3813_v48 = vadd.f32 %v3812_v5, %v6244_v40 }
 0x2e9   : > { %v3814_v0 = vpop.f32.mrf.mxu0  ;;  %v3993_v36 = vpop.f32.mrf.mxu1 }
 0x2ea   : > { %v3815_v14 = vadd.f32 %v3814_v0, %v6247_v24  ;;  %v3992_v2 = vadd.f32 %v3991_v4, %v3813_v48 }
 0x2eb   : > { %v3819_v43 = vpop.f32.mrf.mxu0  ;;  %v3998_v57 = vpop.f32.mrf.mxu1 }
 0x2ec   : > { %v3820_v34 = vadd.f32 %v3819_v43, %v6250_v29  ;;  %v3994_v54 = vadd.f32 %v3993_v36, %v3815_v14 }
 0x2ed   : > { %v3821_v12 = vpop.f32.mrf.mxu0  ;;  %v4000_v27 = vpop.f32.mrf.mxu1 }
 0x2ee   : > { %v3822_v18 = vadd.f32 %v3821_v12, %v6253_v39 }
 0x2ef   : > { %v3826_v28 = vpop.f32.mrf.mxu0  ;;  %v4005_v21 = vpop.f32.mrf.mxu1 }
 0x2f0   : > { %v3827_v9 = vadd.f32 %v3826_v28, %v6256_v41  ;;  %v3999_v41 = vadd.f32 %v3998_v57, %v3820_v34  ;;  %v4001_v48 = vadd.f32 %v4000_v27, %v3822_v18 }
 0x2f1   : > { %v3828_v46 = vpop.f32.mrf.mxu0  ;;  %v4007_v8 = vpop.f32.mrf.mxu1 }
 0x2f2   : > { %v4006_v23 = vadd.f32 %v4005_v21, %v3827_v9  ;;  %v3829_v6 = vadd.f32 %v3828_v46, %v6259_v19 }
 0x2f3   : > { %v3833_v59 = vpop.f32.mrf.mxu0  ;;  %v4012_v31 = vpop.f32.mrf.mxu1 }
 0x2f4   : > { %v4101_v40 = vmin.f32 %v3992_v2, %v4006_v23  ;;  %v4008_v25 = vadd.f32 %v4007_v8, %v3829_v6  ;;  %v3834_v24 = vadd.f32 %v3833_v59, %v6262_v58 }
 0x2f5   : > { %v3835_v26 = vpop.f32.mrf.mxu0  ;;  %v4014_v60 = vpop.f32.mrf.mxu1 }
 0x2f6   : > { %v4122_v5 = vmin.f32 %v3994_v54, %v4008_v25  ;;  %v4013_v0 = vadd.f32 %v4012_v31, %v3834_v24  ;;  %v3836_v4 = vadd.f32 %v3835_v26, %v6265_v63 }
 0x2f7   : > { %v3840_v29 = vpop.f32.mrf.mxu0  ;;  %v4019_v43 = vpop.f32.mrf.mxu1 }
 0x2f8   : > { %v4102_v19 = vmin.f32 %v3999_v41, %v4013_v0  ;;  %v4015_v36 = vadd.f32 %v4014_v60, %v3836_v4  ;;  %v3841_v14 = vadd.f32 %v3840_v29, %v6268_v55 }
 0x2f9   : > { %v3842_v28 = vpop.f32.mrf.mxu0  ;;  %v4021_v39 = vpop.f32.mrf.mxu1 }
 0x2fa   : > { %v4123_v12 = vmin.f32 %v4001_v48, %v4015_v36  ;;  %v4020_v21 = vadd.f32 %v4019_v43, %v3841_v14  ;;  %v3843_v58 = vadd.f32 %v3842_v28, %v6271_v50 }
 0x2fb   : > { %v3847_v9 = vpop.f32.mrf.mxu0  ;;  %v4026_v46 = vpop.f32.mrf.mxu1 }
 0x2fc   : > { %v4103_v57 = vmin.f32 %v4101_v40, %v4020_v21  ;;  %v4022_v8 = vadd.f32 %v4021_v39, %v3843_v58  ;;  %v3848_v2 = vadd.f32 %v3847_v9, %v6274_v20 }
 0x2fd   : > { %v3849_v63 = vpop.f32.mrf.mxu0  ;;  %v4028_v34 = vpop.f32.mrf.mxu1 }
 0x2fe   : > { %v4124_v23 = vmin.f32 %v4122_v5, %v4022_v8  ;;  %v4027_v27 = vadd.f32 %v4026_v46, %v3848_v2  ;;  %v3850_v6 = vadd.f32 %v3849_v63, %v6277_v7 }
 0x2ff   : > { %v3854_v54 = vpop.f32.mrf.mxu0  ;;  %v4033_v55 = vpop.f32.mrf.mxu1 }
 0x300   : > { %v4104_v59 = vmin.f32 %v4102_v19, %v4027_v27  ;;  %v4029_v31 = vadd.f32 %v4028_v34, %v3850_v6  ;;  %v3855_v18 = vadd.f32 %v3854_v54, %v6280_v38 }
 0x301   : > { %v3856_v25 = vpop.f32.mrf.mxu0  ;;  %v4035_v50 = vpop.f32.mrf.mxu1 }
 0x302   : > { %v4125_v24 = vmin.f32 %v4123_v12, %v4029_v31  ;;  %v4034_v26 = vadd.f32 %v4033_v55, %v3855_v18  ;;  %v3857_v40 = vadd.f32 %v3856_v25, %v6283_v33 }
 0x303   : > { %v3861_v60 = vpop.f32.mrf.mxu0  ;;  %v4040_v20 = vpop.f32.mrf.mxu1 }
 0x304   : > { %v4105_v41 = vmin.f32 %v4103_v57, %v4034_v26  ;;  %v4036_v0 = vadd.f32 %v4035_v50, %v3857_v40  ;;  %v3862_v5 = vadd.f32 %v3861_v60, %v6286_v45 }
 0x305   : > { %v3863_v4 = vpop.f32.mrf.mxu0  ;;  %v4042_v7 = vpop.f32.mrf.mxu1 }
 0x306   : > { %v4126_v29 = vmin.f32 %v4124_v23, %v4036_v0  ;;  %v4041_v43 = vadd.f32 %v4040_v20, %v3862_v5  ;;  %v3864_v48 = vadd.f32 %v3863_v4, %v6289_v30 }
 0x307   : > { %v3868_v19 = vpop.f32.mrf.mxu0  ;;  %v4047_v38 = vpop.f32.mrf.mxu1 }
 0x308   : > { %v4106_v36 = vmin.f32 %v4104_v59, %v4041_v43  ;;  %v4043_v14 = vadd.f32 %v4042_v7, %v3864_v48  ;;  %v3869_v28 = vadd.f32 %v3868_v19, %v6292_v44 }
 0x309   : > { %v3870_v39 = vpop.f32.mrf.mxu0  ;;  %v4049_v33 = vpop.f32.mrf.mxu1 }
 0x30a   : > { %v4127_v12 = vmin.f32 %v4125_v24, %v4043_v14  ;;  %v4048_v21 = vadd.f32 %v4047_v38, %v3869_v28  ;;  %v3871_v58 = vadd.f32 %v3870_v39, %v6295_v47 }
 0x30b   : > { %v3875_v9 = vpop.f32.mrf.mxu0  ;;  %v4054_v45 = vpop.f32.mrf.mxu1 }
 0x30c   : > { %v4107_v46 = vmin.f32 %v4105_v41, %v4048_v21  ;;  %v4050_v57 = vadd.f32 %v4049_v33, %v3871_v58  ;;  %v3876_v8 = vadd.f32 %v3875_v9, %v6298_v32 }
 0x30d   : > { %v3877_v2 = vpop.f32.mrf.mxu0  ;;  %v4056_v30 = vpop.f32.mrf.mxu1 }
 0x30e   : > { %v4128_v63 = vmin.f32 %v4126_v29, %v4050_v57  ;;  %v4055_v34 = vadd.f32 %v4054_v45, %v3876_v8  ;;  %v3878_v23 = vadd.f32 %v3877_v2, %v6301_v42 }
 0x30f   : > { %v3882_v27 = vpop.f32.mrf.mxu0  ;;  %v4061_v44 = vpop.f32.mrf.mxu1 }
 0x310   : > { %v4108_v6 = vmin.f32 %v4106_v36, %v4055_v34  ;;  %v4057_v54 = vadd.f32 %v4056_v30, %v3878_v23  ;;  %v3883_v55 = vadd.f32 %v3882_v27, %v6304_v35 }
 0x311   : > { %v3884_v59 = vpop.f32.mrf.mxu0  ;;  %v4063_v47 = vpop.f32.mrf.mxu1 }
 0x312   : > { %v4129_v31 = vmin.f32 %v4127_v12, %v4057_v54  ;;  %v4062_v18 = vadd.f32 %v4061_v44, %v3883_v55  ;;  %v3885_v25 = vadd.f32 %v3884_v59, %v6307_v62  ;;  %v3524_v12 = vadd.f32 %v6331_v56, %v6239_v16 }
 0x313   : > { %v3889_v50 = vpop.f32.mrf.mxu0  ;;  %v4068_v32 = vpop.f32.mrf.mxu1 }
 0x314   : > { %v4109_v24 = vmin.f32 %v4107_v46, %v4062_v18  ;;  %v4064_v26 = vadd.f32 %v4063_v47, %v3885_v25  ;;  %v3890_v40 = vadd.f32 %v3889_v50, %v6310_v49  ;;  %v3735_v30 = vadd.f32 %v6333_v3, %v3524_v12 }
 0x315   : > { %v3891_v60 = vpop.f32.mrf.mxu0  ;;  %v4070_v42 = vpop.f32.mrf.mxu1 }
 0x316   : > { %v4130_v20 = vmin.f32 %v4128_v63, %v4064_v26  ;;  %v4069_v41 = vadd.f32 %v4068_v32, %v3890_v40  ;;  %v3892_v0 = vadd.f32 %v3891_v60, %v6313_v15  ;;  %v4519_v40 = vmov 1966171168  }
 0x317   : > { %v3896_v5 = vpop.f32.mrf.mxu0  ;;  %v4075_v35 = vpop.f32.mrf.mxu1  ;;  %v4153_v60 = vunpack.c.l.s4 %v4519_v40 }
 0x318   : > { %v4110_v4 = vmin.f32 %v4108_v6, %v4069_v41  ;;  %v4071_v7 = vadd.f32 %v4070_v42, %v3892_v0  ;;  %v3897_v29 = vadd.f32 %v3896_v5, %v6316_v51  ;;  %v4155_v42 = vlaneseq }
 0x319   : > { %v3898_v43 = vpop.f32.mrf.mxu0  ;;  %v4077_v62 = vpop.f32.mrf.mxu1 }
 0x31a   : > { %v4131_v48 = vmin.f32 %v4129_v31, %v4071_v7  ;;  %v4076_v19 = vadd.f32 %v4075_v35, %v3897_v29  ;;  %v3899_v38 = vadd.f32 %v3898_v43, %v6319_v22  ;;  %v3526_v22 = vadd.f32 %v6337_v10, %v6241_v1 }
 0x31b   : > { %v3903_v36 = vpop.f32.mrf.mxu0  ;;  %v4082_v49 = vpop.f32.mrf.mxu1  ;;  %v4154_v35 = vunpack.c.0.s8 %v4153_v60  ;;  %vm6379_vm1 = vcmp.lt.s32.totalorder %v4155_v42, 256 }
 0x31c   : > { %v4111_v14 = vmin.f32 %v4109_v24, %v4076_v19  ;;  %v4078_v28 = vadd.f32 %v4077_v62, %v3899_v38  ;;  %v3904_v39 = vadd.f32 %v3903_v36, %v6322_v11 }
 0x31d   : > { %v3905_v33 = vpop.f32.mrf.mxu0  ;;  %v4084_v15 = vpop.f32.mrf.mxu1 }
 0x31e   : > { %v4132_v21 = vmin.f32 %v4130_v20, %v4078_v28  ;;  %v4083_v58 = vadd.f32 %v4082_v49, %v3904_v39  ;;  %v3906_v51 = vadd.f32 %v3905_v33, %v6325_v52  ;;  %v3737_v52 = vadd.f32 %v6339_v61, %v3526_v22 }
 0x31f   : > { %v3910_v9 = vpop.f32.mrf.mxu0  ;;  %v4089_v45 = vpop.f32.mrf.mxu1 }
 0x320   : > { %v4112_v46 = vmin.f32 %v4110_v4, %v4083_v58  ;;  %v4085_v57 = vadd.f32 %v4084_v15, %v3906_v51  ;;  %v3911_v8 = vadd.f32 %v3910_v9, %v6328_v13  ;;  %v4156_v4 = vshrl.u32 %v4155_v42, 7 }
 0x321   : > { %v3912_v2 = vpop.f32.mrf.mxu0  ;;  %v4091_v11 = vpop.f32.mrf.mxu1 }
 0x322   : > { %v4133_v63 = vmin.f32 %v4131_v48, %v4085_v57  ;;  %v4090_v34 = vadd.f32 %v4089_v45, %v3911_v8  ;;  %v3913_v16 = vadd.f32 %v3912_v2, %v6335_v53  ;;  %v4157_v62 = vsub.s32 %v4154_v35, %v4156_v4 }
 0x323   : > { %v3917_v56 = vpop.f32.mrf.mxu0  ;;  %v4096_v23 = vpop.f32.mrf.mxu1 }
 0x324   : > { %v4113_v27 = vmin.f32 %v4111_v14, %v4090_v34  ;;  %v4092_v44 = vadd.f32 %v4091_v11, %v3913_v16  ;;  %v3918_v6 = vadd.f32 %v3917_v56, %v3735_v30 }
 0x325   : > { %v3919_v1 = vpop.f32.mrf.mxu0  ;;  %v4098_v13 = vpop.f32.mrf.mxu1 }
 0x326   : > { %v4134_v10 = vmin.f32 %v4132_v21, %v4092_v44  ;;  %v4097_v54 = vadd.f32 %v4096_v23, %v3918_v6  ;;  %v3920_v55 = vadd.f32 %v3919_v1, %v3737_v52 }
 0x328   : > { %v4114_v59 = vmin.f32 %v4112_v46, %v4097_v54  ;;  %v4099_v47 = vadd.f32 %v4098_v13, %v3920_v55 }
 0x32a   : > { %v4115_v31 = vmin.f32 %v4113_v27, %v4114_v59  ;;  %v4135_v3 = vmin.f32 %v4133_v63, %v4099_v47 }
 0x32c   : > { %v4116_v18 = vrot.slane %v4115_v31, 4  ;;  %v4136_v25 = vmin.f32 %v4134_v10, %v4135_v3 }
 0x32e   : > { %v4117_v50 = vmin.f32 %v4115_v31, %v4116_v18  ;;  %v4137_v53 = vrot.slane %v4136_v25, 4 }
 0x330   : > { %v4118_v32 = vrot.slane %v4117_v50, 2  ;;  %v4138_v24 = vmin.f32 %v4136_v25, %v4137_v53 }
 0x332   : > { %v4119_v26 = vmin.f32 %v4117_v50, %v4118_v32  ;;  %v4139_v61 = vrot.slane %v4138_v24, 2 }
 0x334   : > { %v4120_v20 = vrot.slane %v4119_v26, 1  ;;  %v4140_v41 = vmin.f32 %v4138_v24, %v4139_v61 }
 0x336   : > { %v4121_v0 = vmin.f32 %v4119_v26, %v4120_v20  ;;  %v4141_v5 = vrot.slane %v4140_v41, 1 }
 0x338   : > { %v4143_v7 = vmin.f32 %v6191_v37, %v4121_v0  ;;  %v4142_v29 = vmin.f32 %v4140_v41, %v4141_v5 }
 0x33a   : > { %v4144_v43 = vmin.f32 %v6195_v17, %v4142_v29 }
 0x33c   : > { %v4151_v48 = vcombine.low %v4143_v7, %v4144_v43 }
 0x33e   : > { %v4158_v19 = vrot.slane %v4151_v48, %v4157_v62 }
 0x340   : > { %v4165_v36 = vrot.slane %v4158_v19, %v4157_v62 }
 0x342   : > { %4171 = vst.msk [vmem:[#allocation2] sm:$0x3] %vm6379_vm1, %v4165_v36 }
 0x349   : > { %v4204_v49 = vld [vmem:[#allocation2] sm:$0x3] }
 0x34a   : > { %v4205_v14 = vmax.f32 %v4204_v49, 0.0 }
 0x34c   : > { %4438 = vrsqrt.f32 %v4205_v14  ;;  %vm4208_vm2 = vcmp.eq.f32.partialorder %v4205_v14, inf  ;;  %v4211_v28 = vand.u32 2147483648, %v4205_v14  ;;  %vm4210_vm3 = vcmp.eq.f32.partialorder %v4205_v14, 0.0 }
 0x359   : > { %v4439_v37 = vpop.eup %4438 }
 0x35a   : > { %v4207_v17 = vmul.f32 %v4439_v37, %v4205_v14 }
 0x35c   : > { %v4209_v39 = vsel %vm4208_vm2, %v4205_v14, %v4207_v17 }
 0x35d   : > { %v4212_v33 = vsel %vm4210_vm3, %v4211_v28, %v4209_v39 }
 0x35e   : > { %4217 = vst.msk [vmem:[%s194_s7] sm:$0x3] %vm6379_vm1, %v4212_v33 }
 0x35f   : > { %4453 = shalt.err (!%p4450_p5)
}
 0x360   : > { %s4454_s26 = scalar_lea.hbm %s6390_s18, 32  ;;  %s4458_s29 = scalar_lea.hbm %s6434_s2, 64 }
 0x361   : > { %p4455_p6 = scmp.ne.s32.totalorder %s6390_s18, %s4454_s26  ;;  %p4459_p10 = scmp.lt.s32.totalorder %s6390_s18, %s6434_s2 }
 0x362   : > { %p4460_p11 = scmp.lt.s32.totalorder %s4458_s29, %s4454_s26 }
 0x363   : > { %p4456_p7 = pnand %p4455_p6, %p4576_p4 }
 0x364   : > { %p4461_p12 = por %p4460_p11, %p4459_p10 }
 0x365   : > { %p4457_p9 = pneg %p4456_p7 }
 0x367   : > { %p4462_p13 = pnand %p4461_p12, %p4457_p9 }
 0x369   : > { %4465 = shalt.err (!%p4462_p13)
}
 0x36a   : > { %4381 = dma.vmem_to_hbm [thread:$0]  (%p4576_p4), %s4236_s8, 32, %s6390_s18, %s4219_s20  }
 0x36b PF: > { %p4387_p0 = scmp.ge.s32.totalorder %s4516_s14, 2  ;;  %s4247_s4 = sand.u32 1, %s4496_s9  }
 0x36c   : > { %s4248_s5 = scalar_lea.sflag [#allocation4], %s4247_s4 }
 0x36d   : > { %p4384_p1 = pnand %p4387_p0, %p4583_p8 }
 0x36f   : > { %p4385_p2 = pneg %p4384_p1 }
 0x371   : > { %4491 = dma.done.wait (%p4385_p2), %s4248_s5, 32  }
 0x372   : > { %4493 = vsyncadd (%p4385_p2), %s4248_s5, 4294967264  ;;  %s15_s14 = sadd.s32 1, %s4516_s14   ;;  %s6635_s9 = smov %s4500_s10 }
 0x373   : > { %p12_p3 = scmp.ge.s32.totalorder %s15_s14, 4   ;;  %s6636_s10 = smov %s4504_s11 }
 0x374   : > { %s6637_s11 = smov %s4589_s22  ;;  %s6638_s12 = smov %s4512_s13 }
 0x375   : > { %s6639_s13 = smov %s6641_s17  ;;  %14 = sbr.rel (!%p12_p3) target bundleno = 4 (0x4), region = 80 }
 0x37a   :  { %4253 = vsyncpa [#allocation4], 1 }
 0x37b   :  { %4255 = vsyncpa [#allocation4 + $0x1], 1 }

</bundles_post_ra>
